<compile_context>
chip_gen: v7x
topology: tpu7x:2x2x1
jax: 0.10.0
libtpu: 0.0.40
codegen_flags: <defaults>
</compile_context>

<pallas_src>
import math
import functools

import jax
import jax.numpy as jnp
from jax.experimental import pallas as pl
from jax.experimental.pallas import tpu as pltpu


# Row indices of the packed per-layer vector-parameter array (L, 8, d).
VP_LN1_W, VP_LN1_B, VP_ATTN_B, VP_LN2_W, VP_LN2_B, VP_PROJ_B = range(6)


# ----------------------------------------------------------------------------
# In-kernel helpers
# ----------------------------------------------------------------------------
def _layernorm_onepass(x32, w, b, eps=1e-5):
    """fp32 LayerNorm; one pass (E[x], E[x^2]) -> half the cross-lane reductions."""
    inv_d = 1.0 / x32.shape[-1]
    mean = jnp.sum(x32, axis=-1, keepdims=True) * inv_d
    meansq = jnp.sum(x32 * x32, axis=-1, keepdims=True) * inv_d
    var = jnp.maximum(meansq - mean * mean, 0.0)
    return (x32 - mean) * jax.lax.rsqrt(var + eps) * w + b


# ----------------------------------------------------------------------------
# Kernel: one grid step = one ResidualAttentionBlock applied to one batch tile
# ----------------------------------------------------------------------------
def transformer_kernel(x_ref,
                       wqkv_ref, wo_ref, wfc_ref, wpr_ref,
                       vecp_ref, bqkv_ref, bfc_ref,
                       o_ref,
                       qkv_scr, ctx_scr,
                       *, num_heads, block_batch, ffn_chunk, compute_dtype):
    """x_ref / o_ref blocks: (block_batch * n, d) flattened token slab.
    Weight refs are (1, ...) slices of per-layer-stacked parameters.
    The output block is resident across the layer grid axis (running act)."""
    layer = pl.program_id(1)

    rows, d = o_ref.shape
    n = rows // block_batch
    hd = d // num_heads
    ffn = wfc_ref.shape[-1]

    # Layer 0: bring the input activations into the resident output block.
    @pl.when(layer == 0)
    def _():
        o_ref[...] = x_ref[...]

    x = o_ref[...].astype(jnp.float32)                       # (rows, d) f32
    vp = vecp_ref[0]                                         # (8, d) f32

    # --------------- attention branch: x + out_proj(MHA(LN1(x))) ------------
    xl = _layernorm_onepass(x, vp[VP_LN1_W], vp[VP_LN1_B])
    qkv = jnp.dot(xl.astype(compute_dtype), wqkv_ref[0],
                  preferred_element_type=jnp.float32) + bqkv_ref[0]
    qkv_scr[...] = qkv                                       # (rows, 3d) f32 scratch

    def attend_sample(b, carry):
        r0 = pl.multiple_of(b * n, 8)                        # aligned row offset
        for h in range(num_heads):                           # static lane offsets
            c0 = h * hd
            qh = qkv_scr[pl.ds(r0, n), c0:c0 + hd].astype(compute_dtype)
            kh = qkv_scr[pl.ds(r0, n), d + c0:d + c0 + hd].astype(compute_dtype)
            vh = qkv_scr[pl.ds(r0, n), 2 * d + c0:2 * d + c0 + hd].astype(compute_dtype)
            # scores: q @ k^T (the 1/sqrt(hd) scale is folded into q weights)
            s = jax.lax.dot_general(qh, kh, (((1,), (1,)), ((), ())),
                                    preferred_element_type=jnp.float32)
            s = s - jnp.max(s, axis=-1, keepdims=True)
            p = jnp.exp(s)
            p = p * pl.reciprocal(jnp.sum(p, axis=-1, keepdims=True), approx=True)
            ctx = jnp.dot(p.astype(compute_dtype), vh,
                          preferred_element_type=jnp.float32)   # (n, hd)
            ctx_scr[pl.ds(r0, n), c0:c0 + hd] = ctx
        return carry

    jax.lax.fori_loop(0, block_batch, attend_sample, 0,
                      unroll=(block_batch * num_heads <= 16))

    # Single full-contraction-depth output projection over all heads at once.
    attn = jnp.dot(ctx_scr[...].astype(compute_dtype), wo_ref[0],
                   preferred_element_type=jnp.float32)
    x = x + attn + vp[VP_ATTN_B]

    # --------------- MLP branch: x + c_proj(QuickGELU(c_fc(LN2(x)))) --------
    xl2 = _layernorm_onepass(x, vp[VP_LN2_W], vp[VP_LN2_B])
    xl2_lp = xl2.astype(compute_dtype)

    n_chunks = ffn // ffn_chunk
    if n_chunks <= 1:
        h1 = jnp.dot(xl2_lp, wfc_ref[0],
                     preferred_element_type=jnp.float32) + bfc_ref[0]
        h1 = h1 * jax.nn.sigmoid(1.702 * h1)                 # QuickGELU (f32)
        mlp = jnp.dot(h1.astype(compute_dtype), wpr_ref[0],
                      preferred_element_type=jnp.float32)
    else:
        # Chunk the 4d hidden axis: the (rows, 4d) f32 intermediate never
        # materializes; live range is (rows, ffn_chunk) + the f32 accumulator.
        def mlp_chunk(c, acc):
            c0 = pl.multiple_of(c * ffn_chunk, ffn_chunk)
            h1 = jnp.dot(xl2_lp, wfc_ref[0, :, pl.ds(c0, ffn_chunk)],
                         preferred_element_type=jnp.float32)
            h1 = h1 + bfc_ref[0, :, pl.ds(c0, ffn_chunk)]
            h1 = h1 * jax.nn.sigmoid(1.702 * h1)
            return acc + jnp.dot(h1.astype(compute_dtype),
                                 wpr_ref[0, pl.ds(c0, ffn_chunk), :],
                                 preferred_element_type=jnp.float32)

        mlp = jax.lax.fori_loop(0, n_chunks, mlp_chunk,
                                jnp.zeros((rows, d), jnp.float32),
                                unroll=(n_chunks <= 2))

    o_ref[...] = (x + mlp + vp[VP_PROJ_B]).astype(o_ref.dtype)


# ----------------------------------------------------------------------------
# Wrapper
# ----------------------------------------------------------------------------
def _default_vmem_limit_bytes():
    """Generation-aware scoped-VMEM limit: ~48 MiB on v7x, ~96 MiB on v5e/v6e."""
    try:
        cap = int(pltpu.get_tpu_info().vmem_capacity_bytes)
    except Exception:
        cap = 128 * 1024 * 1024
    return max(32 * 1024 * 1024, cap * 3 // 4)


def _pick_block_batch(bt, n, d, vmem_limit_bytes):
    """Rows target that keeps the kernel MXU-bound but inside VMEM, and keeps
    >= 2 batch tiles so v7x's two TensorCores both get work."""
    weight_bytes = 2 * (12 * d * d) * 2          # double-buffered bf16 weights
    avail = max(vmem_limit_bytes - weight_bytes, 4 << 20)
    # per-row VMEM: f32 in/out act blocks + f32 qkv/ctx scratch + f32 temps
    per_row = 3 * (4 * d) + 4 * (3 * d) + 4 * d + 4 * (3 * d)
    vmem_rows = max(n, avail // max(per_row, 1))
    target_rows = 2048 if vmem_limit_bytes >= (96 << 20) else 768
    cap = max(1, int(min(vmem_rows, target_rows)) // n)
    if bt >= 2:
        cap = min(cap, max(1, bt // 2))          # >= 2 batch tiles (megacore)
    return next(t for t in range(min(bt, cap), 0, -1) if bt % t == 0)


def transformer_forward(x_nbd, packed_params, num_heads, *, block_batch=None,
                        ffn_chunk=None, vmem_limit_bytes=None,
                        compute_dtype=jnp.bfloat16):
    """x_nbd: (n, bt, d) seq-first, like the PyTorch module."""
    n, bt, d = x_nbd.shape
    num_layers = packed_params[0].shape[0]
    assert d % num_heads == 0
    assert n % 8 == 0, "pad the sequence length to a multiple of 8"

    if vmem_limit_bytes is None:
        vmem_limit_bytes = _default_vmem_limit_bytes()
    if block_batch is None:
        block_batch = _pick_block_batch(bt, n, d, vmem_limit_bytes)
    tb = block_batch
    assert bt % tb == 0
    rows = tb * n

    ffn = 4 * d
    if ffn_chunk is None:
        if ffn <= 1024:
            ffn_chunk = ffn
        else:
            cands = [c for c in range(128, 1025, 128) if ffn % c == 0]
            ffn_chunk = max(cands) if cands else ffn
    assert ffn % ffn_chunk == 0
    assert ffn_chunk == ffn or ffn_chunk % 128 == 0

    # Lane-dense 2-D token slab, flattened outside the kernel (free in XLA).
    x2 = jnp.transpose(x_nbd, (1, 0, 2)).reshape(bt * n, d)

    def act_map(b, l):
        return (b, 0)

    def w_map(b, l):
        return (l, 0, 0)

    w_specs = [pl.BlockSpec((1,) + tuple(p.shape[1:]), w_map)
               for p in packed_params]
    out_spec = pl.BlockSpec((rows, d), act_map)

    kernel = functools.partial(transformer_kernel,
                               num_heads=num_heads, block_batch=tb,
                               ffn_chunk=ffn_chunk, compute_dtype=compute_dtype)

    def build_and_run(single_buffer_x):
        if single_buffer_x:
            # x is only read at layer == 0 and its block index never changes
            # along the layer axis -> a second input buffer is pure waste.
            x_spec = pl.BlockSpec((rows, d), act_map,
                                  pipeline_mode=pl.Buffered(1))
        else:
            x_spec = pl.BlockSpec((rows, d), act_map)
        call = pl.pallas_call(
            kernel,
            out_shape=jax.ShapeDtypeStruct((bt * n, d), x2.dtype),
            grid=(bt // tb, num_layers),
            in_specs=[x_spec] + w_specs,
            out_specs=out_spec,
            scratch_shapes=[pltpu.VMEM((rows, 3 * d), jnp.float32),   # qkv
                            pltpu.VMEM((rows, d), jnp.float32)],      # ctx
            compiler_params=pltpu.CompilerParams(
                dimension_semantics=("parallel", "arbitrary"),
                vmem_limit_bytes=int(vmem_limit_bytes)),
        )
        return call(x2, *packed_params)

    try:
        out2 = build_and_run(True)
    except Exception:
        out2 = build_and_run(False)

    return jnp.transpose(out2.reshape(bt, n, d), (1, 0, 2))


# ----------------------------------------------------------------------------
# Parameter init (PyTorch checkpoint layout) + packing for the kernel
# ----------------------------------------------------------------------------
def init_layer_params(key, d):
    ks = jax.random.split(key, 12)
    s = 0.02
    return dict(
        in_proj_w=jax.random.normal(ks[0], (3 * d, d), jnp.float32) * s,
        in_proj_b=jax.random.normal(ks[1], (3 * d,), jnp.float32) * s,
        out_w=jax.random.normal(ks[2], (d, d), jnp.float32) * s,
        out_b=jax.random.normal(ks[3], (d,), jnp.float32) * s,
        ln1_w=1.0 + 0.1 * jax.random.normal(ks[4], (d,), jnp.float32),
        ln1_b=0.1 * jax.random.normal(ks[5], (d,), jnp.float32),
        ln2_w=1.0 + 0.1 * jax.random.normal(ks[6], (d,), jnp.float32),
        ln2_b=0.1 * jax.random.normal(ks[7], (d,), jnp.float32),
        fc_w=jax.random.normal(ks[8], (4 * d, d), jnp.float32) * s,
        fc_b=jax.random.normal(ks[9], (4 * d,), jnp.float32) * s,
        proj_w=jax.random.normal(ks[10], (d, 4 * d), jnp.float32) * s,
        proj_b=jax.random.normal(ks[11], (d,), jnp.float32) * s,
    )


def pack_params(raw_layers, num_heads, compute_dtype=jnp.bfloat16):
    """Transpose, fuse QKV, fold 1/sqrt(hd) into Q, cast matmul weights to
    bf16, consolidate small f32 vectors, stack per layer along a leading axis.
    Returns (wqkv, wo, wfc, wpr, vecp, bqkv, bfc)."""
    d = raw_layers[0]["ln1_w"].shape[0]
    hd = d // num_heads
    scale = 1.0 / math.sqrt(hd)

    def one(r):
        wq, wk, wv = jnp.split(r["in_proj_w"], 3, axis=0)            # (d, d) each
        bq, bk, bv = jnp.split(r["in_proj_b"], 3)
        wqkv = jnp.concatenate([wq.T * scale, wk.T, wv.T], axis=1)   # (d, 3d)
        bqkv = jnp.concatenate([bq * scale, bk, bv]).reshape(1, 3 * d)
        vecp = jnp.zeros((8, d), jnp.float32)
        vecp = vecp.at[VP_LN1_W].set(r["ln1_w"]).at[VP_LN1_B].set(r["ln1_b"])
        vecp = vecp.at[VP_ATTN_B].set(r["out_b"])
        vecp = vecp.at[VP_LN2_W].set(r["ln2_w"]).at[VP_LN2_B].set(r["ln2_b"])
        vecp = vecp.at[VP_PROJ_B].set(r["proj_b"])
        return (wqkv.astype(compute_dtype),
                r["out_w"].T.astype(compute_dtype),
                r["fc_w"].T.astype(compute_dtype),
                r["proj_w"].T.astype(compute_dtype),
                vecp.astype(jnp.float32),
                bqkv.astype(jnp.float32),
                r["fc_b"].reshape(1, 4 * d).astype(jnp.float32))

    per_layer = [one(r) for r in raw_layers]
    return tuple(jnp.stack([lp[i] for lp in per_layer], axis=0)
                 for i in range(len(per_layer[0])))


# ----------------------------------------------------------------------------
# Pure-JAX fp32 reference (PyTorch semantics) for the correctness check
# ----------------------------------------------------------------------------
def _layernorm_ref(x32, w, b, eps=1e-5):
    mu = jnp.mean(x32, axis=-1, keepdims=True)
    var = jnp.mean((x32 - mu) ** 2, axis=-1, keepdims=True)
    return (x32 - mu) * jax.lax.rsqrt(var + eps) * w + b


def ref_resblock(x_bnd, r, num_heads):
    bt, n, d = x_bnd.shape
    hd = d // num_heads
    xl = _layernorm_ref(x_bnd.astype(jnp.float32), r["ln1_w"], r["ln1_b"])
    qkv = xl @ r["in_proj_w"].T + r["in_proj_b"]
    q, k, v = jnp.split(qkv, 3, axis=-1)

    def heads(t):
        return t.reshape(bt, n, num_heads, hd).transpose(0, 2, 1, 3)

    q = heads(q) * (1.0 / math.sqrt(hd))
    k = heads(k)
    v = heads(v)
    s = jnp.einsum("bhqd,bhkd->bhqk", q, k)
    p = jax.nn.softmax(s, axis=-1)
    ctx = jnp.einsum("bhqk,bhkd->bhqd", p, v).transpose(0, 2, 1, 3).reshape(bt, n, d)
    attn = ctx @ r["out_w"].T + r["out_b"]
    x = x_bnd + attn
    xl2 = _layernorm_ref(x, r["ln2_w"], r["ln2_b"])
    h = xl2 @ r["fc_w"].T + r["fc_b"]
    h = h * jax.nn.sigmoid(1.702 * h)
    return x + h @ r["proj_w"].T + r["proj_b"]


def ref_transformer(x_nbd, raw_layers, num_heads):
    x = jnp.transpose(x_nbd, (1, 0, 2))
    for r in raw_layers:
        x = ref_resblock(x, r, num_heads)
    return jnp.transpose(x, (1, 0, 2))


# ----------------------------------------------------------------------------
if __name__ == "__main__":
    # Small config consistent with the module's forward:
    #   vision_width=128, vision_heads=2 (head_dim 64), vision_layers=2.
    #   Input x: (n, bt, d) = (seq, batch*time, width), seq-first.
    n, bt, d = 8, 4, 128
    num_heads = 2
    num_layers = 2

    key = jax.random.PRNGKey(0)
    kx, kp = jax.random.split(key)
    x = jax.random.normal(kx, (n, bt, d), jnp.float32)

    layer_keys = jax.random.split(kp, num_layers)
    raw_layers = [init_layer_params(layer_keys[i], d) for i in range(num_layers)]
    packed = pack_params(raw_layers, num_heads)

    # block_batch=2 -> 2 batch tiles on the "parallel" axis (megacore-friendly);
    # ffn_chunk=256 exercises the chunked-MLP path at this width (4d=512 -> 2 chunks).
    out = transformer_forward(x, packed, num_heads, block_batch=2, ffn_chunk=256)
    out = jax.block_until_ready(out)

    ref = ref_transformer(x, raw_layers, num_heads)
    assert out.shape == (n, bt, d)
    max_err = float(jnp.max(jnp.abs(out - ref)))
    # bf16 matmul inputs (f32 accumulation) + approx reciprocal vs fp32 ref.
    assert jnp.allclose(out, ref, atol=5e-2, rtol=5e-2), (
        f"mismatch vs JAX reference, max|diff|={max_err}")

    print("KERNEL_OK")
</pallas_src>

<mosaic_0001>
module attributes {stable_mosaic.version = 11 : i64} {
  func.func @transformer_kernel(%arg0: i32, %arg1: i32, %arg2: memref<16x128xf32, #tpu.memory_space<vmem>>, %arg3: memref<1x128x384xbf16, #tpu.memory_space<vmem>>, %arg4: memref<1x128x128xbf16, #tpu.memory_space<vmem>>, %arg5: memref<1x128x512xbf16, #tpu.memory_space<vmem>>, %arg6: memref<1x512x128xbf16, #tpu.memory_space<vmem>>, %arg7: memref<1x8x128xf32, #tpu.memory_space<vmem>>, %arg8: memref<1x1x384xf32, #tpu.memory_space<vmem>>, %arg9: memref<1x1x512xf32, #tpu.memory_space<vmem>>, %arg10: memref<16x128xf32, #tpu.memory_space<vmem>>, %arg11: memref<16x384xf32, #tpu.memory_space<vmem>>, %arg12: memref<16x128xf32, #tpu.memory_space<vmem>>) attributes {dimension_semantics = [#tpu.dimension_semantics<parallel>, #tpu.dimension_semantics<arbitrary>], iteration_bounds = array<i64: 2, 2>, scalar_prefetch = 0 : i64, scratch_operands = 2 : i64, tpu.core_type = #tpu.core_type<tc>, window_params = [{pipeline_mode = #tpu.pipeline_mode<synchronous>, transform_indices = @transform_0, window_bounds = array<i64: 16, 128>}, {transform_indices = @transform_1, window_bounds = array<i64: 1, 128, 384>}, {transform_indices = @transform_2, window_bounds = array<i64: 1, 128, 128>}, {transform_indices = @transform_3, window_bounds = array<i64: 1, 128, 512>}, {transform_indices = @transform_4, window_bounds = array<i64: 1, 512, 128>}, {transform_indices = @transform_5, window_bounds = array<i64: 1, 8, 128>}, {transform_indices = @transform_6, window_bounds = array<i64: 1, 1, 384>}, {transform_indices = @transform_7, window_bounds = array<i64: 1, 1, 512>}, {transform_indices = @transform_8, window_bounds = array<i64: 16, 128>}]} {
    %c0_i32 = arith.constant 0 : i32
    %0 = arith.cmpi eq, %arg1, %c0_i32 : i32
    %1 = arith.extui %0 : i1 to i32
    %c0_i32_0 = arith.constant 0 : i32
    %2 = arith.cmpi ne, %1, %c0_i32_0 : i32
    scf.if %2 {
      %c0_87 = arith.constant 0 : index
      %c0_88 = arith.constant 0 : index
      %245 = vector.load %arg2[%c0_87, %c0_88] : memref<16x128xf32, #tpu.memory_space<vmem>>, vector<16x128xf32>
      %c0_89 = arith.constant 0 : index
      %c0_90 = arith.constant 0 : index
      %246 = vector.load %arg10[%c0_89, %c0_90] : memref<16x128xf32, #tpu.memory_space<vmem>>, vector<16x128xf32>
      tpu.vector_store %arg10[%c0_89, %c0_90], %245 {strides = array<i32>} : memref<16x128xf32, #tpu.memory_space<vmem>>, vector<16x128xf32>,
    } else {
    }
    %c0 = arith.constant 0 : index
    %c0_1 = arith.constant 0 : index
    %3 = vector.load %arg10[%c0, %c0_1] : memref<16x128xf32, #tpu.memory_space<vmem>>, vector<16x128xf32>
    %c0_2 = arith.constant 0 : index
    %c0_3 = arith.constant 0 : index
    %c0_4 = arith.constant 0 : index
    %4 = vector.load %arg7[%c0_2, %c0_3, %c0_4] : memref<1x8x128xf32, #tpu.memory_space<vmem>>, vector<1x8x128xf32>
    %5 = vector.shape_cast %4 : vector<1x8x128xf32> to vector<8x128xf32>
    %6 = vector.extract_strided_slice %5 {offsets = [0, 0], sizes = [1, 128], strides = [1, 1]} : vector<8x128xf32> to vector<1x128xf32>
    %7 = vector.shape_cast %6 : vector<1x128xf32> to vector<128xf32>
    %8 = vector.extract_strided_slice %5 {offsets = [1, 0], sizes = [1, 128], strides = [1, 1]} : vector<8x128xf32> to vector<1x128xf32>
    %9 = vector.shape_cast %8 : vector<1x128xf32> to vector<128xf32>
    %cst = arith.constant dense<0.000000e+00> : vector<16xf32>
    %10 = vector.multi_reduction <add>, %3, %cst [1] : vector<16x128xf32> to vector<16xf32>
    %11 = vector.shape_cast %10 : vector<16xf32> to vector<16x1xf32>
    %cst_5 = arith.constant 7.812500e-03 : f32
    %12 = vector.broadcast %cst_5 : f32 to vector<16x1xf32>
    %13 = arith.mulf %11, %12 : vector<16x1xf32>
    %14 = arith.mulf %3, %3 : vector<16x128xf32>
    %cst_6 = arith.constant dense<0.000000e+00> : vector<16xf32>
    %15 = vector.multi_reduction <add>, %14, %cst_6 [1] : vector<16x128xf32> to vector<16xf32>
    %16 = vector.shape_cast %15 : vector<16xf32> to vector<16x1xf32>
    %cst_7 = arith.constant 7.812500e-03 : f32
    %17 = vector.broadcast %cst_7 : f32 to vector<16x1xf32>
    %18 = arith.mulf %16, %17 : vector<16x1xf32>
    %19 = arith.mulf %13, %13 : vector<16x1xf32>
    %20 = arith.subf %18, %19 : vector<16x1xf32>
    %cst_8 = arith.constant 0.000000e+00 : f32
    %21 = vector.broadcast %cst_8 : f32 to vector<16x1xf32>
    %22 = arith.maximumf %20, %21 : vector<16x1xf32>
    %23 = vector.broadcast %13 : vector<16x1xf32> to vector<16x128xf32>
    %24 = arith.subf %3, %23 : vector<16x128xf32>
    %cst_9 = arith.constant 9.99999974E-6 : f32
    %25 = vector.broadcast %cst_9 : f32 to vector<16x1xf32>
    %26 = arith.addf %22, %25 : vector<16x1xf32>
    %27 = math.rsqrt %26 : vector<16x1xf32>
    %28 = vector.broadcast %27 : vector<16x1xf32> to vector<16x128xf32>
    %29 = arith.mulf %24, %28 : vector<16x128xf32>
    %30 = vector.shape_cast %7 : vector<128xf32> to vector<1x128xf32>
    %31 = vector.broadcast %30 : vector<1x128xf32> to vector<16x128xf32>
    %32 = arith.mulf %29, %31 : vector<16x128xf32>
    %33 = vector.shape_cast %9 : vector<128xf32> to vector<1x128xf32>
    %34 = vector.broadcast %33 : vector<1x128xf32> to vector<16x128xf32>
    %35 = arith.addf %32, %34 : vector<16x128xf32>
    %36 = arith.truncf %35 : vector<16x128xf32> to vector<16x128xbf16>
    %c0_10 = arith.constant 0 : index
    %c0_11 = arith.constant 0 : index
    %c0_12 = arith.constant 0 : index
    %37 = vector.load %arg3[%c0_10, %c0_11, %c0_12] : memref<1x128x384xbf16, #tpu.memory_space<vmem>>, vector<1x128x384xbf16>
    %38 = vector.shape_cast %37 : vector<1x128x384xbf16> to vector<128x384xbf16>
    %cst_13 = arith.constant dense<0.000000e+00> : vector<16x384xf32>
    %39 = tpu.matmul %36, %38, %cst_13 {dimension_numbers = #tpu.dot_dimension_numbers<[1], [0], [0], [1], [0, 0, 1, 1], [], []>} : vector<16x128xbf16>, vector<128x384xbf16>, vector<16x384xf32> -> vector<16x384xf32>
    %c0_14 = arith.constant 0 : index
    %c0_15 = arith.constant 0 : index
    %c0_16 = arith.constant 0 : index
    %40 = vector.load %arg8[%c0_14, %c0_15, %c0_16] : memref<1x1x384xf32, #tpu.memory_space<vmem>>, vector<1x1x384xf32>
    %41 = vector.shape_cast %40 : vector<1x1x384xf32> to vector<1x384xf32>
    %42 = vector.broadcast %41 : vector<1x384xf32> to vector<16x384xf32>
    %43 = arith.addf %39, %42 : vector<16x384xf32>
    %c0_17 = arith.constant 0 : index
    %c0_18 = arith.constant 0 : index
    %44 = vector.load %arg11[%c0_17, %c0_18] : memref<16x384xf32, #tpu.memory_space<vmem>>, vector<16x384xf32>
    tpu.vector_store %arg11[%c0_17, %c0_18], %43 {strides = array<i32>} : memref<16x384xf32, #tpu.memory_space<vmem>>, vector<16x384xf32>,
    %c0_i32_19 = arith.constant 0 : i32
    %c8_i32 = arith.constant 8 : i32
    %45 = arith.muli %c0_i32_19, %c8_i32 : i32
    %46 = tpu.assume_multiple %45, 8 : i32
    %47 = arith.index_cast %46 : i32 to index
    %c0_20 = arith.constant 0 : index
    %48 = vector.load %arg11[%47, %c0_20] : memref<16x384xf32, #tpu.memory_space<vmem>>, vector<8x64xf32>
    %49 = arith.truncf %48 : vector<8x64xf32> to vector<8x64xbf16>
    %50 = arith.index_cast %46 : i32 to index
    %c128 = arith.constant 128 : index
    %51 = vector.load %arg11[%50, %c128] : memref<16x384xf32, #tpu.memory_space<vmem>>, vector<8x64xf32>
    %52 = arith.truncf %51 : vector<8x64xf32> to vector<8x64xbf16>
    %53 = arith.index_cast %46 : i32 to index
    %c256 = arith.constant 256 : index
    %54 = vector.load %arg11[%53, %c256] : memref<16x384xf32, #tpu.memory_space<vmem>>, vector<8x64xf32>
    %55 = arith.truncf %54 : vector<8x64xf32> to vector<8x64xbf16>
    %cst_21 = arith.constant dense<0.000000e+00> : vector<8x8xf32>
    %56 = tpu.matmul %49, %52, %cst_21 {dimension_numbers = #tpu.dot_dimension_numbers<[1], [1], [0], [0], [0, 0, 1, 0], [], []>} : vector<8x64xbf16>, vector<8x64xbf16>, vector<8x8xf32> -> vector<8x8xf32>
    %cst_22 = arith.constant dense<0xFF800000> : vector<8xf32>
    %57 = vector.multi_reduction <maximumf>, %56, %cst_22 [1] : vector<8x8xf32> to vector<8xf32>
    %58 = vector.shape_cast %57 : vector<8xf32> to vector<8x1xf32>
    %59 = vector.broadcast %58 : vector<8x1xf32> to vector<8x8xf32>
    %60 = arith.subf %56, %59 : vector<8x8xf32>
    %61 = math.exp %60 : vector<8x8xf32>
    %cst_23 = arith.constant dense<0.000000e+00> : vector<8xf32>
    %62 = vector.multi_reduction <add>, %61, %cst_23 [1] : vector<8x8xf32> to vector<8xf32>
    %63 = vector.shape_cast %62 : vector<8xf32> to vector<8x1xf32>
    %64 = tpu.reciprocal %63 {approx = true} : vector<8x1xf32> -> vector<8x1xf32>
    %65 = vector.broadcast %64 : vector<8x1xf32> to vector<8x8xf32>
    %66 = arith.mulf %61, %65 : vector<8x8xf32>
    %67 = arith.truncf %66 : vector<8x8xf32> to vector<8x8xbf16>
    %cst_24 = arith.constant dense<0.000000e+00> : vector<8x64xf32>
    %68 = tpu.matmul %67, %55, %cst_24 {dimension_numbers = #tpu.dot_dimension_numbers<[1], [0], [0], [1], [0, 0, 1, 1], [], []>} : vector<8x8xbf16>, vector<8x64xbf16>, vector<8x64xf32> -> vector<8x64xf32>
    %69 = arith.index_cast %46 : i32 to index
    %c0_25 = arith.constant 0 : index
    %70 = vector.load %arg12[%69, %c0_25] : memref<16x128xf32, #tpu.memory_space<vmem>>, vector<8x64xf32>
    tpu.vector_store %arg12[%69, %c0_25], %68 {strides = array<i32>} : memref<16x128xf32, #tpu.memory_space<vmem>>, vector<8x64xf32>,
    %71 = arith.index_cast %46 : i32 to index
    %c64 = arith.constant 64 : index
    %72 = vector.load %arg11[%71, %c64] : memref<16x384xf32, #tpu.memory_space<vmem>>, vector<8x64xf32>
    %73 = arith.truncf %72 : vector<8x64xf32> to vector<8x64xbf16>
    %74 = arith.index_cast %46 : i32 to index
    %c192 = arith.constant 192 : index
    %75 = vector.load %arg11[%74, %c192] : memref<16x384xf32, #tpu.memory_space<vmem>>, vector<8x64xf32>
    %76 = arith.truncf %75 : vector<8x64xf32> to vector<8x64xbf16>
    %77 = arith.index_cast %46 : i32 to index
    %c320 = arith.constant 320 : index
    %78 = vector.load %arg11[%77, %c320] : memref<16x384xf32, #tpu.memory_space<vmem>>, vector<8x64xf32>
    %79 = arith.truncf %78 : vector<8x64xf32> to vector<8x64xbf16>
    %cst_26 = arith.constant dense<0.000000e+00> : vector<8x8xf32>
    %80 = tpu.matmul %73, %76, %cst_26 {dimension_numbers = #tpu.dot_dimension_numbers<[1], [1], [0], [0], [0, 0, 1, 0], [], []>} : vector<8x64xbf16>, vector<8x64xbf16>, vector<8x8xf32> -> vector<8x8xf32>
    %cst_27 = arith.constant dense<0xFF800000> : vector<8xf32>
    %81 = vector.multi_reduction <maximumf>, %80, %cst_27 [1] : vector<8x8xf32> to vector<8xf32>
    %82 = vector.shape_cast %81 : vector<8xf32> to vector<8x1xf32>
    %83 = vector.broadcast %82 : vector<8x1xf32> to vector<8x8xf32>
    %84 = arith.subf %80, %83 : vector<8x8xf32>
    %85 = math.exp %84 : vector<8x8xf32>
    %cst_28 = arith.constant dense<0.000000e+00> : vector<8xf32>
    %86 = vector.multi_reduction <add>, %85, %cst_28 [1] : vector<8x8xf32> to vector<8xf32>
    %87 = vector.shape_cast %86 : vector<8xf32> to vector<8x1xf32>
    %88 = tpu.reciprocal %87 {approx = true} : vector<8x1xf32> -> vector<8x1xf32>
    %89 = vector.broadcast %88 : vector<8x1xf32> to vector<8x8xf32>
    %90 = arith.mulf %85, %89 : vector<8x8xf32>
    %91 = arith.truncf %90 : vector<8x8xf32> to vector<8x8xbf16>
    %cst_29 = arith.constant dense<0.000000e+00> : vector<8x64xf32>
    %92 = tpu.matmul %91, %79, %cst_29 {dimension_numbers = #tpu.dot_dimension_numbers<[1], [0], [0], [1], [0, 0, 1, 1], [], []>} : vector<8x8xbf16>, vector<8x64xbf16>, vector<8x64xf32> -> vector<8x64xf32>
    %93 = arith.index_cast %46 : i32 to index
    %c64_30 = arith.constant 64 : index
    %94 = vector.load %arg12[%93, %c64_30] : memref<16x128xf32, #tpu.memory_space<vmem>>, vector<8x64xf32>
    tpu.vector_store %arg12[%93, %c64_30], %92 {strides = array<i32>} : memref<16x128xf32, #tpu.memory_space<vmem>>, vector<8x64xf32>,
    %c1_i32 = arith.constant 1 : i32
    %c8_i32_31 = arith.constant 8 : i32
    %95 = arith.muli %c1_i32, %c8_i32_31 : i32
    %96 = tpu.assume_multiple %95, 8 : i32
    %97 = arith.index_cast %96 : i32 to index
    %c0_32 = arith.constant 0 : index
    %98 = vector.load %arg11[%97, %c0_32] : memref<16x384xf32, #tpu.memory_space<vmem>>, vector<8x64xf32>
    %99 = arith.truncf %98 : vector<8x64xf32> to vector<8x64xbf16>
    %100 = arith.index_cast %96 : i32 to index
    %c128_33 = arith.constant 128 : index
    %101 = vector.load %arg11[%100, %c128_33] : memref<16x384xf32, #tpu.memory_space<vmem>>, vector<8x64xf32>
    %102 = arith.truncf %101 : vector<8x64xf32> to vector<8x64xbf16>
    %103 = arith.index_cast %96 : i32 to index
    %c256_34 = arith.constant 256 : index
    %104 = vector.load %arg11[%103, %c256_34] : memref<16x384xf32, #tpu.memory_space<vmem>>, vector<8x64xf32>
    %105 = arith.truncf %104 : vector<8x64xf32> to vector<8x64xbf16>
    %cst_35 = arith.constant dense<0.000000e+00> : vector<8x8xf32>
    %106 = tpu.matmul %99, %102, %cst_35 {dimension_numbers = #tpu.dot_dimension_numbers<[1], [1], [0], [0], [0, 0, 1, 0], [], []>} : vector<8x64xbf16>, vector<8x64xbf16>, vector<8x8xf32> -> vector<8x8xf32>
    %cst_36 = arith.constant dense<0xFF800000> : vector<8xf32>
    %107 = vector.multi_reduction <maximumf>, %106, %cst_36 [1] : vector<8x8xf32> to vector<8xf32>
    %108 = vector.shape_cast %107 : vector<8xf32> to vector<8x1xf32>
    %109 = vector.broadcast %108 : vector<8x1xf32> to vector<8x8xf32>
    %110 = arith.subf %106, %109 : vector<8x8xf32>
    %111 = math.exp %110 : vector<8x8xf32>
    %cst_37 = arith.constant dense<0.000000e+00> : vector<8xf32>
    %112 = vector.multi_reduction <add>, %111, %cst_37 [1] : vector<8x8xf32> to vector<8xf32>
    %113 = vector.shape_cast %112 : vector<8xf32> to vector<8x1xf32>
    %114 = tpu.reciprocal %113 {approx = true} : vector<8x1xf32> -> vector<8x1xf32>
    %115 = vector.broadcast %114 : vector<8x1xf32> to vector<8x8xf32>
    %116 = arith.mulf %111, %115 : vector<8x8xf32>
    %117 = arith.truncf %116 : vector<8x8xf32> to vector<8x8xbf16>
    %cst_38 = arith.constant dense<0.000000e+00> : vector<8x64xf32>
    %118 = tpu.matmul %117, %105, %cst_38 {dimension_numbers = #tpu.dot_dimension_numbers<[1], [0], [0], [1], [0, 0, 1, 1], [], []>} : vector<8x8xbf16>, vector<8x64xbf16>, vector<8x64xf32> -> vector<8x64xf32>
    %119 = arith.index_cast %96 : i32 to index
    %c0_39 = arith.constant 0 : index
    %120 = vector.load %arg12[%119, %c0_39] : memref<16x128xf32, #tpu.memory_space<vmem>>, vector<8x64xf32>
    tpu.vector_store %arg12[%119, %c0_39], %118 {strides = array<i32>} : memref<16x128xf32, #tpu.memory_space<vmem>>, vector<8x64xf32>,
    %121 = arith.index_cast %96 : i32 to index
    %c64_40 = arith.constant 64 : index
    %122 = vector.load %arg11[%121, %c64_40] : memref<16x384xf32, #tpu.memory_space<vmem>>, vector<8x64xf32>
    %123 = arith.truncf %122 : vector<8x64xf32> to vector<8x64xbf16>
    %124 = arith.index_cast %96 : i32 to index
    %c192_41 = arith.constant 192 : index
    %125 = vector.load %arg11[%124, %c192_41] : memref<16x384xf32, #tpu.memory_space<vmem>>, vector<8x64xf32>
    %126 = arith.truncf %125 : vector<8x64xf32> to vector<8x64xbf16>
    %127 = arith.index_cast %96 : i32 to index
    %c320_42 = arith.constant 320 : index
    %128 = vector.load %arg11[%127, %c320_42] : memref<16x384xf32, #tpu.memory_space<vmem>>, vector<8x64xf32>
    %129 = arith.truncf %128 : vector<8x64xf32> to vector<8x64xbf16>
    %cst_43 = arith.constant dense<0.000000e+00> : vector<8x8xf32>
    %130 = tpu.matmul %123, %126, %cst_43 {dimension_numbers = #tpu.dot_dimension_numbers<[1], [1], [0], [0], [0, 0, 1, 0], [], []>} : vector<8x64xbf16>, vector<8x64xbf16>, vector<8x8xf32> -> vector<8x8xf32>
    %cst_44 = arith.constant dense<0xFF800000> : vector<8xf32>
    %131 = vector.multi_reduction <maximumf>, %130, %cst_44 [1] : vector<8x8xf32> to vector<8xf32>
    %132 = vector.shape_cast %131 : vector<8xf32> to vector<8x1xf32>
    %133 = vector.broadcast %132 : vector<8x1xf32> to vector<8x8xf32>
    %134 = arith.subf %130, %133 : vector<8x8xf32>
    %135 = math.exp %134 : vector<8x8xf32>
    %cst_45 = arith.constant dense<0.000000e+00> : vector<8xf32>
    %136 = vector.multi_reduction <add>, %135, %cst_45 [1] : vector<8x8xf32> to vector<8xf32>
    %137 = vector.shape_cast %136 : vector<8xf32> to vector<8x1xf32>
    %138 = tpu.reciprocal %137 {approx = true} : vector<8x1xf32> -> vector<8x1xf32>
    %139 = vector.broadcast %138 : vector<8x1xf32> to vector<8x8xf32>
    %140 = arith.mulf %135, %139 : vector<8x8xf32>
    %141 = arith.truncf %140 : vector<8x8xf32> to vector<8x8xbf16>
    %cst_46 = arith.constant dense<0.000000e+00> : vector<8x64xf32>
    %142 = tpu.matmul %141, %129, %cst_46 {dimension_numbers = #tpu.dot_dimension_numbers<[1], [0], [0], [1], [0, 0, 1, 1], [], []>} : vector<8x8xbf16>, vector<8x64xbf16>, vector<8x64xf32> -> vector<8x64xf32>
    %143 = arith.index_cast %96 : i32 to index
    %c64_47 = arith.constant 64 : index
    %144 = vector.load %arg12[%143, %c64_47] : memref<16x128xf32, #tpu.memory_space<vmem>>, vector<8x64xf32>
    tpu.vector_store %arg12[%143, %c64_47], %142 {strides = array<i32>} : memref<16x128xf32, #tpu.memory_space<vmem>>, vector<8x64xf32>,
    %c2_i32 = arith.constant 2 : i32
    %c0_48 = arith.constant 0 : index
    %c0_49 = arith.constant 0 : index
    %145 = vector.load %arg12[%c0_48, %c0_49] : memref<16x128xf32, #tpu.memory_space<vmem>>, vector<16x128xf32>
    %146 = arith.truncf %145 : vector<16x128xf32> to vector<16x128xbf16>
    %c0_50 = arith.constant 0 : index
    %c0_51 = arith.constant 0 : index
    %c0_52 = arith.constant 0 : index
    %147 = vector.load %arg4[%c0_50, %c0_51, %c0_52] : memref<1x128x128xbf16, #tpu.memory_space<vmem>>, vector<1x128x128xbf16>
    %148 = vector.shape_cast %147 : vector<1x128x128xbf16> to vector<128x128xbf16>
    %cst_53 = arith.constant dense<0.000000e+00> : vector<16x128xf32>
    %149 = tpu.matmul %146, %148, %cst_53 {dimension_numbers = #tpu.dot_dimension_numbers<[1], [0], [0], [1], [0, 0, 1, 1], [], []>} : vector<16x128xbf16>, vector<128x128xbf16>, vector<16x128xf32> -> vector<16x128xf32>
    %150 = arith.addf %3, %149 : vector<16x128xf32>
    %151 = vector.extract_strided_slice %5 {offsets = [2, 0], sizes = [1, 128], strides = [1, 1]} : vector<8x128xf32> to vector<1x128xf32>
    %152 = vector.shape_cast %151 : vector<1x128xf32> to vector<128xf32>
    %153 = vector.shape_cast %152 : vector<128xf32> to vector<1x128xf32>
    %154 = vector.broadcast %153 : vector<1x128xf32> to vector<16x128xf32>
    %155 = arith.addf %150, %154 : vector<16x128xf32>
    %156 = vector.extract_strided_slice %5 {offsets = [3, 0], sizes = [1, 128], strides = [1, 1]} : vector<8x128xf32> to vector<1x128xf32>
    %157 = vector.shape_cast %156 : vector<1x128xf32> to vector<128xf32>
    %158 = vector.extract_strided_slice %5 {offsets = [4, 0], sizes = [1, 128], strides = [1, 1]} : vector<8x128xf32> to vector<1x128xf32>
    %159 = vector.shape_cast %158 : vector<1x128xf32> to vector<128xf32>
    %cst_54 = arith.constant dense<0.000000e+00> : vector<16xf32>
    %160 = vector.multi_reduction <add>, %155, %cst_54 [1] : vector<16x128xf32> to vector<16xf32>
    %161 = vector.shape_cast %160 : vector<16xf32> to vector<16x1xf32>
    %cst_55 = arith.constant 7.812500e-03 : f32
    %162 = vector.broadcast %cst_55 : f32 to vector<16x1xf32>
    %163 = arith.mulf %161, %162 : vector<16x1xf32>
    %164 = arith.mulf %155, %155 : vector<16x128xf32>
    %cst_56 = arith.constant dense<0.000000e+00> : vector<16xf32>
    %165 = vector.multi_reduction <add>, %164, %cst_56 [1] : vector<16x128xf32> to vector<16xf32>
    %166 = vector.shape_cast %165 : vector<16xf32> to vector<16x1xf32>
    %cst_57 = arith.constant 7.812500e-03 : f32
    %167 = vector.broadcast %cst_57 : f32 to vector<16x1xf32>
    %168 = arith.mulf %166, %167 : vector<16x1xf32>
    %169 = arith.mulf %163, %163 : vector<16x1xf32>
    %170 = arith.subf %168, %169 : vector<16x1xf32>
    %cst_58 = arith.constant 0.000000e+00 : f32
    %171 = vector.broadcast %cst_58 : f32 to vector<16x1xf32>
    %172 = arith.maximumf %170, %171 : vector<16x1xf32>
    %173 = vector.broadcast %163 : vector<16x1xf32> to vector<16x128xf32>
    %174 = arith.subf %155, %173 : vector<16x128xf32>
    %cst_59 = arith.constant 9.99999974E-6 : f32
    %175 = vector.broadcast %cst_59 : f32 to vector<16x1xf32>
    %176 = arith.addf %172, %175 : vector<16x1xf32>
    %177 = math.rsqrt %176 : vector<16x1xf32>
    %178 = vector.broadcast %177 : vector<16x1xf32> to vector<16x128xf32>
    %179 = arith.mulf %174, %178 : vector<16x128xf32>
    %180 = vector.shape_cast %157 : vector<128xf32> to vector<1x128xf32>
    %181 = vector.broadcast %180 : vector<1x128xf32> to vector<16x128xf32>
    %182 = arith.mulf %179, %181 : vector<16x128xf32>
    %183 = vector.shape_cast %159 : vector<128xf32> to vector<1x128xf32>
    %184 = vector.broadcast %183 : vector<1x128xf32> to vector<16x128xf32>
    %185 = arith.addf %182, %184 : vector<16x128xf32>
    %186 = arith.truncf %185 : vector<16x128xf32> to vector<16x128xbf16>
    %cst_60 = arith.constant 0.000000e+00 : f32
    %187 = vector.broadcast %cst_60 : f32 to vector<16x128xf32>
    %c0_i32_61 = arith.constant 0 : i32
    %c256_i32 = arith.constant 256 : i32
    %188 = arith.muli %c0_i32_61, %c256_i32 : i32
    %189 = tpu.assume_multiple %188, 256 : i32
    %c0_62 = arith.constant 0 : index
    %c0_63 = arith.constant 0 : index
    %190 = arith.index_cast %189 : i32 to index
    %191 = vector.load %arg5[%c0_62, %c0_63, %190] : memref<1x128x512xbf16, #tpu.memory_space<vmem>>, vector<1x128x256xbf16>
    %192 = vector.shape_cast %191 : vector<1x128x256xbf16> to vector<128x256xbf16>
    %cst_64 = arith.constant dense<0.000000e+00> : vector<16x256xf32>
    %193 = tpu.matmul %186, %192, %cst_64 {dimension_numbers = #tpu.dot_dimension_numbers<[1], [0], [0], [1], [0, 0, 1, 1], [], []>} : vector<16x128xbf16>, vector<128x256xbf16>, vector<16x256xf32> -> vector<16x256xf32>
    %c0_65 = arith.constant 0 : index
    %c0_66 = arith.constant 0 : index
    %194 = arith.index_cast %189 : i32 to index
    %195 = vector.load %arg9[%c0_65, %c0_66, %194] : memref<1x1x512xf32, #tpu.memory_space<vmem>>, vector<1x1x256xf32>
    %196 = vector.shape_cast %195 : vector<1x1x256xf32> to vector<1x256xf32>
    %197 = vector.broadcast %196 : vector<1x256xf32> to vector<16x256xf32>
    %198 = arith.addf %193, %197 : vector<16x256xf32>
    %cst_67 = arith.constant 1.702000e+00 : f32
    %199 = vector.broadcast %cst_67 : f32 to vector<16x256xf32>
    %200 = arith.mulf %199, %198 : vector<16x256xf32>
    %201 = arith.negf %200 : vector<16x256xf32>
    %202 = math.exp %201 : vector<16x256xf32>
    %cst_68 = arith.constant 1.000000e+00 : f32
    %203 = vector.broadcast %cst_68 : f32 to vector<16x256xf32>
    %204 = arith.addf %203, %202 : vector<16x256xf32>
    %205 = arith.divf %203, %204 : vector<16x256xf32>
    %206 = arith.mulf %198, %205 : vector<16x256xf32>
    %207 = arith.truncf %206 : vector<16x256xf32> to vector<16x256xbf16>
    %c0_69 = arith.constant 0 : index
    %208 = arith.index_cast %189 : i32 to index
    %c0_70 = arith.constant 0 : index
    %209 = vector.load %arg6[%c0_69, %208, %c0_70] : memref<1x512x128xbf16, #tpu.memory_space<vmem>>, vector<1x256x128xbf16>
    %210 = vector.shape_cast %209 : vector<1x256x128xbf16> to vector<256x128xbf16>
    %cst_71 = arith.constant dense<0.000000e+00> : vector<16x128xf32>
    %211 = tpu.matmul %207, %210, %cst_71 {dimension_numbers = #tpu.dot_dimension_numbers<[1], [0], [0], [1], [0, 0, 1, 1], [], []>} : vector<16x256xbf16>, vector<256x128xbf16>, vector<16x128xf32> -> vector<16x128xf32>
    %212 = arith.addf %187, %211 : vector<16x128xf32>
    %c1_i32_72 = arith.constant 1 : i32
    %c256_i32_73 = arith.constant 256 : i32
    %213 = arith.muli %c1_i32_72, %c256_i32_73 : i32
    %214 = tpu.assume_multiple %213, 256 : i32
    %c0_74 = arith.constant 0 : index
    %c0_75 = arith.constant 0 : index
    %215 = arith.index_cast %214 : i32 to index
    %216 = vector.load %arg5[%c0_74, %c0_75, %215] : memref<1x128x512xbf16, #tpu.memory_space<vmem>>, vector<1x128x256xbf16>
    %217 = vector.shape_cast %216 : vector<1x128x256xbf16> to vector<128x256xbf16>
    %cst_76 = arith.constant dense<0.000000e+00> : vector<16x256xf32>
    %218 = tpu.matmul %186, %217, %cst_76 {dimension_numbers = #tpu.dot_dimension_numbers<[1], [0], [0], [1], [0, 0, 1, 1], [], []>} : vector<16x128xbf16>, vector<128x256xbf16>, vector<16x256xf32> -> vector<16x256xf32>
    %c0_77 = arith.constant 0 : index
    %c0_78 = arith.constant 0 : index
    %219 = arith.index_cast %214 : i32 to index
    %220 = vector.load %arg9[%c0_77, %c0_78, %219] : memref<1x1x512xf32, #tpu.memory_space<vmem>>, vector<1x1x256xf32>
    %221 = vector.shape_cast %220 : vector<1x1x256xf32> to vector<1x256xf32>
    %222 = vector.broadcast %221 : vector<1x256xf32> to vector<16x256xf32>
    %223 = arith.addf %218, %222 : vector<16x256xf32>
    %cst_79 = arith.constant 1.702000e+00 : f32
    %224 = vector.broadcast %cst_79 : f32 to vector<16x256xf32>
    %225 = arith.mulf %224, %223 : vector<16x256xf32>
    %226 = arith.negf %225 : vector<16x256xf32>
    %227 = math.exp %226 : vector<16x256xf32>
    %cst_80 = arith.constant 1.000000e+00 : f32
    %228 = vector.broadcast %cst_80 : f32 to vector<16x256xf32>
    %229 = arith.addf %228, %227 : vector<16x256xf32>
    %230 = arith.divf %228, %229 : vector<16x256xf32>
    %231 = arith.mulf %223, %230 : vector<16x256xf32>
    %232 = arith.truncf %231 : vector<16x256xf32> to vector<16x256xbf16>
    %c0_81 = arith.constant 0 : index
    %233 = arith.index_cast %214 : i32 to index
    %c0_82 = arith.constant 0 : index
    %234 = vector.load %arg6[%c0_81, %233, %c0_82] : memref<1x512x128xbf16, #tpu.memory_space<vmem>>, vector<1x256x128xbf16>
    %235 = vector.shape_cast %234 : vector<1x256x128xbf16> to vector<256x128xbf16>
    %cst_83 = arith.constant dense<0.000000e+00> : vector<16x128xf32>
    %236 = tpu.matmul %232, %235, %cst_83 {dimension_numbers = #tpu.dot_dimension_numbers<[1], [0], [0], [1], [0, 0, 1, 1], [], []>} : vector<16x256xbf16>, vector<256x128xbf16>, vector<16x128xf32> -> vector<16x128xf32>
    %237 = arith.addf %212, %236 : vector<16x128xf32>
    %c2_i32_84 = arith.constant 2 : i32
    %238 = arith.addf %155, %237 : vector<16x128xf32>
    %239 = vector.extract_strided_slice %5 {offsets = [5, 0], sizes = [1, 128], strides = [1, 1]} : vector<8x128xf32> to vector<1x128xf32>
    %240 = vector.shape_cast %239 : vector<1x128xf32> to vector<128xf32>
    %241 = vector.shape_cast %240 : vector<128xf32> to vector<1x128xf32>
    %242 = vector.broadcast %241 : vector<1x128xf32> to vector<16x128xf32>
    %243 = arith.addf %238, %242 : vector<16x128xf32>
    %c0_85 = arith.constant 0 : index
    %c0_86 = arith.constant 0 : index
    %244 = vector.load %arg10[%c0_85, %c0_86] : memref<16x128xf32, #tpu.memory_space<vmem>>, vector<16x128xf32>
    tpu.vector_store %arg10[%c0_85, %c0_86], %243 {strides = array<i32>} : memref<16x128xf32, #tpu.memory_space<vmem>>, vector<16x128xf32>,
    return
  }
  func.func @transform_0(%arg0: i32, %arg1: i32) -> (i32, i32) {
    %c0_i32 = arith.constant 0 : i32
    %c0_i32_0 = arith.constant 0 : i32
    return %arg0, %c0_i32 : i32, i32
  }
  func.func @transform_1(%arg0: i32, %arg1: i32) -> (i32, i32, i32) {
    %c0_i32 = arith.constant 0 : i32
    %c0_i32_0 = arith.constant 0 : i32
    %c0_i32_1 = arith.constant 0 : i32
    return %arg1, %c0_i32, %c0_i32_0 : i32, i32, i32
  }
  func.func @transform_2(%arg0: i32, %arg1: i32) -> (i32, i32, i32) {
    %c0_i32 = arith.constant 0 : i32
    %c0_i32_0 = arith.constant 0 : i32
    %c0_i32_1 = arith.constant 0 : i32
    return %arg1, %c0_i32, %c0_i32_0 : i32, i32, i32
  }
  func.func @transform_3(%arg0: i32, %arg1: i32) -> (i32, i32, i32) {
    %c0_i32 = arith.constant 0 : i32
    %c0_i32_0 = arith.constant 0 : i32
    %c0_i32_1 = arith.constant 0 : i32
    return %arg1, %c0_i32, %c0_i32_0 : i32, i32, i32
  }
  func.func @transform_4(%arg0: i32, %arg1: i32) -> (i32, i32, i32) {
    %c0_i32 = arith.constant 0 : i32
    %c0_i32_0 = arith.constant 0 : i32
    %c0_i32_1 = arith.constant 0 : i32
    return %arg1, %c0_i32, %c0_i32_0 : i32, i32, i32
  }
  func.func @transform_5(%arg0: i32, %arg1: i32) -> (i32, i32, i32) {
    %c0_i32 = arith.constant 0 : i32
    %c0_i32_0 = arith.constant 0 : i32
    %c0_i32_1 = arith.constant 0 : i32
    return %arg1, %c0_i32, %c0_i32_0 : i32, i32, i32
  }
  func.func @transform_6(%arg0: i32, %arg1: i32) -> (i32, i32, i32) {
    %c0_i32 = arith.constant 0 : i32
    %c0_i32_0 = arith.constant 0 : i32
    %c0_i32_1 = arith.constant 0 : i32
    return %arg1, %c0_i32, %c0_i32_0 : i32, i32, i32
  }
  func.func @transform_7(%arg0: i32, %arg1: i32) -> (i32, i32, i32) {
    %c0_i32 = arith.constant 0 : i32
    %c0_i32_0 = arith.constant 0 : i32
    %c0_i32_1 = arith.constant 0 : i32
    return %arg1, %c0_i32, %c0_i32_0 : i32, i32, i32
  }
  func.func @transform_8(%arg0: i32, %arg1: i32) -> (i32, i32) {
    %c0_i32 = arith.constant 0 : i32
    %c0_i32_0 = arith.constant 0 : i32
    return %arg0, %c0_i32 : i32, i32
  }
}

module attributes {stable_mosaic.version = 11 : i64} {
  func.func @transformer_kernel(%arg0: i32, %arg1: i32, %arg2: memref<16x128xf32, #tpu.memory_space<vmem>>, %arg3: memref<1x128x384xbf16, #tpu.memory_space<vmem>>, %arg4: memref<1x128x128xbf16, #tpu.memory_space<vmem>>, %arg5: memref<1x128x512xbf16, #tpu.memory_space<vmem>>, %arg6: memref<1x512x128xbf16, #tpu.memory_space<vmem>>, %arg7: memref<1x8x128xf32, #tpu.memory_space<vmem>>, %arg8: memref<1x1x384xf32, #tpu.memory_space<vmem>>, %arg9: memref<1x1x512xf32, #tpu.memory_space<vmem>>, %arg10: memref<16x128xf32, #tpu.memory_space<vmem>>, %arg11: memref<16x384xf32, #tpu.memory_space<vmem>>, %arg12: memref<16x128xf32, #tpu.memory_space<vmem>>) attributes {dimension_semantics = [#tpu.dimension_semantics<parallel>, #tpu.dimension_semantics<arbitrary>], iteration_bounds = array<i64: 2, 2>, scalar_prefetch = 0 : i64, scratch_operands = 2 : i64, tpu.core_type = #tpu.core_type<tc>, window_params = [{transform_indices = @transform_0, window_bounds = array<i64: 16, 128>}, {transform_indices = @transform_1, window_bounds = array<i64: 1, 128, 384>}, {transform_indices = @transform_2, window_bounds = array<i64: 1, 128, 128>}, {transform_indices = @transform_3, window_bounds = array<i64: 1, 128, 512>}, {transform_indices = @transform_4, window_bounds = array<i64: 1, 512, 128>}, {transform_indices = @transform_5, window_bounds = array<i64: 1, 8, 128>}, {transform_indices = @transform_6, window_bounds = array<i64: 1, 1, 384>}, {transform_indices = @transform_7, window_bounds = array<i64: 1, 1, 512>}, {transform_indices = @transform_8, window_bounds = array<i64: 16, 128>}]} {
    %c0_i32 = arith.constant 0 : i32
    %0 = arith.cmpi eq, %arg1, %c0_i32 : i32
    %1 = arith.extui %0 : i1 to i32
    %c0_i32_0 = arith.constant 0 : i32
    %2 = arith.cmpi ne, %1, %c0_i32_0 : i32
    scf.if %2 {
      %c0_87 = arith.constant 0 : index
      %c0_88 = arith.constant 0 : index
      %245 = vector.load %arg2[%c0_87, %c0_88] : memref<16x128xf32, #tpu.memory_space<vmem>>, vector<16x128xf32>
      %c0_89 = arith.constant 0 : index
      %c0_90 = arith.constant 0 : index
      %246 = vector.load %arg10[%c0_89, %c0_90] : memref<16x128xf32, #tpu.memory_space<vmem>>, vector<16x128xf32>
      tpu.vector_store %arg10[%c0_89, %c0_90], %245 {strides = array<i32>} : memref<16x128xf32, #tpu.memory_space<vmem>>, vector<16x128xf32>,
    } else {
    }
    %c0 = arith.constant 0 : index
    %c0_1 = arith.constant 0 : index
    %3 = vector.load %arg10[%c0, %c0_1] : memref<16x128xf32, #tpu.memory_space<vmem>>, vector<16x128xf32>
    %c0_2 = arith.constant 0 : index
    %c0_3 = arith.constant 0 : index
    %c0_4 = arith.constant 0 : index
    %4 = vector.load %arg7[%c0_2, %c0_3, %c0_4] : memref<1x8x128xf32, #tpu.memory_space<vmem>>, vector<1x8x128xf32>
    %5 = vector.shape_cast %4 : vector<1x8x128xf32> to vector<8x128xf32>
    %6 = vector.extract_strided_slice %5 {offsets = [0, 0], sizes = [1, 128], strides = [1, 1]} : vector<8x128xf32> to vector<1x128xf32>
    %7 = vector.shape_cast %6 : vector<1x128xf32> to vector<128xf32>
    %8 = vector.extract_strided_slice %5 {offsets = [1, 0], sizes = [1, 128], strides = [1, 1]} : vector<8x128xf32> to vector<1x128xf32>
    %9 = vector.shape_cast %8 : vector<1x128xf32> to vector<128xf32>
    %cst = arith.constant dense<0.000000e+00> : vector<16xf32>
    %10 = vector.multi_reduction <add>, %3, %cst [1] : vector<16x128xf32> to vector<16xf32>
    %11 = vector.shape_cast %10 : vector<16xf32> to vector<16x1xf32>
    %cst_5 = arith.constant 7.812500e-03 : f32
    %12 = vector.broadcast %cst_5 : f32 to vector<16x1xf32>
    %13 = arith.mulf %11, %12 : vector<16x1xf32>
    %14 = arith.mulf %3, %3 : vector<16x128xf32>
    %cst_6 = arith.constant dense<0.000000e+00> : vector<16xf32>
    %15 = vector.multi_reduction <add>, %14, %cst_6 [1] : vector<16x128xf32> to vector<16xf32>
    %16 = vector.shape_cast %15 : vector<16xf32> to vector<16x1xf32>
    %cst_7 = arith.constant 7.812500e-03 : f32
    %17 = vector.broadcast %cst_7 : f32 to vector<16x1xf32>
    %18 = arith.mulf %16, %17 : vector<16x1xf32>
    %19 = arith.mulf %13, %13 : vector<16x1xf32>
    %20 = arith.subf %18, %19 : vector<16x1xf32>
    %cst_8 = arith.constant 0.000000e+00 : f32
    %21 = vector.broadcast %cst_8 : f32 to vector<16x1xf32>
    %22 = arith.maximumf %20, %21 : vector<16x1xf32>
    %23 = vector.broadcast %13 : vector<16x1xf32> to vector<16x128xf32>
    %24 = arith.subf %3, %23 : vector<16x128xf32>
    %cst_9 = arith.constant 9.99999974E-6 : f32
    %25 = vector.broadcast %cst_9 : f32 to vector<16x1xf32>
    %26 = arith.addf %22, %25 : vector<16x1xf32>
    %27 = math.rsqrt %26 : vector<16x1xf32>
    %28 = vector.broadcast %27 : vector<16x1xf32> to vector<16x128xf32>
    %29 = arith.mulf %24, %28 : vector<16x128xf32>
    %30 = vector.shape_cast %7 : vector<128xf32> to vector<1x128xf32>
    %31 = vector.broadcast %30 : vector<1x128xf32> to vector<16x128xf32>
    %32 = arith.mulf %29, %31 : vector<16x128xf32>
    %33 = vector.shape_cast %9 : vector<128xf32> to vector<1x128xf32>
    %34 = vector.broadcast %33 : vector<1x128xf32> to vector<16x128xf32>
    %35 = arith.addf %32, %34 : vector<16x128xf32>
    %36 = arith.truncf %35 : vector<16x128xf32> to vector<16x128xbf16>
    %c0_10 = arith.constant 0 : index
    %c0_11 = arith.constant 0 : index
    %c0_12 = arith.constant 0 : index
    %37 = vector.load %arg3[%c0_10, %c0_11, %c0_12] : memref<1x128x384xbf16, #tpu.memory_space<vmem>>, vector<1x128x384xbf16>
    %38 = vector.shape_cast %37 : vector<1x128x384xbf16> to vector<128x384xbf16>
    %cst_13 = arith.constant dense<0.000000e+00> : vector<16x384xf32>
    %39 = tpu.matmul %36, %38, %cst_13 {dimension_numbers = #tpu.dot_dimension_numbers<[1], [0], [0], [1], [0, 0, 1, 1], [], []>} : vector<16x128xbf16>, vector<128x384xbf16>, vector<16x384xf32> -> vector<16x384xf32>
    %c0_14 = arith.constant 0 : index
    %c0_15 = arith.constant 0 : index
    %c0_16 = arith.constant 0 : index
    %40 = vector.load %arg8[%c0_14, %c0_15, %c0_16] : memref<1x1x384xf32, #tpu.memory_space<vmem>>, vector<1x1x384xf32>
    %41 = vector.shape_cast %40 : vector<1x1x384xf32> to vector<1x384xf32>
    %42 = vector.broadcast %41 : vector<1x384xf32> to vector<16x384xf32>
    %43 = arith.addf %39, %42 : vector<16x384xf32>
    %c0_17 = arith.constant 0 : index
    %c0_18 = arith.constant 0 : index
    %44 = vector.load %arg11[%c0_17, %c0_18] : memref<16x384xf32, #tpu.memory_space<vmem>>, vector<16x384xf32>
    tpu.vector_store %arg11[%c0_17, %c0_18], %43 {strides = array<i32>} : memref<16x384xf32, #tpu.memory_space<vmem>>, vector<16x384xf32>,
    %c0_i32_19 = arith.constant 0 : i32
    %c8_i32 = arith.constant 8 : i32
    %45 = arith.muli %c0_i32_19, %c8_i32 : i32
    %46 = tpu.assume_multiple %45, 8 : i32
    %47 = arith.index_cast %46 : i32 to index
    %c0_20 = arith.constant 0 : index
    %48 = vector.load %arg11[%47, %c0_20] : memref<16x384xf32, #tpu.memory_space<vmem>>, vector<8x64xf32>
    %49 = arith.truncf %48 : vector<8x64xf32> to vector<8x64xbf16>
    %50 = arith.index_cast %46 : i32 to index
    %c128 = arith.constant 128 : index
    %51 = vector.load %arg11[%50, %c128] : memref<16x384xf32, #tpu.memory_space<vmem>>, vector<8x64xf32>
    %52 = arith.truncf %51 : vector<8x64xf32> to vector<8x64xbf16>
    %53 = arith.index_cast %46 : i32 to index
    %c256 = arith.constant 256 : index
    %54 = vector.load %arg11[%53, %c256] : memref<16x384xf32, #tpu.memory_space<vmem>>, vector<8x64xf32>
    %55 = arith.truncf %54 : vector<8x64xf32> to vector<8x64xbf16>
    %cst_21 = arith.constant dense<0.000000e+00> : vector<8x8xf32>
    %56 = tpu.matmul %49, %52, %cst_21 {dimension_numbers = #tpu.dot_dimension_numbers<[1], [1], [0], [0], [0, 0, 1, 0], [], []>} : vector<8x64xbf16>, vector<8x64xbf16>, vector<8x8xf32> -> vector<8x8xf32>
    %cst_22 = arith.constant dense<0xFF800000> : vector<8xf32>
    %57 = vector.multi_reduction <maximumf>, %56, %cst_22 [1] : vector<8x8xf32> to vector<8xf32>
    %58 = vector.shape_cast %57 : vector<8xf32> to vector<8x1xf32>
    %59 = vector.broadcast %58 : vector<8x1xf32> to vector<8x8xf32>
    %60 = arith.subf %56, %59 : vector<8x8xf32>
    %61 = math.exp %60 : vector<8x8xf32>
    %cst_23 = arith.constant dense<0.000000e+00> : vector<8xf32>
    %62 = vector.multi_reduction <add>, %61, %cst_23 [1] : vector<8x8xf32> to vector<8xf32>
    %63 = vector.shape_cast %62 : vector<8xf32> to vector<8x1xf32>
    %64 = tpu.reciprocal %63 {approx = true} : vector<8x1xf32> -> vector<8x1xf32>
    %65 = vector.broadcast %64 : vector<8x1xf32> to vector<8x8xf32>
    %66 = arith.mulf %61, %65 : vector<8x8xf32>
    %67 = arith.truncf %66 : vector<8x8xf32> to vector<8x8xbf16>
    %cst_24 = arith.constant dense<0.000000e+00> : vector<8x64xf32>
    %68 = tpu.matmul %67, %55, %cst_24 {dimension_numbers = #tpu.dot_dimension_numbers<[1], [0], [0], [1], [0, 0, 1, 1], [], []>} : vector<8x8xbf16>, vector<8x64xbf16>, vector<8x64xf32> -> vector<8x64xf32>
    %69 = arith.index_cast %46 : i32 to index
    %c0_25 = arith.constant 0 : index
    %70 = vector.load %arg12[%69, %c0_25] : memref<16x128xf32, #tpu.memory_space<vmem>>, vector<8x64xf32>
    tpu.vector_store %arg12[%69, %c0_25], %68 {strides = array<i32>} : memref<16x128xf32, #tpu.memory_space<vmem>>, vector<8x64xf32>,
    %71 = arith.index_cast %46 : i32 to index
    %c64 = arith.constant 64 : index
    %72 = vector.load %arg11[%71, %c64] : memref<16x384xf32, #tpu.memory_space<vmem>>, vector<8x64xf32>
    %73 = arith.truncf %72 : vector<8x64xf32> to vector<8x64xbf16>
    %74 = arith.index_cast %46 : i32 to index
    %c192 = arith.constant 192 : index
    %75 = vector.load %arg11[%74, %c192] : memref<16x384xf32, #tpu.memory_space<vmem>>, vector<8x64xf32>
    %76 = arith.truncf %75 : vector<8x64xf32> to vector<8x64xbf16>
    %77 = arith.index_cast %46 : i32 to index
    %c320 = arith.constant 320 : index
    %78 = vector.load %arg11[%77, %c320] : memref<16x384xf32, #tpu.memory_space<vmem>>, vector<8x64xf32>
    %79 = arith.truncf %78 : vector<8x64xf32> to vector<8x64xbf16>
    %cst_26 = arith.constant dense<0.000000e+00> : vector<8x8xf32>
    %80 = tpu.matmul %73, %76, %cst_26 {dimension_numbers = #tpu.dot_dimension_numbers<[1], [1], [0], [0], [0, 0, 1, 0], [], []>} : vector<8x64xbf16>, vector<8x64xbf16>, vector<8x8xf32> -> vector<8x8xf32>
    %cst_27 = arith.constant dense<0xFF800000> : vector<8xf32>
    %81 = vector.multi_reduction <maximumf>, %80, %cst_27 [1] : vector<8x8xf32> to vector<8xf32>
    %82 = vector.shape_cast %81 : vector<8xf32> to vector<8x1xf32>
    %83 = vector.broadcast %82 : vector<8x1xf32> to vector<8x8xf32>
    %84 = arith.subf %80, %83 : vector<8x8xf32>
    %85 = math.exp %84 : vector<8x8xf32>
    %cst_28 = arith.constant dense<0.000000e+00> : vector<8xf32>
    %86 = vector.multi_reduction <add>, %85, %cst_28 [1] : vector<8x8xf32> to vector<8xf32>
    %87 = vector.shape_cast %86 : vector<8xf32> to vector<8x1xf32>
    %88 = tpu.reciprocal %87 {approx = true} : vector<8x1xf32> -> vector<8x1xf32>
    %89 = vector.broadcast %88 : vector<8x1xf32> to vector<8x8xf32>
    %90 = arith.mulf %85, %89 : vector<8x8xf32>
    %91 = arith.truncf %90 : vector<8x8xf32> to vector<8x8xbf16>
    %cst_29 = arith.constant dense<0.000000e+00> : vector<8x64xf32>
    %92 = tpu.matmul %91, %79, %cst_29 {dimension_numbers = #tpu.dot_dimension_numbers<[1], [0], [0], [1], [0, 0, 1, 1], [], []>} : vector<8x8xbf16>, vector<8x64xbf16>, vector<8x64xf32> -> vector<8x64xf32>
    %93 = arith.index_cast %46 : i32 to index
    %c64_30 = arith.constant 64 : index
    %94 = vector.load %arg12[%93, %c64_30] : memref<16x128xf32, #tpu.memory_space<vmem>>, vector<8x64xf32>
    tpu.vector_store %arg12[%93, %c64_30], %92 {strides = array<i32>} : memref<16x128xf32, #tpu.memory_space<vmem>>, vector<8x64xf32>,
    %c1_i32 = arith.constant 1 : i32
    %c8_i32_31 = arith.constant 8 : i32
    %95 = arith.muli %c1_i32, %c8_i32_31 : i32
    %96 = tpu.assume_multiple %95, 8 : i32
    %97 = arith.index_cast %96 : i32 to index
    %c0_32 = arith.constant 0 : index
    %98 = vector.load %arg11[%97, %c0_32] : memref<16x384xf32, #tpu.memory_space<vmem>>, vector<8x64xf32>
    %99 = arith.truncf %98 : vector<8x64xf32> to vector<8x64xbf16>
    %100 = arith.index_cast %96 : i32 to index
    %c128_33 = arith.constant 128 : index
    %101 = vector.load %arg11[%100, %c128_33] : memref<16x384xf32, #tpu.memory_space<vmem>>, vector<8x64xf32>
    %102 = arith.truncf %101 : vector<8x64xf32> to vector<8x64xbf16>
    %103 = arith.index_cast %96 : i32 to index
    %c256_34 = arith.constant 256 : index
    %104 = vector.load %arg11[%103, %c256_34] : memref<16x384xf32, #tpu.memory_space<vmem>>, vector<8x64xf32>
    %105 = arith.truncf %104 : vector<8x64xf32> to vector<8x64xbf16>
    %cst_35 = arith.constant dense<0.000000e+00> : vector<8x8xf32>
    %106 = tpu.matmul %99, %102, %cst_35 {dimension_numbers = #tpu.dot_dimension_numbers<[1], [1], [0], [0], [0, 0, 1, 0], [], []>} : vector<8x64xbf16>, vector<8x64xbf16>, vector<8x8xf32> -> vector<8x8xf32>
    %cst_36 = arith.constant dense<0xFF800000> : vector<8xf32>
    %107 = vector.multi_reduction <maximumf>, %106, %cst_36 [1] : vector<8x8xf32> to vector<8xf32>
    %108 = vector.shape_cast %107 : vector<8xf32> to vector<8x1xf32>
    %109 = vector.broadcast %108 : vector<8x1xf32> to vector<8x8xf32>
    %110 = arith.subf %106, %109 : vector<8x8xf32>
    %111 = math.exp %110 : vector<8x8xf32>
    %cst_37 = arith.constant dense<0.000000e+00> : vector<8xf32>
    %112 = vector.multi_reduction <add>, %111, %cst_37 [1] : vector<8x8xf32> to vector<8xf32>
    %113 = vector.shape_cast %112 : vector<8xf32> to vector<8x1xf32>
    %114 = tpu.reciprocal %113 {approx = true} : vector<8x1xf32> -> vector<8x1xf32>
    %115 = vector.broadcast %114 : vector<8x1xf32> to vector<8x8xf32>
    %116 = arith.mulf %111, %115 : vector<8x8xf32>
    %117 = arith.truncf %116 : vector<8x8xf32> to vector<8x8xbf16>
    %cst_38 = arith.constant dense<0.000000e+00> : vector<8x64xf32>
    %118 = tpu.matmul %117, %105, %cst_38 {dimension_numbers = #tpu.dot_dimension_numbers<[1], [0], [0], [1], [0, 0, 1, 1], [], []>} : vector<8x8xbf16>, vector<8x64xbf16>, vector<8x64xf32> -> vector<8x64xf32>
    %119 = arith.index_cast %96 : i32 to index
    %c0_39 = arith.constant 0 : index
    %120 = vector.load %arg12[%119, %c0_39] : memref<16x128xf32, #tpu.memory_space<vmem>>, vector<8x64xf32>
    tpu.vector_store %arg12[%119, %c0_39], %118 {strides = array<i32>} : memref<16x128xf32, #tpu.memory_space<vmem>>, vector<8x64xf32>,
    %121 = arith.index_cast %96 : i32 to index
    %c64_40 = arith.constant 64 : index
    %122 = vector.load %arg11[%121, %c64_40] : memref<16x384xf32, #tpu.memory_space<vmem>>, vector<8x64xf32>
    %123 = arith.truncf %122 : vector<8x64xf32> to vector<8x64xbf16>
    %124 = arith.index_cast %96 : i32 to index
    %c192_41 = arith.constant 192 : index
    %125 = vector.load %arg11[%124, %c192_41] : memref<16x384xf32, #tpu.memory_space<vmem>>, vector<8x64xf32>
    %126 = arith.truncf %125 : vector<8x64xf32> to vector<8x64xbf16>
    %127 = arith.index_cast %96 : i32 to index
    %c320_42 = arith.constant 320 : index
    %128 = vector.load %arg11[%127, %c320_42] : memref<16x384xf32, #tpu.memory_space<vmem>>, vector<8x64xf32>
    %129 = arith.truncf %128 : vector<8x64xf32> to vector<8x64xbf16>
    %cst_43 = arith.constant dense<0.000000e+00> : vector<8x8xf32>
    %130 = tpu.matmul %123, %126, %cst_43 {dimension_numbers = #tpu.dot_dimension_numbers<[1], [1], [0], [0], [0, 0, 1, 0], [], []>} : vector<8x64xbf16>, vector<8x64xbf16>, vector<8x8xf32> -> vector<8x8xf32>
    %cst_44 = arith.constant dense<0xFF800000> : vector<8xf32>
    %131 = vector.multi_reduction <maximumf>, %130, %cst_44 [1] : vector<8x8xf32> to vector<8xf32>
    %132 = vector.shape_cast %131 : vector<8xf32> to vector<8x1xf32>
    %133 = vector.broadcast %132 : vector<8x1xf32> to vector<8x8xf32>
    %134 = arith.subf %130, %133 : vector<8x8xf32>
    %135 = math.exp %134 : vector<8x8xf32>
    %cst_45 = arith.constant dense<0.000000e+00> : vector<8xf32>
    %136 = vector.multi_reduction <add>, %135, %cst_45 [1] : vector<8x8xf32> to vector<8xf32>
    %137 = vector.shape_cast %136 : vector<8xf32> to vector<8x1xf32>
    %138 = tpu.reciprocal %137 {approx = true} : vector<8x1xf32> -> vector<8x1xf32>
    %139 = vector.broadcast %138 : vector<8x1xf32> to vector<8x8xf32>
    %140 = arith.mulf %135, %139 : vector<8x8xf32>
    %141 = arith.truncf %140 : vector<8x8xf32> to vector<8x8xbf16>
    %cst_46 = arith.constant dense<0.000000e+00> : vector<8x64xf32>
    %142 = tpu.matmul %141, %129, %cst_46 {dimension_numbers = #tpu.dot_dimension_numbers<[1], [0], [0], [1], [0, 0, 1, 1], [], []>} : vector<8x8xbf16>, vector<8x64xbf16>, vector<8x64xf32> -> vector<8x64xf32>
    %143 = arith.index_cast %96 : i32 to index
    %c64_47 = arith.constant 64 : index
    %144 = vector.load %arg12[%143, %c64_47] : memref<16x128xf32, #tpu.memory_space<vmem>>, vector<8x64xf32>
    tpu.vector_store %arg12[%143, %c64_47], %142 {strides = array<i32>} : memref<16x128xf32, #tpu.memory_space<vmem>>, vector<8x64xf32>,
    %c2_i32 = arith.constant 2 : i32
    %c0_48 = arith.constant 0 : index
    %c0_49 = arith.constant 0 : index
    %145 = vector.load %arg12[%c0_48, %c0_49] : memref<16x128xf32, #tpu.memory_space<vmem>>, vector<16x128xf32>
    %146 = arith.truncf %145 : vector<16x128xf32> to vector<16x128xbf16>
    %c0_50 = arith.constant 0 : index
    %c0_51 = arith.constant 0 : index
    %c0_52 = arith.constant 0 : index
    %147 = vector.load %arg4[%c0_50, %c0_51, %c0_52] : memref<1x128x128xbf16, #tpu.memory_space<vmem>>, vector<1x128x128xbf16>
    %148 = vector.shape_cast %147 : vector<1x128x128xbf16> to vector<128x128xbf16>
    %cst_53 = arith.constant dense<0.000000e+00> : vector<16x128xf32>
    %149 = tpu.matmul %146, %148, %cst_53 {dimension_numbers = #tpu.dot_dimension_numbers<[1], [0], [0], [1], [0, 0, 1, 1], [], []>} : vector<16x128xbf16>, vector<128x128xbf16>, vector<16x128xf32> -> vector<16x128xf32>
    %150 = arith.addf %3, %149 : vector<16x128xf32>
    %151 = vector.extract_strided_slice %5 {offsets = [2, 0], sizes = [1, 128], strides = [1, 1]} : vector<8x128xf32> to vector<1x128xf32>
    %152 = vector.shape_cast %151 : vector<1x128xf32> to vector<128xf32>
    %153 = vector.shape_cast %152 : vector<128xf32> to vector<1x128xf32>
    %154 = vector.broadcast %153 : vector<1x128xf32> to vector<16x128xf32>
    %155 = arith.addf %150, %154 : vector<16x128xf32>
    %156 = vector.extract_strided_slice %5 {offsets = [3, 0], sizes = [1, 128], strides = [1, 1]} : vector<8x128xf32> to vector<1x128xf32>
    %157 = vector.shape_cast %156 : vector<1x128xf32> to vector<128xf32>
    %158 = vector.extract_strided_slice %5 {offsets = [4, 0], sizes = [1, 128], strides = [1, 1]} : vector<8x128xf32> to vector<1x128xf32>
    %159 = vector.shape_cast %158 : vector<1x128xf32> to vector<128xf32>
    %cst_54 = arith.constant dense<0.000000e+00> : vector<16xf32>
    %160 = vector.multi_reduction <add>, %155, %cst_54 [1] : vector<16x128xf32> to vector<16xf32>
    %161 = vector.shape_cast %160 : vector<16xf32> to vector<16x1xf32>
    %cst_55 = arith.constant 7.812500e-03 : f32
    %162 = vector.broadcast %cst_55 : f32 to vector<16x1xf32>
    %163 = arith.mulf %161, %162 : vector<16x1xf32>
    %164 = arith.mulf %155, %155 : vector<16x128xf32>
    %cst_56 = arith.constant dense<0.000000e+00> : vector<16xf32>
    %165 = vector.multi_reduction <add>, %164, %cst_56 [1] : vector<16x128xf32> to vector<16xf32>
    %166 = vector.shape_cast %165 : vector<16xf32> to vector<16x1xf32>
    %cst_57 = arith.constant 7.812500e-03 : f32
    %167 = vector.broadcast %cst_57 : f32 to vector<16x1xf32>
    %168 = arith.mulf %166, %167 : vector<16x1xf32>
    %169 = arith.mulf %163, %163 : vector<16x1xf32>
    %170 = arith.subf %168, %169 : vector<16x1xf32>
    %cst_58 = arith.constant 0.000000e+00 : f32
    %171 = vector.broadcast %cst_58 : f32 to vector<16x1xf32>
    %172 = arith.maximumf %170, %171 : vector<16x1xf32>
    %173 = vector.broadcast %163 : vector<16x1xf32> to vector<16x128xf32>
    %174 = arith.subf %155, %173 : vector<16x128xf32>
    %cst_59 = arith.constant 9.99999974E-6 : f32
    %175 = vector.broadcast %cst_59 : f32 to vector<16x1xf32>
    %176 = arith.addf %172, %175 : vector<16x1xf32>
    %177 = math.rsqrt %176 : vector<16x1xf32>
    %178 = vector.broadcast %177 : vector<16x1xf32> to vector<16x128xf32>
    %179 = arith.mulf %174, %178 : vector<16x128xf32>
    %180 = vector.shape_cast %157 : vector<128xf32> to vector<1x128xf32>
    %181 = vector.broadcast %180 : vector<1x128xf32> to vector<16x128xf32>
    %182 = arith.mulf %179, %181 : vector<16x128xf32>
    %183 = vector.shape_cast %159 : vector<128xf32> to vector<1x128xf32>
    %184 = vector.broadcast %183 : vector<1x128xf32> to vector<16x128xf32>
    %185 = arith.addf %182, %184 : vector<16x128xf32>
    %186 = arith.truncf %185 : vector<16x128xf32> to vector<16x128xbf16>
    %cst_60 = arith.constant 0.000000e+00 : f32
    %187 = vector.broadcast %cst_60 : f32 to vector<16x128xf32>
    %c0_i32_61 = arith.constant 0 : i32
    %c256_i32 = arith.constant 256 : i32
    %188 = arith.muli %c0_i32_61, %c256_i32 : i32
    %189 = tpu.assume_multiple %188, 256 : i32
    %c0_62 = arith.constant 0 : index
    %c0_63 = arith.constant 0 : index
    %190 = arith.index_cast %189 : i32 to index
    %191 = vector.load %arg5[%c0_62, %c0_63, %190] : memref<1x128x512xbf16, #tpu.memory_space<vmem>>, vector<1x128x256xbf16>
    %192 = vector.shape_cast %191 : vector<1x128x256xbf16> to vector<128x256xbf16>
    %cst_64 = arith.constant dense<0.000000e+00> : vector<16x256xf32>
    %193 = tpu.matmul %186, %192, %cst_64 {dimension_numbers = #tpu.dot_dimension_numbers<[1], [0], [0], [1], [0, 0, 1, 1], [], []>} : vector<16x128xbf16>, vector<128x256xbf16>, vector<16x256xf32> -> vector<16x256xf32>
    %c0_65 = arith.constant 0 : index
    %c0_66 = arith.constant 0 : index
    %194 = arith.index_cast %189 : i32 to index
    %195 = vector.load %arg9[%c0_65, %c0_66, %194] : memref<1x1x512xf32, #tpu.memory_space<vmem>>, vector<1x1x256xf32>
    %196 = vector.shape_cast %195 : vector<1x1x256xf32> to vector<1x256xf32>
    %197 = vector.broadcast %196 : vector<1x256xf32> to vector<16x256xf32>
    %198 = arith.addf %193, %197 : vector<16x256xf32>
    %cst_67 = arith.constant 1.702000e+00 : f32
    %199 = vector.broadcast %cst_67 : f32 to vector<16x256xf32>
    %200 = arith.mulf %199, %198 : vector<16x256xf32>
    %201 = arith.negf %200 : vector<16x256xf32>
    %202 = math.exp %201 : vector<16x256xf32>
    %cst_68 = arith.constant 1.000000e+00 : f32
    %203 = vector.broadcast %cst_68 : f32 to vector<16x256xf32>
    %204 = arith.addf %203, %202 : vector<16x256xf32>
    %205 = arith.divf %203, %204 : vector<16x256xf32>
    %206 = arith.mulf %198, %205 : vector<16x256xf32>
    %207 = arith.truncf %206 : vector<16x256xf32> to vector<16x256xbf16>
    %c0_69 = arith.constant 0 : index
    %208 = arith.index_cast %189 : i32 to index
    %c0_70 = arith.constant 0 : index
    %209 = vector.load %arg6[%c0_69, %208, %c0_70] : memref<1x512x128xbf16, #tpu.memory_space<vmem>>, vector<1x256x128xbf16>
    %210 = vector.shape_cast %209 : vector<1x256x128xbf16> to vector<256x128xbf16>
    %cst_71 = arith.constant dense<0.000000e+00> : vector<16x128xf32>
    %211 = tpu.matmul %207, %210, %cst_71 {dimension_numbers = #tpu.dot_dimension_numbers<[1], [0], [0], [1], [0, 0, 1, 1], [], []>} : vector<16x256xbf16>, vector<256x128xbf16>, vector<16x128xf32> -> vector<16x128xf32>
    %212 = arith.addf %187, %211 : vector<16x128xf32>
    %c1_i32_72 = arith.constant 1 : i32
    %c256_i32_73 = arith.constant 256 : i32
    %213 = arith.muli %c1_i32_72, %c256_i32_73 : i32
    %214 = tpu.assume_multiple %213, 256 : i32
    %c0_74 = arith.constant 0 : index
    %c0_75 = arith.constant 0 : index
    %215 = arith.index_cast %214 : i32 to index
    %216 = vector.load %arg5[%c0_74, %c0_75, %215] : memref<1x128x512xbf16, #tpu.memory_space<vmem>>, vector<1x128x256xbf16>
    %217 = vector.shape_cast %216 : vector<1x128x256xbf16> to vector<128x256xbf16>
    %cst_76 = arith.constant dense<0.000000e+00> : vector<16x256xf32>
    %218 = tpu.matmul %186, %217, %cst_76 {dimension_numbers = #tpu.dot_dimension_numbers<[1], [0], [0], [1], [0, 0, 1, 1], [], []>} : vector<16x128xbf16>, vector<128x256xbf16>, vector<16x256xf32> -> vector<16x256xf32>
    %c0_77 = arith.constant 0 : index
    %c0_78 = arith.constant 0 : index
    %219 = arith.index_cast %214 : i32 to index
    %220 = vector.load %arg9[%c0_77, %c0_78, %219] : memref<1x1x512xf32, #tpu.memory_space<vmem>>, vector<1x1x256xf32>
    %221 = vector.shape_cast %220 : vector<1x1x256xf32> to vector<1x256xf32>
    %222 = vector.broadcast %221 : vector<1x256xf32> to vector<16x256xf32>
    %223 = arith.addf %218, %222 : vector<16x256xf32>
    %cst_79 = arith.constant 1.702000e+00 : f32
    %224 = vector.broadcast %cst_79 : f32 to vector<16x256xf32>
    %225 = arith.mulf %224, %223 : vector<16x256xf32>
    %226 = arith.negf %225 : vector<16x256xf32>
    %227 = math.exp %226 : vector<16x256xf32>
    %cst_80 = arith.constant 1.000000e+00 : f32
    %228 = vector.broadcast %cst_80 : f32 to vector<16x256xf32>
    %229 = arith.addf %228, %227 : vector<16x256xf32>
    %230 = arith.divf %228, %229 : vector<16x256xf32>
    %231 = arith.mulf %223, %230 : vector<16x256xf32>
    %232 = arith.truncf %231 : vector<16x256xf32> to vector<16x256xbf16>
    %c0_81 = arith.constant 0 : index
    %233 = arith.index_cast %214 : i32 to index
    %c0_82 = arith.constant 0 : index
    %234 = vector.load %arg6[%c0_81, %233, %c0_82] : memref<1x512x128xbf16, #tpu.memory_space<vmem>>, vector<1x256x128xbf16>
    %235 = vector.shape_cast %234 : vector<1x256x128xbf16> to vector<256x128xbf16>
    %cst_83 = arith.constant dense<0.000000e+00> : vector<16x128xf32>
    %236 = tpu.matmul %232, %235, %cst_83 {dimension_numbers = #tpu.dot_dimension_numbers<[1], [0], [0], [1], [0, 0, 1, 1], [], []>} : vector<16x256xbf16>, vector<256x128xbf16>, vector<16x128xf32> -> vector<16x128xf32>
    %237 = arith.addf %212, %236 : vector<16x128xf32>
    %c2_i32_84 = arith.constant 2 : i32
    %238 = arith.addf %155, %237 : vector<16x128xf32>
    %239 = vector.extract_strided_slice %5 {offsets = [5, 0], sizes = [1, 128], strides = [1, 1]} : vector<8x128xf32> to vector<1x128xf32>
    %240 = vector.shape_cast %239 : vector<1x128xf32> to vector<128xf32>
    %241 = vector.shape_cast %240 : vector<128xf32> to vector<1x128xf32>
    %242 = vector.broadcast %241 : vector<1x128xf32> to vector<16x128xf32>
    %243 = arith.addf %238, %242 : vector<16x128xf32>
    %c0_85 = arith.constant 0 : index
    %c0_86 = arith.constant 0 : index
    %244 = vector.load %arg10[%c0_85, %c0_86] : memref<16x128xf32, #tpu.memory_space<vmem>>, vector<16x128xf32>
    tpu.vector_store %arg10[%c0_85, %c0_86], %243 {strides = array<i32>} : memref<16x128xf32, #tpu.memory_space<vmem>>, vector<16x128xf32>,
    return
  }
  func.func @transform_0(%arg0: i32, %arg1: i32) -> (i32, i32) {
    %c0_i32 = arith.constant 0 : i32
    %c0_i32_0 = arith.constant 0 : i32
    return %arg0, %c0_i32 : i32, i32
  }
  func.func @transform_1(%arg0: i32, %arg1: i32) -> (i32, i32, i32) {
    %c0_i32 = arith.constant 0 : i32
    %c0_i32_0 = arith.constant 0 : i32
    %c0_i32_1 = arith.constant 0 : i32
    return %arg1, %c0_i32, %c0_i32_0 : i32, i32, i32
  }
  func.func @transform_2(%arg0: i32, %arg1: i32) -> (i32, i32, i32) {
    %c0_i32 = arith.constant 0 : i32
    %c0_i32_0 = arith.constant 0 : i32
    %c0_i32_1 = arith.constant 0 : i32
    return %arg1, %c0_i32, %c0_i32_0 : i32, i32, i32
  }
  func.func @transform_3(%arg0: i32, %arg1: i32) -> (i32, i32, i32) {
    %c0_i32 = arith.constant 0 : i32
    %c0_i32_0 = arith.constant 0 : i32
    %c0_i32_1 = arith.constant 0 : i32
    return %arg1, %c0_i32, %c0_i32_0 : i32, i32, i32
  }
  func.func @transform_4(%arg0: i32, %arg1: i32) -> (i32, i32, i32) {
    %c0_i32 = arith.constant 0 : i32
    %c0_i32_0 = arith.constant 0 : i32
    %c0_i32_1 = arith.constant 0 : i32
    return %arg1, %c0_i32, %c0_i32_0 : i32, i32, i32
  }
  func.func @transform_5(%arg0: i32, %arg1: i32) -> (i32, i32, i32) {
    %c0_i32 = arith.constant 0 : i32
    %c0_i32_0 = arith.constant 0 : i32
    %c0_i32_1 = arith.constant 0 : i32
    return %arg1, %c0_i32, %c0_i32_0 : i32, i32, i32
  }
  func.func @transform_6(%arg0: i32, %arg1: i32) -> (i32, i32, i32) {
    %c0_i32 = arith.constant 0 : i32
    %c0_i32_0 = arith.constant 0 : i32
    %c0_i32_1 = arith.constant 0 : i32
    return %arg1, %c0_i32, %c0_i32_0 : i32, i32, i32
  }
  func.func @transform_7(%arg0: i32, %arg1: i32) -> (i32, i32, i32) {
    %c0_i32 = arith.constant 0 : i32
    %c0_i32_0 = arith.constant 0 : i32
    %c0_i32_1 = arith.constant 0 : i32
    return %arg1, %c0_i32, %c0_i32_0 : i32, i32, i32
  }
  func.func @transform_8(%arg0: i32, %arg1: i32) -> (i32, i32) {
    %c0_i32 = arith.constant 0 : i32
    %c0_i32_0 = arith.constant 0 : i32
    return %arg0, %c0_i32 : i32, i32
  }
}

</mosaic_0001>

<bundles_post_ra>
// kernel: tpu_custom_call.1
= control target key start
LH: loop header
LB: loop body
LE: loop exit
PB: predicated region body
PF: predicated region fallthrough
CT: control target
= control target key end

     0   :  { %s4451_s0 = inlined_call_operand.hbm [shape: f32[32,128], index: 0, kind: input, shape index: {}]   ;;  %s4452_s1 = inlined_call_operand.hbm [shape: bf16[2,128,384], index: 1, kind: input, shape index: {}]   ;;  %s4453_s2 = inlined_call_operand.hbm [shape: bf16[2,128,128], index: 2, kind: input, shape index: {}]   ;;  %s4454_s3 = inlined_call_operand.hbm [shape: bf16[2,128,512], index: 3, kind: input, shape index: {}]   ;;  %s4455_s4 = inlined_call_operand.hbm [shape: bf16[2,512,128], index: 4, kind: input, shape index: {}]   ;;  %s4456_s5 = inlined_call_operand.hbm [shape: f32[2,8,128], index: 5, kind: input, shape index: {}]   ;;  %s4457_s6 = inlined_call_operand.hbm [shape: f32[2,1,384], index: 6, kind: input, shape index: {}]   ;;  %s4458_s7 = inlined_call_operand.hbm [shape: f32[2,1,512], index: 7, kind: input, shape index: {}]   ;;  %s4459_s8 = inlined_call_operand.hbm [shape: f32[32,128], index: 8, kind: output, shape index: {}]  }
   0x1   :  { %4492 = sst [smem:[#allocation39_spill]] %s4451_s0 }
   0x2   :  { %4493 = sst [smem:[#allocation40_spill]] %s4452_s1 }
   0x3   :  { %4494 = sst [smem:[#allocation41_spill]] %s4453_s2 }
   0x4   :  { %4495 = sst [smem:[#allocation42_spill]] %s4454_s3 }
   0x5   :  { %4496 = sst [smem:[#allocation43_spill]] %s4456_s5 }
   0x6   :  { %4497 = sst [smem:[#allocation44_spill]] %s4457_s6 }
   0x7   :  { %4498 = sst [smem:[#allocation45_spill]] %s4458_s7 }
   0x8   :  { %4499 = sst [smem:[#allocation46_spill]] %s4459_s8 }
   0x9   :  { %13 = vsyncpa [#allocation5], 0 }
   0xa   :  { %14 = vsyncpa [#allocation8], 0 }
   0xb   :  { %16 = vsyncpa [#allocation8 + $0x1], 0 }
   0xc   :  { %17 = vsyncpa [#allocation11], 0 }
   0xd   :  { %19 = vsyncpa [#allocation11 + $0x1], 0 }
   0xe   :  { %20 = vsyncpa [#allocation14], 0 }
   0xf   :  { %22 = vsyncpa [#allocation14 + $0x1], 0 }
  0x10   :  { %23 = vsyncpa [#allocation17], 0 }
  0x11   :  { %25 = vsyncpa [#allocation17 + $0x1], 0 }
  0x12   :  { %26 = vsyncpa [#allocation6], 0 }
  0x13   :  { %28 = vsyncpa [#allocation6 + $0x1], 0  ;;  %s3657_s27 = smov 0   ;;  %s3659_s28 = smov 0  }
  0x14   :  { %s3661_s29 = smov 0   ;;  %s3663_s30 = smov 0  }
  0x15   :  { %s3665_s9 = smov 0   ;;  %s3667_s10 = smov 0  }
  0x16   :  { %s3669_s11 = smov 0   ;;  %s3671_s12 = smov 0  }
  0x17   :  { %s3673_s13 = smov 0   ;;  %s3675_s14 = smov 0  }
  0x18   :  { %s3677_s15 = smov 0  }
  0x19 LB: > { %4500 = sst [smem:[#allocation25_spill]] %s3551_s28  ;;  %s43_s16 = sadd.s32 1, %s3579_s13  ;;  %s3587_s15 = sphi %s3677_s15, %s34_s15   ;;  %s3583_s14 = sphi %s3675_s14, %s4564_s14   ;;  %s3579_s13 = sphi %s3673_s13, %s4569_s13   ;;  %s3575_s12 = sphi %s3671_s12, %s4562_s12   ;;  %s3571_s11 = sphi %s3669_s11, %s4568_s11   ;;  %s3567_s10 = sphi %s3667_s10, %s4567_s10   ;;  %s3563_s9 = sphi %s3665_s9, %s4566_s9   ;;  %s3559_s30 = sphi %s3663_s30, %s4565_s30   ;;  %s3555_s29 = sphi %s3661_s29, %s4559_s29   ;;  %s3551_s28 = sphi %s3659_s28, %s4558_s28   ;;  %s3547_s27 = sphi %s3657_s27, %s4557_s27  }
  0x1a   : > { %4501 = sst [smem:[#allocation26_spill]] %s3555_s29  ;;  %s79_s17 = sadd.s32 1, %s3555_s29 }
  0x1b   : > { %4502 = sst [smem:[#allocation27_spill]] %s3559_s30  ;;  %p3714_p0 = scmp.ge.s32.totalorder %s43_s16, 2 }
  0x1c   : > { %4503 = sst [smem:[#allocation28_spill]] %s3567_s10  ;;  %p86_p1 = scmp.ne.s32.totalorder %s3555_s29, %s3551_s28 }
  0x1d   : > { %4504 = sst [smem:[#allocation29_spill]] %s3571_s11  ;;  %p87_p2 = scmp.eq.s32.totalorder %s3587_s15, 0 }
  0x1e   : > { %4505 = sst [smem:[#allocation30_spill]] %s3575_s12  ;;  %s4571_s16 = smov (%p3714_p0, %s43_s16), 0 }
  0x1f   : > { %4506 = sst [smem:[#allocation31_spill]] %s3583_s14  ;;  %p88_p3 = por %p87_p2, %p86_p1 }
  0x20   : > { %4507 = sst [smem:[#allocation32_spill]] %s3587_s15  ;;  %p2928_p4 = scmp.lt.s32.totalorder %s3587_s15, 4 }
  0x21   : > { %s4508_s18 = scalar_select %p3714_p0, 1, 0 }
  0x22   : > { %4509 = sst [smem:[#allocation33_spill]] %s4571_s16  ;;  %s76_s19 = ssub.s32 %s3579_s13, %s4571_s16 }
  0x23   : > { %s3729_s20 = sand.u32 1, %s3587_s15   ;;  %p77_p5 = scmp.eq.s32.totalorder %s76_s19, 0 }
  0x24   : > { %s3732_s21 = sand.u32 1, %s3555_s29   ;;  %s2875_s22 = smul.u32 3072, %s3579_s13 }
  0x25   : > { %s3736_s23 = scalar_select %p77_p5, %s3555_s29, %s79_s17  }
  0x26   : > { %s2874_s24 = smul.u32 192, %s3732_s21  ;;  %s4511_s1 = sld [smem:[#allocation40_spill]] }
  0x27   : > { %4510 = sst [smem:[#allocation34_spill]] %s3736_s23  ;;  %p3744_p6 = pnand %p2928_p4, %p88_p3 }
  0x28   : > { %s318_s19 = scalar_lea.vmem [#allocation7], %s2874_s24 }
  0x29   : > { %s4512_s16 = scalar_select %p3744_p6, 1, 0 }
  0x2a   : > { %s325_s11 = sshll.u32 %s318_s19, 4  ;;  %p3755_p8 = pneg %p3744_p6  ;;  %s3748_s11 = int_to_ptr.vmem [resolvable:$true] %s325_s11 }
  0x2c   : > { %s3742_s8 = scalar_lea.hbm %s4511_s1, %s2875_s22  ;;  %s3214_s29 = scalar_lea.hbm %s4511_s1, 6144 }
  0x2d   : > { %s3209_s23 = scalar_lea.hbm %s3742_s8, 3072  ;;  %p3215_p11 = scmp.lt.u32.totalorder %s3742_s8, %s4511_s1 }
  0x2e   : > { %p3210_p7 = scmp.ne.s32.totalorder %s3742_s8, %s3209_s23  ;;  %p3216_p12 = scmp.lt.u32.totalorder %s3214_s29, %s3209_s23 }
  0x2f   : > { %s4513_s22 = scalar_select %p3755_p8, 1, 0 }
  0x30   : > { %p3212_p9 = pnand %p3755_p8, %p3210_p7  ;;  %p3217_p13 = por %p3216_p12, %p3215_p11 }
  0x31   : > { %p3218_p1 = scmp.lt.u32.totalorder %s3209_s23, %s3742_s8 }
  0x32   : > { %p3213_p10 = pneg %p3212_p9 }
  0x33   : > { %p3219_p2 = por %p3218_p1, %p3217_p13 }
  0x35   : > { %p3220_p3 = pnand %p3219_p2, %p3213_p10 }
  0x37   : > { %3223 = shalt.err (!%p3220_p3)
}
  0x38   : > { %s3224_s17 = scalar_lea.vmem %s3748_s11, 3072  ;;  %s3589_s25 = smov [#allocation7]  }
  0x39   : > { %p3225_p4 = scmp.ne.s32.totalorder %s3748_s11, %s3224_s17  ;;  %s3229_s26 = sshll.u32 %s3589_s25, 4  ;;  %s3230_s26 = int_to_ptr.vmem [resolvable:$false] %s3229_s26 }
  0x3a   : > { %s3231_s24 = scalar_lea.vmem %s3230_s26, 6144  ;;  %p3232_p9 = scmp.lt.s32.totalorder %s3748_s11, %s3230_s26 }
  0x3b   : > { %p3227_p5 = pnand %p3225_p4, %p3755_p8  ;;  %p3233_p0 = scmp.lt.s32.totalorder %s3231_s24, %s3224_s17 }
  0x3d   : > { %p3228_p7 = pneg %p3227_p5  ;;  %p3234_p11 = por %p3233_p0, %p3232_p9 }
  0x3f   : > { %p3235_p12 = pnand %p3234_p11, %p3228_p7 }
  0x41   : > { %3238 = shalt.err (!%p3235_p12)
}
  0x42   : > { %s3590_s29 = smov 192   ;;  %s3591_s23 = smov 12  }
  0x43   : > { %s4514_s19 = scalar_lea.sflag [#allocation8], %s3729_s20  ;;  %s2516_s25 = sshll.u32 %s3732_s21, 8 }
  0x44   : > { %2905 = dma.hbm_to_vmem [thread:$0]  (!%p3744_p6), %s3742_s8, 3072, %s3748_s11, %s4514_s19, %s3590_s29, %s3590_s29, %s3591_s23  }
  0x45   : > { %s2704_s17 = sshll.u32 %s3579_s13, 12  ;;  %s4515_s3 = sld [smem:[#allocation42_spill]] }
  0x46   : > { %s360_s7 = scalar_lea.vmem [#allocation10], %s2516_s25  ;;  %s4473_s2 = scalar_lea.sflag [#allocation11], %s3729_s20 }
  0x47   : > { %s367_s6 = sshll.u32 %s360_s7, 4  ;;  %s3791_s6 = int_to_ptr.vmem [resolvable:$true] %s367_s6 }
  0x4b   : > { %s3787_s1 = scalar_lea.hbm %s4515_s3, %s2704_s17  ;;  %s3244_s29 = scalar_lea.hbm %s4515_s3, 8192 }
  0x4c   : > { %s3239_s0 = scalar_lea.hbm %s3787_s1, 4096  ;;  %p3245_p1 = scmp.lt.u32.totalorder %s3787_s1, %s4515_s3 }
  0x4d   : > { %p3240_p0 = scmp.ne.s32.totalorder %s3787_s1, %s3239_s0  ;;  %p3246_p2 = scmp.lt.u32.totalorder %s3244_s29, %s3239_s0 }
  0x4e   : > { %p3248_p4 = scmp.lt.u32.totalorder %s3239_s0, %s3787_s1 }
  0x4f   : > { %p3242_p10 = pnand %p3240_p0, %p3755_p8  ;;  %p3247_p3 = por %p3246_p2, %p3245_p1 }
  0x51   : > { %p3243_p13 = pneg %p3242_p10  ;;  %p3249_p5 = por %p3248_p4, %p3247_p3 }
  0x53   : > { %p3250_p7 = pnand %p3249_p5, %p3243_p13 }
  0x55   : > { %3253 = shalt.err (!%p3250_p7)
}
  0x56   : > { %s3254_s7 = scalar_lea.vmem %s3791_s6, 4096  ;;  %s3592_s26 = smov [#allocation10]  }
  0x57   : > { %p3255_p9 = scmp.ne.s32.totalorder %s3791_s6, %s3254_s7  ;;  %s3259_s24 = sshll.u32 %s3592_s26, 4  ;;  %s3260_s24 = int_to_ptr.vmem [resolvable:$false] %s3259_s24 }
  0x58   : > { %s3261_s8 = scalar_lea.vmem %s3260_s24, 8192  ;;  %p3262_p0 = scmp.lt.s32.totalorder %s3791_s6, %s3260_s24 }
  0x59   : > { %p3257_p11 = pnand %p3255_p9, %p3755_p8  ;;  %p3263_p10 = scmp.lt.s32.totalorder %s3261_s8, %s3254_s7 }
  0x5b   : > { %p3258_p12 = pneg %p3257_p11  ;;  %p3264_p1 = por %p3263_p10, %p3262_p0 }
  0x5d   : > { %p3265_p2 = pnand %p3264_p1, %p3258_p12 }
  0x5f   : > { %3268 = shalt.err (!%p3265_p2)
}
  0x60   : > { %s3593_s0 = smov 256   ;;  %s3594_s11 = smov 16  }
  0x61   : > { %2911 = dma.hbm_to_vmem [thread:$0]  (!%p3744_p6), %s3787_s1, 4096, %s3791_s6, %s4473_s2, %s3593_s0, %s3593_s0, %s3594_s11  }
  0x62   : > { %s3822_s19 = scalar_lea.hbm %s4455_s4, %s2704_s17  ;;  %s381_s7 = scalar_lea.vmem [#allocation12], %s2516_s25 }
  0x63   : > { %s388_s26 = sshll.u32 %s381_s7, 4  ;;  %s2522_s24 = sshll.u32 %s3732_s21, 3  ;;  %s3826_s26 = int_to_ptr.vmem [resolvable:$true] %s388_s26 }
  0x64   : > { %s2523_s8 = sshll.u32 %s3579_s13, 7  ;;  %s4516_s5 = sld [smem:[#allocation43_spill]] }
  0x65   : > { %s402_s1 = scalar_lea.vmem [#allocation13], %s2522_s24  ;;  %s4472_s17 = scalar_lea.sflag [#allocation14], %s3729_s20 }
  0x66   : > { %s409_s6 = sshll.u32 %s402_s1, 4  ;;  %s410_s6 = int_to_ptr.vmem [resolvable:$true] %s409_s6 }
  0x6a   : > { %s3833_s28 = scalar_lea.hbm %s4516_s5, %s2523_s8  ;;  %s3274_s29 = scalar_lea.hbm %s4516_s5, 256 }
  0x6b   : > { %s3269_s0 = scalar_lea.hbm %s3833_s28, 128  ;;  %p3275_p5 = scmp.lt.u32.totalorder %s3833_s28, %s4516_s5 }
  0x6c   : > { %p3270_p13 = scmp.ne.s32.totalorder %s3833_s28, %s3269_s0  ;;  %p3276_p7 = scmp.lt.u32.totalorder %s3274_s29, %s3269_s0 }
  0x6d   : > { %p3278_p11 = scmp.lt.u32.totalorder %s3269_s0, %s3833_s28 }
  0x6e   : > { %p3272_p3 = pnand %p3270_p13, %p3755_p8  ;;  %p3277_p9 = por %p3276_p7, %p3275_p5 }
  0x70   : > { %p3273_p4 = pneg %p3272_p3  ;;  %p3279_p12 = por %p3278_p11, %p3277_p9 }
  0x72   : > { %p3280_p0 = pnand %p3279_p12, %p3273_p4 }
  0x74   : > { %3283 = shalt.err (!%p3280_p0)
}
  0x75   : > { %s3284_s23 = scalar_lea.vmem %s410_s6, 128  ;;  %s3595_s7 = smov [#allocation13]  }
  0x76   : > { %p3285_p10 = scmp.ne.s32.totalorder %s410_s6, %s3284_s23  ;;  %s3289_s24 = sshll.u32 %s3595_s7, 4  ;;  %s3290_s24 = int_to_ptr.vmem [resolvable:$false] %s3289_s24 }
  0x77   : > { %s3291_s8 = scalar_lea.vmem %s3290_s24, 256  ;;  %p3292_p13 = scmp.lt.s32.totalorder %s410_s6, %s3290_s24 }
  0x78   : > { %p3287_p1 = pnand %p3285_p10, %p3755_p8  ;;  %p3293_p3 = scmp.lt.s32.totalorder %s3291_s8, %s3284_s23 }
  0x7a   : > { %p3288_p2 = pneg %p3287_p1  ;;  %p3294_p6 = por %p3293_p3, %p3292_p13 }
  0x7c   : > { %p3295_p5 = pnand %p3294_p6, %p3288_p2 }
  0x7e   : > { %3298 = shalt.err (!%p3295_p5)
}
  0x7f   : > { %p4517_p7 = scmp.ne.s32.totalorder %s4512_s16, 0  ;;  %s4518_s1 = sld [smem:[#allocation25_spill]] }
  0x80   : > { %s3856_s0 = sadd.s32 4294967295, %s3587_s15   ;;  %s2507_s25 = sadd.s32 4294967294, %s3587_s15  }
  0x81   : > { %2917 = dma.hbm_to_vmem [thread:$0]  (!%p4517_p7), %s3833_s28, 128, %s410_s6, %s4472_s17  }
  0x82   : > { %s46_s11 = sadd.s32 1, %s3583_s14  ;;  %p4519_p6 = scmp.ne.s32.totalorder %s4508_s18, 0 }
  0x83   : > { %s53_s29 = sadd.s32 1, %s3567_s10  ;;  %p66_p4 = scmp.ne.s32.totalorder %s3563_s9, %s3559_s30 }
  0x84   : > { %s4573_s11 = smov (!%p4519_p6, %s46_s11), %s3583_s14  ;;  %s4520_s3 = sld [smem:[#allocation30_spill]] }
  0x85   : > { %p48_p9 = scmp.ge.s32.totalorder %s4573_s11, 2  ;;  %p67_p11 = scmp.eq.s32.totalorder %s3856_s0, 0 }
  0x86   : > { %p92_p12 = scmp.ne.s32.totalorder %s4518_s1, %s3547_s27  ;;  %p271_p0 = scmp.ne.s32.totalorder %s3567_s10, %s3563_s9 }
  0x87   : > { %s4575_s11 = smov (%p48_p9, %s4573_s11), 0  ;;  %p3876_p10 = por %p67_p11, %p66_p4 }
  0x88   : > { %4521 = sst [smem:[#allocation35_spill]] %s4575_s11  ;;  %p3880_p1 = por %p92_p12, %p67_p11 }
  0x89   : > { %s4522_s28 = scalar_select %p3876_p10, 1, 0 }
  0x8a   : > { %s4523_s18 = scalar_select %p3880_p1, 1, 0 }
  0x8b   : > { %s50_s6 = ssub.s32 %s3583_s14, %s4575_s11  ;;  %p272_p2 = scmp.eq.s32.totalorder %s3856_s0, 3 }
  0x8c   : > { %p51_p13 = scmp.eq.s32.totalorder %s50_s6, 0  ;;  %p278_p3 = scmp.eq.s32.totalorder %s2507_s25, 3 }
  0x8d   : > { %p3887_p5 = por %p272_p2, %p271_p0  ;;  %p2508_p6 = scmp.ge.s32.totalorder %s3587_s15, 1 }
  0x8e   : > { %s3893_s12 = scalar_select %p51_p13, %s3567_s10, %s53_s29  }
  0x8f   : > { %s4524_s27 = scalar_select %p3887_p5, 1, 0 }
  0x90   : > { %4526 = sst [smem:[#allocation37_spill]] %s3893_s12  ;;  %p3898_p9 = por %p278_p3, %p66_p4 }
  0x91   : > { %4525 = sst [smem:[#allocation36_spill]] %s4524_s27  ;;  %p285_p11 = scmp.lt.s32.totalorder %s3587_s15, 5 }
  0x92   : > { %s4527_s23 = scalar_select %p3898_p9, 1, 0 }
  0x93   : > { %s4474_s7 = sshll.u32 %s4520_s3, 8  ;;  %p3904_p12 = pnand %p2508_p6, %p285_p11 }
  0x94   : > { %4528 = sst [smem:[#allocation38_spill]] %s4527_s23  ;;  %s4530_s25 = sld [smem:[#allocation39_spill]] }
  0x95   : > { %s4529_s24 = scalar_select %p3904_p12, 1, 0 }
  0x96   : > { %s3596_s29 = smov [#allocation4]   ;;  %p2898_p4 = pneg %p3904_p12 }
  0x97   : > { %s300_s17 = sshll.u32 %s3596_s29, 4  ;;  %s2513_s2 = sshll.u32 %s3732_s21, 6  ;;  %s3917_s17 = int_to_ptr.vmem [resolvable:$true] %s300_s17 }
  0x98   : > { %p3922_p0 = pnand %p2898_p4, %p3876_p10  ;;  %s2703_s8 = sshll.u32 %s3579_s13, 10 }
  0x99   : > { %s3927_s1 = scalar_lea.vmem [#allocation9], %s2513_s2  ;;  %s4532_s11 = sld [smem:[#allocation41_spill]] }
  0x9a   : > { %s3913_s6 = scalar_lea.hbm %s4530_s25, %s4474_s7  ;;  %s346_s7 = sshll.u32 %s3927_s1, 4  ;;  %s3963_s7 = int_to_ptr.vmem [resolvable:$true] %s346_s7 }
  0x9b   : > { %s3299_s12 = scalar_lea.hbm %s3913_s6, 256  ;;  %p3301_p13 = pneg %p3922_p0 }
  0x9c   : > { %p3300_p2 = scmp.ne.s32.totalorder %s3913_s6, %s3299_s12  ;;  %s3304_s2 = scalar_lea.hbm %s4530_s25, 512 }
  0x9d   : > { %p3305_p11 = scmp.lt.u32.totalorder %s3913_s6, %s4530_s25  ;;  %p3306_p4 = scmp.lt.u32.totalorder %s3304_s2, %s3299_s12 }
  0x9e   : > { %p3302_p3 = pnand %p3301_p13, %p3300_p2  ;;  %p3308_p5 = scmp.lt.u32.totalorder %s3299_s12, %s3913_s6 }
  0x9f   : > { %s4533_s23 = smov %s4532_s11  ;;  %s3933_s14 = scalar_lea.hbm %s4532_s11, %s2703_s8 }
  0xa0   : > { %p3303_p6 = pneg %p3302_p3  ;;  %p3307_p9 = por %p3306_p4, %p3305_p11 }
  0xa2   : > { %p3309_p1 = por %p3308_p5, %p3307_p9 }
  0xa4   : > { %p3310_p10 = pnand %p3309_p1, %p3303_p6 }
  0xa6   : > { %3313 = shalt.err (!%p3310_p10)
}
  0xa7   : > { %s3314_s5 = scalar_lea.vmem %s3917_s17, 256  ;;  %p3322_p7 = scmp.lt.s32.totalorder %s3917_s17, %s3917_s17 }
  0xa8   : > { %p3315_p2 = scmp.ne.s32.totalorder %s3917_s17, %s3314_s5  ;;  %p3323_p8 = scmp.lt.s32.totalorder %s3314_s5, %s3314_s5 }
  0xaa   : > { %p3317_p3 = pnand %p3315_p2, %p3301_p13  ;;  %p3324_p4 = por %p3323_p8, %p3322_p7 }
  0xac   : > { %p3318_p12 = pneg %p3317_p3 }
  0xae   : > { %p3325_p11 = pnand %p3324_p4, %p3318_p12 }
  0xb0   : > { %3328 = shalt.err (!%p3325_p11)
}
  0xb1   : > { %s3597_s30 = smov 128   ;;  %s3598_s10 = smov 8  }
  0xb2   : > { %2901 = dma.hbm_to_vmem [thread:$0]  (!%p3922_p0), %s3913_s6, 256, %s3917_s17, [#allocation5], %s3597_s30, %s3597_s30, %s3598_s10  }
  0xb3   : > { %s2876_s15 = smul.u32 3, %s3732_s21  ;;  %s3329_s11 = scalar_lea.hbm %s3933_s14, 1024 }
  0xb4   : > { %p3330_p8 = scmp.ne.s32.totalorder %s3933_s14, %s3329_s11  ;;  %p4534_p7 = scmp.ne.s32.totalorder %s4513_s22, 0 }
  0xb5   : > { %s3334_s8 = scalar_lea.hbm %s4533_s23, 2048  ;;  %p3335_p5 = scmp.lt.u32.totalorder %s3933_s14, %s4533_s23 }
  0xb6   : > { %p3332_p10 = pnand %p3330_p8, %p4534_p7  ;;  %p3336_p9 = scmp.lt.u32.totalorder %s3334_s8, %s3329_s11 }
  0xb7   : > { %p3338_p0 = scmp.lt.u32.totalorder %s3329_s11, %s3933_s14 }
  0xb8   : > { %p3333_p1 = pneg %p3332_p10  ;;  %p3337_p12 = por %p3336_p9, %p3335_p5 }
  0xba   : > { %p3339_p13 = por %p3338_p0, %p3337_p12 }
  0xbc   : > { %p3340_p6 = pnand %p3339_p13, %p3333_p1 }
  0xbe   : > { %3343 = shalt.err (!%p3340_p6)
}
  0xbf   : > { %s3344_s17 = scalar_lea.vmem %s3963_s7, 1024  ;;  %s3599_s6 = smov [#allocation9]  }
  0xc0   : > { %p3345_p2 = scmp.ne.s32.totalorder %s3963_s7, %s3344_s17  ;;  %s3349_s3 = sshll.u32 %s3599_s6, 4  ;;  %s3350_s3 = int_to_ptr.vmem [resolvable:$false] %s3349_s3 }
  0xc1   : > { %s3351_s1 = scalar_lea.vmem %s3350_s3, 2048  ;;  %p3352_p11 = scmp.lt.s32.totalorder %s3963_s7, %s3350_s3 }
  0xc2   : > { %p3347_p3 = pnand %p3345_p2, %p4534_p7  ;;  %p3353_p8 = scmp.lt.s32.totalorder %s3351_s1, %s3344_s17 }
  0xc4   : > { %p3348_p4 = pneg %p3347_p3  ;;  %p3354_p10 = por %p3353_p8, %p3352_p11 }
  0xc6   : > { %p3355_p5 = pnand %p3354_p10, %p3348_p4 }
  0xc8   : > { %3358 = shalt.err (!%p3355_p5)
}
  0xc9   : > { %s3600_s5 = smov 64   ;;  %s3601_s30 = smov 4  }
  0xca   : > { %p4535_p1 = scmp.ne.s32.totalorder %s4512_s16, 0  ;;  %s4536_s10 = scalar_lea.sflag [#allocation8], %s3729_s20 }
  0xcb   : > { %s3359_s11 = scalar_lea.hbm %s3822_s19, 4096  ;;  %s3364_s8 = scalar_lea.hbm %s4455_s4, 8192 }
  0xcc   : > { %2908 = dma.hbm_to_vmem [thread:$0]  (!%p4535_p1), %s3933_s14, 1024, %s3963_s7, %s4536_s10, %s3600_s5, %s3600_s5, %s3601_s30  }
  0xcd   : > { %p3360_p9 = scmp.ne.s32.totalorder %s3822_s19, %s3359_s11  ;;  %p3365_p13 = scmp.lt.u32.totalorder %s3822_s19, %s4455_s4 }
  0xce   : > { %p3366_p6 = scmp.lt.u32.totalorder %s3364_s8, %s3359_s11  ;;  %p3368_p3 = scmp.lt.u32.totalorder %s3359_s11, %s3822_s19 }
  0xcf   : > { %p3362_p12 = pnand %p3360_p9, %p4534_p7 }
  0xd0   : > { %p3367_p2 = por %p3366_p6, %p3365_p13 }
  0xd1   : > { %p3363_p0 = pneg %p3362_p12 }
  0xd2   : > { %p3369_p4 = por %p3368_p3, %p3367_p2 }
  0xd4   : > { %p3370_p11 = pnand %p3369_p4, %p3363_p0 }
  0xd6   : > { %3373 = shalt.err (!%p3370_p11)
}
  0xd7   : > { %s3374_s14 = scalar_lea.vmem %s3826_s26, 4096  ;;  %s3602_s7 = smov [#allocation12]  }
  0xd8   : > { %p3375_p8 = scmp.ne.s32.totalorder %s3826_s26, %s3374_s14  ;;  %s3379_s17 = sshll.u32 %s3602_s7, 4  ;;  %s3380_s17 = int_to_ptr.vmem [resolvable:$false] %s3379_s17 }
  0xd9   : > { %s3381_s6 = scalar_lea.vmem %s3380_s17, 8192  ;;  %p3382_p9 = scmp.lt.s32.totalorder %s3826_s26, %s3380_s17 }
  0xda   : > { %p3377_p10 = pnand %p3375_p8, %p4534_p7  ;;  %p3383_p12 = scmp.lt.s32.totalorder %s3381_s6, %s3374_s14 }
  0xdc   : > { %p3378_p5 = pneg %p3377_p10  ;;  %p3384_p13 = por %p3383_p12, %p3382_p9 }
  0xde   : > { %p3385_p6 = pnand %p3384_p13, %p3378_p5 }
  0xe0   : > { %3388 = shalt.err (!%p3385_p6)
}
  0xe1   : > { %s4537_s3 = scalar_lea.sflag [#allocation11], %s3729_s20  ;;  %s2877_s1 = smul.u32 48, %s3579_s13 }
  0xe2   : > { %2914 = dma.hbm_to_vmem [thread:$0]  (!%p4535_p1), %s3822_s19, 4096, %s3826_s26, %s4537_s3, %s3600_s5, %s3600_s5, %s3601_s30  }
  0xe3   : > { %s420_s10 = scalar_lea.vmem [#allocation15], %s2876_s15  ;;  %s4538_s8 = sld [smem:[#allocation44_spill]] }
  0xe4   : > { %s428_s11 = sshll.u32 %s420_s10, 4  ;;  %s429_s11 = int_to_ptr.vmem [resolvable:$true] %s428_s11 }
  0xe9   : > { %s426_s29 = scalar_lea.hbm %s4538_s8, %s2877_s1  ;;  %s3394_s17 = scalar_lea.hbm %s4538_s8, 96 }
  0xea   : > { %s3389_s2 = scalar_lea.hbm %s426_s29, 48  ;;  %p3395_p4 = scmp.lt.u32.totalorder %s426_s29, %s4538_s8 }
  0xeb   : > { %p3390_p0 = scmp.ne.s32.totalorder %s426_s29, %s3389_s2  ;;  %p3396_p11 = scmp.lt.u32.totalorder %s3394_s17, %s3389_s2 }
  0xec   : > { %p3398_p10 = scmp.lt.u32.totalorder %s3389_s2, %s426_s29 }
  0xed   : > { %p3392_p2 = pnand %p3390_p0, %p4534_p7  ;;  %p3397_p8 = por %p3396_p11, %p3395_p4 }
  0xef   : > { %p3393_p3 = pneg %p3392_p2  ;;  %p3399_p5 = por %p3398_p10, %p3397_p8 }
  0xf1   : > { %p3400_p9 = pnand %p3399_p5, %p3393_p3 }
  0xf3   : > { %3403 = shalt.err (!%p3400_p9)
}
  0xf4   : > { %s3404_s26 = scalar_lea.vmem %s429_s11, 48  ;;  %s3603_s15 = smov [#allocation15]  }
  0xf5   : > { %p3405_p12 = scmp.ne.s32.totalorder %s429_s11, %s3404_s26  ;;  %s3409_s5 = sshll.u32 %s3603_s15, 4  ;;  %s3410_s5 = int_to_ptr.vmem [resolvable:$false] %s3409_s5 }
  0xf6   : > { %s3411_s30 = scalar_lea.vmem %s3410_s5, 96  ;;  %p3412_p0 = scmp.lt.s32.totalorder %s429_s11, %s3410_s5 }
  0xf7   : > { %p3407_p13 = pnand %p3405_p12, %p4534_p7  ;;  %p3413_p2 = scmp.lt.s32.totalorder %s3411_s30, %s3404_s26 }
  0xf9   : > { %p3408_p6 = pneg %p3407_p13  ;;  %p3414_p1 = por %p3413_p2, %p3412_p0 }
  0xfb   : > { %p3415_p4 = pnand %p3414_p1, %p3408_p6 }
  0xfd   : > { %3418 = shalt.err (!%p3415_p4)
}
  0xfe   : > { %p4539_p11 = scmp.ne.s32.totalorder %s4512_s16, 0  ;;  %s4540_s3 = scalar_lea.sflag [#allocation14], %s3729_s20 }
  0xff   : > { %s2525_s1 = sshll.u32 %s3732_s21, 2  ;;  %s2706_s10 = sshll.u32 %s3579_s13, 6 }
 0x100   : > { %2920 = dma.hbm_to_vmem [thread:$0]  (!%p4539_p11), %s426_s29, 48, %s429_s11, %s4540_s3  }
 0x101   : > { %s4541_s2 = sld [smem:[#allocation45_spill]]  ;;  %s439_s7 = scalar_lea.vmem [#allocation16], %s2525_s1 }
 0x102   : > { %s447_s17 = sshll.u32 %s439_s7, 4  ;;  %s436_s20 = scalar_lea.sflag [#allocation17], %s3732_s21  ;;  %s448_s17 = int_to_ptr.vmem [resolvable:$true] %s447_s17 }
 0x107   : > { %s4043_s14 = scalar_lea.hbm %s4541_s2, %s2706_s10  ;;  %s3424_s19 = scalar_lea.hbm %s4541_s2, 128 }
 0x108   : > { %s3419_s6 = scalar_lea.hbm %s4043_s14, 64  ;;  %p3425_p10 = scmp.lt.u32.totalorder %s4043_s14, %s4541_s2 }
 0x109   : > { %p3420_p1 = scmp.ne.s32.totalorder %s4043_s14, %s3419_s6  ;;  %p3426_p5 = scmp.lt.u32.totalorder %s3424_s19, %s3419_s6 }
 0x10a   : > { %p3428_p12 = scmp.lt.u32.totalorder %s3419_s6, %s4043_s14 }
 0x10b   : > { %p3422_p3 = pnand %p3420_p1, %p4534_p7  ;;  %p3427_p9 = por %p3426_p5, %p3425_p10 }
 0x10d   : > { %p3423_p8 = pneg %p3422_p3  ;;  %p3429_p13 = por %p3428_p12, %p3427_p9 }
 0x10f   : > { %p3430_p6 = pnand %p3429_p13, %p3423_p8 }
 0x111   : > { %3433 = shalt.err (!%p3430_p6)
}
 0x112   : > { %s3434_s21 = scalar_lea.vmem %s448_s17, 64  ;;  %s3604_s5 = smov [#allocation16]  }
 0x113   : > { %p3435_p0 = scmp.ne.s32.totalorder %s448_s17, %s3434_s21  ;;  %s3439_s30 = sshll.u32 %s3604_s5, 4  ;;  %s3440_s30 = int_to_ptr.vmem [resolvable:$false] %s3439_s30 }
 0x114   : > { %s3441_s3 = scalar_lea.vmem %s3440_s30, 128  ;;  %p3442_p1 = scmp.lt.s32.totalorder %s448_s17, %s3440_s30 }
 0x115   : > { %p3437_p2 = pnand %p3435_p0, %p4534_p7  ;;  %p3443_p3 = scmp.lt.s32.totalorder %s3441_s3, %s3434_s21 }
 0x117   : > { %p3438_p4 = pneg %p3437_p2  ;;  %p3444_p11 = por %p3443_p3, %p3442_p1 }
 0x119   : > { %p3445_p5 = pnand %p3444_p11, %p3438_p4 }
 0x11b   : > { %3448 = shalt.err (!%p3445_p5)
}
 0x11c   : > { %p4542_p10 = scmp.ne.s32.totalorder %s4512_s16, 0  ;;  %p4543_p8 = scmp.ne.s32.totalorder %s4529_s24, 0 }
 0x11d   : > { %p4544_p9 = scmp.ne.s32.totalorder (!%p4543_p8), %s4522_s28, 0 }
 0x11e   : > { %2923 = dma.hbm_to_vmem [thread:$0]  (!%p4542_p10), %s4043_s14, 64, %s448_s17, %s436_s20  }
 0x11f   : > { %456 = sbr.rel (%p4543_p8) target bundleno = 3035 (0xbdb), region = 52 }
 0x126   : > { %3522 = dma.done.wait (%p4544_p9), [#allocation5], 256  }
 0x127   : > { %3524 = vsyncadd (%p4544_p9), [#allocation5], 4294967040  ;;  %s4545_s22 = sld [smem:[#allocation25_spill]]  ;;  %s462_s1 = sand.u32 1, %s3856_s0  }
 0x128   : > { %s463_s12 = scalar_lea.sflag [#allocation8], %s462_s1  ;;  %p4546_p7 = scmp.ne.s32.totalorder %s4523_s18, 0 }
 0x12d   : > { %s464_s10 = sand.u32 1, %s4545_s22  }
 0x12e   : > { %s2878_s27 = smul.u32 192, %s464_s10 }
 0x130   : > { %s4071_s7 = scalar_lea.vmem [#allocation7], %s2878_s27 }
 0x131   : > { %3526 = dma.done.wait (%p4546_p7), %s463_s12, 4096  }
 0x132   : > { %3528 = vsyncadd (%p4546_p7), %s463_s12, 4294963200  ;;  %s2529_s16 = sshll.u32 %s464_s10, 6  ;;  %s2530_s24 = sshll.u32 %s464_s10, 8 }
 0x133   : > { %s4077_s14 = scalar_lea.vmem [#allocation9], %s2529_s16  ;;  %s481_s28 = scalar_lea.sflag [#allocation11], %s462_s1 }
 0x134   : > { %s4079_s17 = scalar_lea.vmem [#allocation10], %s2530_s24 }
 0x135   : > { %3530 = dma.done.wait (%p4546_p7), %s481_s28, 8192  }
 0x136   : > { %3532 = vsyncadd (%p4546_p7), %s481_s28, 4294959104  ;;  %s2532_s0 = sshll.u32 %s464_s10, 3  ;;  %s4085_s20 = scalar_lea.vmem [#allocation12], %s2530_s24 }
 0x137   : > { %s499_s6 = scalar_lea.sflag [#allocation14], %s462_s1  ;;  %s4087_s11 = scalar_lea.vmem [#allocation13], %s2532_s0 }
 0x138   : > { %3534 = dma.done.wait (%p4546_p7), %s499_s6, 176  }
 0x139   : > { %3536 = vsyncadd (%p4546_p7), %s499_s6, 4294967120  ;;  %s2879_s29 = smul.u32 3, %s464_s10  ;;  %s2533_s19 = sshll.u32 %s464_s10, 2 }
 0x13a   : > { %s517_s15 = scalar_lea.sflag [#allocation17], %s464_s10  ;;  %s4095_s21 = scalar_lea.vmem [#allocation16], %s2533_s19 }
 0x13b   : > { %s4093_s26 = scalar_lea.vmem [#allocation15], %s2879_s29 }
 0x13c   : > { %3538 = dma.done.wait (%p4546_p7), %s517_s15, 64  }
 0x13d   : > { %3540 = vsyncadd (%p4546_p7), %s517_s15, 4294967232  ;;  %s580_s5 = sand.u32 1, %s3563_s9   ;;  %s4547_s22 = sld [smem:[#allocation29_spill]] }
 0x13e   : > { %s2534_s30 = sshll.u32 %s580_s5, 4 }
 0x13f   : > { %s4104_s3 = scalar_lea.vmem [#allocation18], %s2534_s30 }
 0x143   : > { %p2535_p11 = scmp.ne.s32.totalorder %s4547_s22, 0 }
 0x144   : > { %v590_v0 = vld [vmem:[#allocation4] sm:$0xff] (!%p2535_p11)  ;;  %v591_v1 = vld [vmem:[#allocation4 + $0x8] sm:$0xff] (!%p2535_p11) }
 0x145   : > { %589 = sbr.rel (%p2535_p11) target bundleno = 332 (0x14c), region = 88  ;;  %592 = vst [vmem:[%s4104_s3] sm:$0xff] (!%p2535_p11), %v590_v0  ;;  %593 = vst [vmem:[%s4104_s3 + $0x8] sm:$0xff] (!%p2535_p11), %v591_v1 }
 0x14c PF: > { %v4110_v2 = vld [vmem:[%s4104_s3] sm:$0xff]  ;;  %v4113_v3 = vld [vmem:[%s4104_s3 + $0x8] sm:$0xff]  ;;  %v3605_v9 = vmov 0.0   ;;  %v3606_v28 = vmov 0   ;;  %vm3607_vm0 = vmmov 0   ;;  %v625_v46 = vlaneseq  ;;  %s3608_s18 = smov 64  }
 0x14d   : > { %597 = vadd.xlane.f32.xlu0 %v4110_v2  ;;  %v603_v4 = vmul.f32 %v4110_v2, %v4110_v2  ;;  %v604_v5 = vmul.f32 %v4113_v3, %v4113_v3  ;;  %v3033_v6 = vld [vmem:[%s4071_s7 + $0x4] ss:$12 sps:$4 sm:$0xff]   ;;  %v3035_v7 = vld [vmem:[%s4071_s7] ss:$12 sps:$4 sm:$0xff]   ;;  %v3036_v8 = vld [vmem:[%s4071_s7 + $0x8] ss:$12 sps:$4 sm:$0xff]   ;;  %2786 = vmatprep.subr.bf16.mxu1 %v3605_v9 }
 0x14e   : > { %815 = vmatprep.subr.bf16.mxu0 %v3033_v6  ;;  %2787 = vmatpush3.bf16.msra.mxu1 %v3036_v8  ;;  %v3037_v10 = vld [vmem:[%s4071_s7 + $0x1c] ss:$12 sps:$4 sm:$0xff]   ;;  %v3039_v11 = vld [vmem:[%s4071_s7 + $0x18] ss:$12 sps:$4 sm:$0xff]   ;;  %v3040_v12 = vld [vmem:[%s4071_s7 + $0x20] ss:$12 sps:$4 sm:$0xff]  }
 0x14f   : > { %605 = vadd.xlane.f32.xlu1 %v603_v4  ;;  %816 = vmatpush1.bf16.msra.mxu0 %v3035_v7  ;;  %v3041_v13 = vld [vmem:[%s4071_s7 + $0x34] ss:$12 sps:$4 sm:$0xff]   ;;  %v3043_v14 = vld [vmem:[%s4071_s7 + $0x30] ss:$12 sps:$4 sm:$0xff]   ;;  %v3044_v15 = vld [vmem:[%s4071_s7 + $0x38] ss:$12 sps:$4 sm:$0xff]  }
 0x150   : > { %2788 = vmatprep.subr.bf16.mxu1 %v3605_v9  ;;  %817 = vmatprep.subr.bf16.mxu0 %v3037_v10  ;;  %v3045_v16 = vld [vmem:[%s4071_s7 + $0x4c] ss:$12 sps:$4 sm:$0xff]   ;;  %v3047_v17 = vld [vmem:[%s4071_s7 + $0x48] ss:$12 sps:$4 sm:$0xff]   ;;  %v3048_v18 = vld [vmem:[%s4071_s7 + $0x50] ss:$12 sps:$4 sm:$0xff]  }
 0x151   : > { %599 = vadd.xlane.f32.xlu0 %v4113_v3  ;;  %v3049_v19 = vld [vmem:[%s4071_s7 + $0x64] ss:$12 sps:$4 sm:$0xff]   ;;  %v3051_v20 = vld [vmem:[%s4071_s7 + $0x60] ss:$12 sps:$4 sm:$0xff]   ;;  %v3052_v21 = vld [vmem:[%s4071_s7 + $0x68] ss:$12 sps:$4 sm:$0xff]   ;;  %847 = vmatprep.mubr.bf16.mxu0 %v3606_v28 }
 0x152   : > { %2789 = vmatpush3.bf16.msra.mxu1 %v3040_v12  ;;  %v3053_v22 = vld [vmem:[%s4071_s7 + $0x7c] ss:$12 sps:$4 sm:$0xff]   ;;  %v3055_v23 = vld [vmem:[%s4071_s7 + $0x78] ss:$12 sps:$4 sm:$0xff]   ;;  %v3056_v24 = vld [vmem:[%s4071_s7 + $0x80] ss:$12 sps:$4 sm:$0xff]   ;;  %2802 = vmatprep.mubr.msk.bf16.mxu1 %vm3607_vm0, %v3605_v9 }
 0x153   : > { %607 = vadd.xlane.f32.xlu1 %v604_v5  ;;  %818 = vmatpush1.bf16.msra.mxu0 %v3039_v11  ;;  %v3057_v25 = vld [vmem:[%s4071_s7 + $0x94] ss:$12 sps:$4 sm:$0xff]   ;;  %v3059_v26 = vld [vmem:[%s4071_s7 + $0x90] ss:$12 sps:$4 sm:$0xff]   ;;  %v3060_v27 = vld [vmem:[%s4071_s7 + $0x98] ss:$12 sps:$4 sm:$0xff]  }
 0x154   : > { %2790 = vmatprep.subr.bf16.mxu1 %v3605_v9  ;;  %819 = vmatprep.subr.bf16.mxu0 %v3041_v13  ;;  %v3061_v29 = vld [vmem:[%s4071_s7 + $0xac] ss:$12 sps:$4 sm:$0xff]   ;;  %v3063_v30 = vld [vmem:[%s4071_s7 + $0xa8] ss:$12 sps:$4 sm:$0xff]   ;;  %v3064_v31 = vld [vmem:[%s4071_s7 + $0xb0] ss:$12 sps:$4 sm:$0xff]  }
 0x155   : > { %v4158_v49 = vshrl.u32 %v625_v46, 7  ;;  %v4164_v51 = vld [vmem:[%s4087_s11] sm:$0xff]  ;;  %v670_v4 = vld [vmem:[%s4093_s26] sm:$0x7]  ;;  %vm914_vm1 = vcmask 523264   ;;  %vm977_vm2 = vcmask 1043456  }
 0x156   : > { %2791 = vmatpush3.bf16.msra.mxu1 %v3044_v15  ;;  %vm961_vm3 = vcmask 64512   ;;  %vm1145_vm4 = vcmask 1048064   ;;  %s4548_s1 = sld [smem:[#allocation30_spill]]  ;;  %s4549_s10 = sld [smem:[#allocation36_spill]] }
 0x157   : > { %820 = vmatpush1.bf16.msra.mxu0 %v3043_v14  ;;  %2792 = vmatprep.subr.bf16.mxu1 %v3605_v9  ;;  %v4161_v50 = vsub.s32 0, %v4158_v49  ;;  %v4170_v56 = vsub.s32 1, %v4158_v49  ;;  %v682_v5 = vsub.s32 2, %v4158_v49  ;;  %s2278_s27 = sshll.u32 %s4104_s3, 4  ;;  %s4551_s24 = sld [smem:[#allocation46_spill]]  ;;  %s4384_s27 = int_to_ptr.vmem [resolvable:$true] %s2278_s27 }
 0x158   : > { %821 = vmatprep.subr.bf16.mxu0 %v3045_v16  ;;  %s4390_s28 = scalar_lea.sflag [#allocation6], %s580_s5  ;;  %s3609_s0 = smov [#allocation18]  }
 0x159   : > { %v628_v55 = vrot.slane %v4164_v51, %v4161_v50  ;;  %v634_v61 = vrot.slane %v4164_v51, %v4170_v56  ;;  %v679_v6 = vrot.slane %v670_v4, %v4170_v56  ;;  %v683_v10 = vrot.slane %v670_v4, %v682_v5 }
 0x15a   : > { %2793 = vmatpush3.bf16.msra.mxu1 %v3048_v18 }
 0x15b   : > { %822 = vmatpush1.bf16.msra.mxu0 %v3047_v17  ;;  %2794 = vmatprep.subr.bf16.mxu1 %v3605_v9 }
 0x15c   : > { %823 = vmatprep.subr.bf16.mxu0 %v3049_v19  ;;  %v675_v19 = vrot.slane %v670_v4, %v4161_v50  ;;  %s4550_s12 = sshll.u32 %s4548_s1, 8  ;;  %p4552_p13 = scmp.ne.s32.totalorder %s4549_s10, 0 }
 0x15e   : > { %2795 = vmatpush3.bf16.msra.mxu1 %v3052_v21 }
 0x15f   : > { %824 = vmatpush1.bf16.msra.mxu0 %v3051_v20  ;;  %2796 = vmatprep.subr.bf16.mxu1 %v3605_v9 }
 0x160   : > { %825 = vmatprep.subr.bf16.mxu0 %v3053_v22 }
 0x162   : > { %2797 = vmatpush3.bf16.msra.mxu1 %v3056_v24 }
 0x163   : > { %826 = vmatpush1.bf16.msra.mxu0 %v3055_v23  ;;  %2798 = vmatprep.subr.bf16.mxu1 %v3605_v9 }
 0x164   : > { %827 = vmatprep.subr.bf16.mxu0 %v3057_v25 }
 0x166   : > { %2799 = vmatpush3.bf16.msra.mxu1 %v3060_v27 }
 0x167   : > { %828 = vmatpush1.bf16.msra.mxu0 %v3059_v26  ;;  %2800 = vmatprep.subr.bf16.mxu1 %v3605_v9 }
 0x168   : > { %829 = vmatprep.subr.bf16.mxu0 %v3061_v29 }
 0x16a   : > { %2801 = vmatpush3.bf16.msra.mxu1 %v3064_v31 }
 0x16b   : > { %830 = vmatpush1.bf16.msra.mxu0 %v3063_v30  ;;  %2806 = vmatprep.subr.bf16.mxu1 %v3605_v9 }
 0x16c   : > { %2830 = vmatprep.subr.bf16.mxu0 %v3605_v9 }
 0x1da   : > { %v598_v32 = vpop.xlane.xlu0 %597 }
 0x1db   : > { %v601_v33 = vmul.f32 0.0078125, %v598_v32 }
 0x1dc   : > { %v606_v34 = vpop.xlane.xlu1 %605 }
 0x1dd   : > { %v611_v35 = vmul.f32 %v601_v33, %v601_v33  ;;  %v609_v36 = vmul.f32 0.0078125, %v606_v34  ;;  %v617_v52 = vsub.f32 %v4110_v2, %v601_v33 }
 0x1de   : > { %v600_v37 = vpop.xlane.xlu0 %599 }
 0x1df   : > { %v613_v38 = vsub.f32 %v609_v36, %v611_v35  ;;  %v602_v39 = vmul.f32 0.0078125, %v600_v37 }
 0x1e0   : > { %v608_v40 = vpop.xlane.xlu1 %607 }
 0x1e1   : > { %v615_v41 = vmax.f32 %v613_v38, 0.0  ;;  %v612_v42 = vmul.f32 %v602_v39, %v602_v39  ;;  %v610_v43 = vmul.f32 0.0078125, %v608_v40  ;;  %v618_v57 = vsub.f32 %v4113_v3, %v602_v39 }
 0x1e3   : > { %v619_v44 = vadd.f32 1e-05, %v615_v41  ;;  %v614_v45 = vsub.f32 %v610_v43, %v612_v42 }
 0x1e5   : > { %3153 = vrsqrt.f32 %v619_v44  ;;  %v616_v47 = vmax.f32 %v614_v45, 0.0 }
 0x1e7   : > { %v620_v48 = vadd.f32 1e-05, %v616_v47 }
 0x1e9   : > { %3155 = vrsqrt.f32 %v620_v48 }
 0x1ef   : > { %v3154_v53 = vpop.eup %3153 }
 0x1f0   : > { %v623_v54 = vmul.f32 %v3154_v53, %v617_v52 }
 0x1f2   : > { %v629_v60 = vmul.f32 %v628_v55, %v623_v54 }
 0x1f3   : > { %v3156_v58 = vpop.eup %3155 }
 0x1f4   : > { %v624_v59 = vmul.f32 %v3156_v58, %v618_v57  ;;  %v635_v63 = vadd.f32 %v634_v61, %v629_v60 }
 0x1f6   : > { %v630_v62 = vmul.f32 %v628_v55, %v624_v59 }
 0x1f8   : > { %v636_v0 = vadd.f32 %v634_v61, %v630_v62 }
 0x1fa   : > { %v637_v1 = vpack.c.bf16 %v636_v0, %v635_v63 }
 0x1fc   : > { %848 = vmatmul.mubr.bf16.vlgmr.msra.gmra.mrb[0].mxu0 %v637_v1  ;;  %2803 = vmatmul.mubr.bf16.vlgmr.msra.gmra.mrb[0].mxu1 %v637_v1 }
 0x1fd   : > { %2808 = vmatprep.mubr.msk.bf16.mxu1 %vm3607_vm0, %v3605_v9  ;;  %2832 = vmatprep.mubr.msk.bf16.mxu0 %vm3607_vm0, %v3605_v9 }
 0x2cf   : > { %v849_v7 = vpop.f32.mrb[0].mxu0  ;;  %v892_v8 = vpop.f32.mrb[0].mxu1 }
 0x2d0   : > { %v851_v11 = vpop.f32.mrb[1].mxu0  ;;  %v2804_v12 = vpop.f32.mrb[1].mxu1  ;;  %v893_v22 = vadd.f32 %v892_v8, %v683_v10  ;;  %v850_v25 = vadd.f32 %v849_v7, %v675_v19 }
 0x2d1   : > { %v852_v13 = vadd.f32 %v851_v11, %v679_v6  ;;  %v853_v14 = vpop.f32.mrb[2].mxu0  ;;  %v895_v15 = vpop.f32.mrb[2].mxu1 }
 0x2d2   : > { %v4184_v16 = vadd.f32 %v895_v15, %v683_v10  ;;  %v855_v17 = vpop.f32.mrb[3].mxu0  ;;  %v2805_v18 = vpop.f32.mrb[3].mxu1  ;;  %v4190_v27 = vpack.c.bf16 %v893_v22, %v893_v22  ;;  %v854_v29 = vadd.f32 %v853_v14, %v675_v19  ;;  %v909_v30 = vpack.c.bf16 %v850_v25, %v850_v25 }
 0x2d3   : > { %v911_v20 = vpack.c.bf16 %v852_v13, %v852_v13  ;;  %v856_v21 = vadd.f32 %v855_v17, %v679_v6 }
 0x2d4   : > { %v979_v31 = vsel %vm977_vm2, %v4190_v27, 0  ;;  %v1151_v32 = vpack.c.bf16 %v854_v29, %v854_v29 }
 0x2d5   : > { %v919_v23 = vsel %vm914_vm1, %v911_v20, 0  ;;  %v1153_v24 = vpack.c.bf16 %v856_v21, %v856_v21 }
 0x2d6   : > { %2807 = vmatpush3.bf16.xpose.msra.mxu1 %v919_v23 }
 0x2d7   : > { %v1160_v26 = vsel %vm914_vm1, %v1153_v24, 0  ;;  %2812 = vmatprep.subr.bf16.mxu1 %v3605_v9 }
 0x2d8   : > { %2831 = vmatpush3.bf16.xpose.msra.mxu0 %v1160_v26 }
 0x2d9   : > { %2842 = vmatprep.subr.bf16.mxu0 %v3605_v9 }
 0x2dd   : > { %2809 = vmatmul.mubr.msk.bf16.vlgmr.msra.gmra.mrb[4].mxu1 %vm914_vm1, %v909_v30 }
 0x2de   : > { %2813 = vmatpush3.bf16.msra.mxu1 %v979_v31  ;;  %2814 = vmatprep.mubr.msk.bf16.mxu1 %vm3607_vm0, %v3605_v9 }
 0x2df   : > { %2833 = vmatmul.mubr.msk.bf16.vlgmr.msra.gmra.mrb[4].mxu0 %vm914_vm1, %v1151_v32  ;;  %2818 = vmatprep.subr.bf16.mxu1 %v3605_v9 }
 0x2e0   : > { %2844 = vmatprep.mubr.msk.bf16.mxu0 %vm3607_vm0, %v3605_v9 }
 0x3b0   : > { %v955_v33 = vpop.f32.mrb[4].mxu1 }
 0x3b1   : > { %v2810_v34 = vpop.f32.mrb[5].mxu1  ;;  %v962_v35 = vsel %vm961_vm3, %v955_v33, -inf }
 0x3b2   : > { %v1196_v36 = vpop.f32.mrb[4].mxu0  ;;  %963 = vmax.xlane.f32.xlu0 %v962_v35  ;;  %v958_v37 = vpop.f32.mrb[6].mxu1  ;;  %v1155_v34 = vpack.c.bf16 %v4184_v16, %v4184_v16 }
 0x3b3   : > { %v2811_v38 = vpop.f32.mrb[7].mxu1  ;;  %v2834_v39 = vpop.f32.mrb[5].mxu0  ;;  %v1202_v47 = vsel %vm961_vm3, %v1196_v36, -inf }
 0x3b4   : > { %v1199_v40 = vpop.f32.mrb[6].mxu0 }
 0x3b5   : > { %v2835_v41 = vpop.f32.mrb[7].mxu0 }
 0x3c8   : > { %1032 = vrot.lane.b32.xlu0 %v911_v20, %s3608_s18 }
 0x43f   : > { %v964_v42 = vpop.xlane.xlu0 %963 }
 0x440   : > { %v965_v43 = vsub.f32 %v955_v33, %v964_v42 }
 0x442   : > { %v966_v44 = vmul.f32 1.442695, %v965_v43  ;;  %v1218_v43 = vsel %vm977_vm2, %v1155_v34, 0 }
 0x443   : > { %v1033_v58 = vpop.permute.xlu0 %1032 }
 0x444   : > { %3157 = vpow2.f32 %v966_v44  ;;  %v1038_v60 = vsel %vm914_vm1, %v1033_v58, 0  ;;  %v3069_v58 = vld [vmem:[%s4077_s14 + $0x20] sm:$0xff]  }
 0x44e   : > { %v3158_v45 = vpop.eup %3157 }
 0x44f   : > { %v968_v46 = vsel %vm961_vm3, %v3158_v45, 0.0 }
 0x450   : > { %969 = vadd.xlane.f32.xlu1 %v968_v46 }
 0x461   : > { %1029 = vrot.lane.b32.xlu1 %v909_v30, %s3608_s18 }
 0x465   : > { %1272 = vrot.lane.b32.xlu1 %v1153_v24, %s3608_s18 }
 0x469   : > { %1269 = vrot.lane.b32.xlu1 %v1151_v32, %s3608_s18 }
 0x48d   : > { %1203 = vmax.xlane.f32.xlu1 %v1202_v47 }
 0x4dd   : > { %v970_v48 = vpop.xlane.xlu1 %969 }
 0x4de   : > { %3159 = vrcp.f32 %v970_v48 }
 0x4e1   : > { %v1030_v52 = vpop.permute.xlu1 %1029 }
 0x4e5   : > { %v1273_v53 = vpop.permute.xlu1 %1272 }
 0x4e6   : > { %v1278_v54 = vsel %vm914_vm1, %v1273_v53, 0  ;;  %v3065_v53 = vld [vmem:[%s4077_s14] sm:$0xff]  }
 0x4e7   : > { %2843 = vmatpush3.bf16.xpose.msra.mxu0 %v1278_v54  ;;  %v3066_v54 = vld [vmem:[%s4077_s14 + $0x8] sm:$0xff]  }
 0x4e8   : > { %v3160_v55 = vpop.eup %3159  ;;  %2854 = vmatprep.subr.bf16.mxu0 %v3605_v9 }
 0x4e9   : > { %v972_v57 = vmul.f32 %v3160_v55, %v3158_v45  ;;  %v1270_v61 = vpop.permute.xlu1 %1269  ;;  %v3067_v55 = vld [vmem:[%s4077_s14 + $0x10] sm:$0xff]  }
 0x4eb   : > { %v973_v59 = vpack.c.bf16 %v972_v57, %v972_v57  ;;  %v3068_v57 = vld [vmem:[%s4077_s14 + $0x18] sm:$0xff]  }
 0x4ed   : > { %2815 = vmatmul.mubr.msk.bf16.vlgmr.msra.gmra.mrb[8].mxu1 %vm961_vm3, %v973_v59  ;;  %v3070_v59 = vld [vmem:[%s4077_s14 + $0x28] sm:$0xff]  }
 0x4ee   : > { %2819 = vmatpush3.bf16.xpose.msra.mxu1 %v1038_v60  ;;  %2845 = vmatmul.mubr.msk.bf16.vlgmr.msra.gmra.mrb[8].mxu0 %vm914_vm1, %v1270_v61 }
 0x4ef   : > { %2820 = vmatprep.mubr.msk.bf16.mxu1 %vm3607_vm0, %v3605_v9  ;;  %2824 = vmatprep.subr.bf16.mxu1 %v3605_v9 }
 0x4f0   : > { %2870 = vmatprep.mubr.msk.bf16.mxu0 %vm3607_vm0, %v3605_v9  ;;  %2855 = vmatpush3.bf16.msra.mxu0 %v3065_v53  ;;  %v3111_v53 = vld [vmem:[%s4079_s17 + $0xc4] ss:$16 sps:$4 sm:$0xff]  }
 0x4f1   : > { %2856 = vmatprep.subr.bf16.mxu0 %v3605_v9 }
 0x4f4   : > { %2857 = vmatpush3.bf16.msra.mxu0 %v3066_v54  ;;  %v3114_v54 = vld [vmem:[%s4079_s17 + $0xcc] ss:$16 sps:$4 sm:$0xff]  }
 0x4f5   : > { %2821 = vmatmul.mubr.msk.bf16.vlgmr.msra.gmra.mrb[12].mxu1 %vm914_vm1, %v1030_v52  ;;  %2858 = vmatprep.subr.bf16.mxu0 %v3605_v9 }
 0x4f6   : > { %2826 = vmatprep.mubr.msk.bf16.mxu1 %vm3607_vm0, %v3605_v9 }
 0x4f8   : > { %2859 = vmatpush3.bf16.msra.mxu0 %v3067_v55  ;;  %v3109_v55 = vld [vmem:[%s4079_s17 + $0xc0] ss:$16 sps:$4 sm:$0xff]  }
 0x4f9   : > { %2860 = vmatprep.subr.bf16.mxu0 %v3605_v9 }
 0x4fc   : > { %2861 = vmatpush3.bf16.msra.mxu0 %v3068_v57  ;;  %v3112_v57 = vld [vmem:[%s4079_s17 + $0xc8] ss:$16 sps:$4 sm:$0xff]  }
 0x4fd   : > { %2862 = vmatprep.subr.bf16.mxu0 %v3605_v9 }
 0x500   : > { %2863 = vmatpush3.bf16.msra.mxu0 %v3069_v58  ;;  %v3117_v58 = vld [vmem:[%s4079_s17 + $0xe4] ss:$16 sps:$4 sm:$0xff]  }
 0x501   : > { %2864 = vmatprep.subr.bf16.mxu0 %v3605_v9 }
 0x504   : > { %2865 = vmatpush3.bf16.msra.mxu0 %v3070_v59  ;;  %v3120_v59 = vld [vmem:[%s4079_s17 + $0xec] ss:$16 sps:$4 sm:$0xff]  }
 0x505   : > { %2866 = vmatprep.subr.bf16.mxu0 %v3605_v9 }
 0x51a   : > { %v1204_v62 = vpop.xlane.xlu1 %1203 }
 0x51b   : > { %v1205_v63 = vsub.f32 %v1196_v36, %v1204_v62 }
 0x51d   : > { %v1206_v0 = vmul.f32 1.442695, %v1205_v63 }
 0x51f   : > { %3161 = vpow2.f32 %v1206_v0  ;;  %v3071_v0 = vld [vmem:[%s4077_s14 + $0x30] sm:$0xff]  }
 0x520   : > { %2867 = vmatpush3.bf16.msra.mxu0 %v3071_v0 }
 0x521   : > { %2868 = vmatprep.subr.bf16.mxu0 %v3605_v9 }
 0x529   : > { %v3162_v20 = vpop.eup %3161 }
 0x52a   : > { %v1208_v21 = vsel %vm961_vm3, %v3162_v20, 0.0 }
 0x5c0   : > { %v1015_v1 = vpop.f32.mrb[8].mxu1 }
 0x5c1   : > { %1021 = vst.msk [vmem:[#allocation3] sm:$0xff] %vm914_vm1, %v1015_v1  ;;  %v2816_v4 = vpop.f32.mrb[9].mxu1  ;;  %v1314_v6 = vpop.f32.mrb[8].mxu0  ;;  %v3072_v1 = vld [vmem:[%s4077_s14 + $0x38] sm:$0xff]   ;;  %s4382_s14 = scalar_lea.hbm %s4551_s24, %s4550_s12 }
 0x5c2   : > { %v1018_v7 = vpop.f32.mrb[10].mxu1  ;;  %v2846_v8 = vpop.f32.mrb[9].mxu0  ;;  %v1320_v19 = vsel %vm961_vm3, %v1314_v6, -inf  ;;  %2869 = vmatpush3.bf16.msra.mxu0 %v3072_v1 }
 0x5c3   : > { %v2817_v10 = vpop.f32.mrb[11].mxu1  ;;  %v1317_v11 = vpop.f32.mrb[10].mxu0 }
 0x5c4   : > { %v2847_v12 = vpop.f32.mrb[11].mxu0 }
 0x5c8   : > { %v1074_v13 = vpop.f32.mrb[12].mxu1 }
 0x5c9   : > { %v2822_v14 = vpop.f32.mrb[13].mxu1  ;;  %v1080_v15 = vsel %vm961_vm3, %v1074_v13, -inf }
 0x5ca   : > { %1081 = vmax.xlane.f32.xlu0 %v1080_v15  ;;  %v1077_v17 = vpop.f32.mrb[14].mxu1 }
 0x5cb   : > { %v2823_v18 = vpop.f32.mrb[15].mxu1 }
 0x5ce   : > { %1321 = vmax.xlane.f32.xlu0 %v1320_v19  ;;  %v1499_v19 = vrot.slane %v4164_v51, %v682_v5 }
 0x5d2   : > { %1209 = vadd.xlane.f32.xlu0 %v1208_v21 }
 0x657   : > { %v1082_v22 = vpop.xlane.xlu0 %1081 }
 0x658   : > { %v1083_v23 = vsub.f32 %v1074_v13, %v1082_v22 }
 0x65a   : > { %v1084_v24 = vmul.f32 1.442695, %v1083_v23 }
 0x65b   : > { %v1322_v25 = vpop.xlane.xlu0 %1321 }
 0x65c   : > { %3163 = vpow2.f32 %v1084_v24  ;;  %v1323_v26 = vsub.f32 %v1314_v6, %v1322_v25 }
 0x65e   : > { %v1324_v29 = vmul.f32 1.442695, %v1323_v26 }
 0x65f   : > { %v1210_v35 = vpop.xlane.xlu0 %1209 }
 0x660   : > { %3165 = vpow2.f32 %v1324_v29  ;;  %v3078_v29 = vld [vmem:[%s4079_s17 + $0xc] ss:$16 sps:$4 sm:$0xff]  }
 0x661   : > { %1870 = vmatprep.subr.bf16.mxu0 %v3078_v29 }
 0x666   : > { %v3164_v30 = vpop.eup %3163 }
 0x667   : > { %v1086_v31 = vsel %vm961_vm3, %v3164_v30, 0.0 }
 0x668   : > { %1087 = vadd.xlane.f32.xlu0 %v1086_v31  ;;  %v3076_v31 = vld [vmem:[%s4079_s17 + $0x8] ss:$16 sps:$4 sm:$0xff]  }
 0x66a   : > { %v3166_v32 = vpop.eup %3165 }
 0x66b   : > { %v1326_v33 = vsel %vm961_vm3, %v3166_v32, 0.0 }
 0x66c   : > { %1327 = vadd.xlane.f32.xlu1 %v1326_v33  ;;  %v3084_v33 = vld [vmem:[%s4079_s17 + $0x2c] ss:$16 sps:$4 sm:$0xff]  }
 0x67d   : > { %1333 = vrot.lane.b32.xlu1 %v1155_v34, %s3608_s18  ;;  %v3079_v34 = vld [vmem:[%s4079_s17 + $0x20] ss:$16 sps:$4 sm:$0xff]  }
 0x67e   : > { %1093 = vrot.lane.b32.xlu0 %v4190_v27, %s3608_s18 }
 0x6f5   : > { %v1088_v36 = vpop.xlane.xlu0 %1087 }
 0x6f6   : > { %3167 = vrcp.f32 %v1088_v36  ;;  %v3087_v36 = vld [vmem:[%s4079_s17 + $0x44] ss:$16 sps:$4 sm:$0xff]  }
 0x6f7   : > { %3169 = vrcp.f32 %v1210_v35  ;;  %v3082_v35 = vld [vmem:[%s4079_s17 + $0x28] ss:$16 sps:$4 sm:$0xff]  }
 0x6f9   : > { %v1094_v37 = vpop.permute.xlu0 %1093  ;;  %v1328_v39 = vpop.xlane.xlu1 %1327 }
 0x6fa   : > { %v1099_v38 = vsel %vm977_vm2, %v1094_v37, 0  ;;  %3171 = vrcp.f32 %v1328_v39  ;;  %v3090_v37 = vld [vmem:[%s4079_s17 + $0x4c] ss:$16 sps:$4 sm:$0xff]   ;;  %v3088_v39 = vld [vmem:[%s4079_s17 + $0x48] ss:$16 sps:$4 sm:$0xff]  }
 0x6fb   : > { %2825 = vmatpush3.bf16.msra.mxu1 %v1099_v38  ;;  %v3085_v38 = vld [vmem:[%s4079_s17 + $0x40] ss:$16 sps:$4 sm:$0xff]  }
 0x6fc   : > { %2836 = vmatprep.subr.bf16.mxu1 %v3605_v9 }
 0x6fd   : > { %v1334_v44 = vpop.permute.xlu1 %1333 }
 0x6fe   : > { %v1339_v47 = vsel %vm977_vm2, %v1334_v44, 0  ;;  %v3100_v44 = vld [vmem:[%s4079_s17 + $0x88] ss:$16 sps:$4 sm:$0xff]  }
 0x700   : > { %v3168_v40 = vpop.eup %3167 }
 0x701   : > { %v1090_v41 = vmul.f32 %v3168_v40, %v3164_v30  ;;  %v3170_v42 = vpop.eup %3169  ;;  %v3073_v30 = vld [vmem:[%s4079_s17] ss:$16 sps:$4 sm:$0xff]   ;;  %v3093_v40 = vld [vmem:[%s4079_s17 + $0x64] ss:$16 sps:$4 sm:$0xff]  }
 0x702   : > { %v1212_v27 = vmul.f32 %v3170_v42, %v3162_v20  ;;  %v3094_v42 = vld [vmem:[%s4079_s17 + $0x68] ss:$16 sps:$4 sm:$0xff]  }
 0x703   : > { %v1091_v16 = vpack.c.bf16 %v1090_v41, %v1090_v41  ;;  %v3096_v41 = vld [vmem:[%s4079_s17 + $0x6c] ss:$16 sps:$4 sm:$0xff]  }
 0x704   : > { %v1213_v45 = vpack.c.bf16 %v1212_v27, %v1212_v27  ;;  %v3172_v46 = vpop.eup %3171  ;;  %v3097_v27 = vld [vmem:[%s4079_s17 + $0x80] ss:$16 sps:$4 sm:$0xff]  }
 0x705   : > { %2827 = vmatmul.mubr.msk.bf16.vlgmr.msra.gmra.mrb[16].mxu1 %vm961_vm3, %v1091_v16  ;;  %v1330_v48 = vmul.f32 %v3172_v46, %v3166_v32  ;;  %v3081_v32 = vld [vmem:[%s4079_s17 + $0x24] ss:$16 sps:$4 sm:$0xff]   ;;  %v3091_v16 = vld [vmem:[%s4079_s17 + $0x60] ss:$16 sps:$4 sm:$0xff]  }
 0x706   : > { %2837 = vmatpush3.bf16.msra.mxu1 %v1218_v43  ;;  %2838 = vmatprep.mubr.msk.bf16.mxu1 %vm3607_vm0, %v3605_v9  ;;  %v3099_v43 = vld [vmem:[%s4079_s17 + $0x84] ss:$16 sps:$4 sm:$0xff]  }
 0x707   : > { %2848 = vmatprep.subr.bf16.mxu1 %v3605_v9  ;;  %v1331_v52 = vpack.c.bf16 %v1330_v48, %v1330_v48  ;;  %v3105_v46 = vld [vmem:[%s4079_s17 + $0xa4] ss:$16 sps:$4 sm:$0xff]   ;;  %v3103_v48 = vld [vmem:[%s4079_s17 + $0xa0] ss:$16 sps:$4 sm:$0xff]  }
 0x70d   : > { %2839 = vmatmul.mubr.msk.bf16.vlgmr.msra.gmra.mrb[20].mxu1 %vm961_vm3, %v1213_v45  ;;  %v3102_v45 = vld [vmem:[%s4079_s17 + $0x8c] ss:$16 sps:$4 sm:$0xff]  }
 0x70e   : > { %2849 = vmatpush3.bf16.msra.mxu1 %v1339_v47  ;;  %2850 = vmatprep.mubr.msk.bf16.mxu1 %vm3607_vm0, %v3605_v9  ;;  %v3108_v47 = vld [vmem:[%s4079_s17 + $0xac] ss:$16 sps:$4 sm:$0xff]  }
 0x715   : > { %2851 = vmatmul.mubr.msk.bf16.vlgmr.msra.gmra.mrb[24].mxu1 %vm961_vm3, %v1331_v52  ;;  %v3106_v52 = vld [vmem:[%s4079_s17 + $0xa8] ss:$16 sps:$4 sm:$0xff]  }
 0x716   : > { %1683 = vmatprep.mubr.bf16.mxu1 %v3606_v28 }
 0x7d8   : > { %v1135_v60 = vpop.f32.mrb[16].mxu1 }
 0x7d9   : > { %1142 = vrot.lane.b32.xlu1 %v1135_v60, %s3608_s18  ;;  %v2828_v61 = vpop.f32.mrb[17].mxu1  ;;  %v3115_v60 = vld [vmem:[%s4079_s17 + $0xe0] ss:$16 sps:$4 sm:$0xff]  }
 0x7da   : > { %v1138_v62 = vpop.f32.mrb[18].mxu1  ;;  %v3118_v61 = vld [vmem:[%s4079_s17 + $0xe8] ss:$16 sps:$4 sm:$0xff]  }
 0x7db   : > { %v2829_v63 = vpop.f32.mrb[19].mxu1 }
 0x7e0   : > { %v1254_v4 = vpop.f32.mrb[20].mxu1 }
 0x7e1   : > { %1261 = vst.msk [vmem:[#allocation3 + $0x8] sm:$0xff] %vm914_vm1, %v1254_v4  ;;  %v2840_v6 = vpop.f32.mrb[21].mxu1 }
 0x7e2   : > { %v1257_v7 = vpop.f32.mrb[22].mxu1 }
 0x7e3   : > { %v2841_v8 = vpop.f32.mrb[23].mxu1 }
 0x7e8   : > { %v1375_v10 = vpop.f32.mrb[24].mxu1 }
 0x7e9   : > { %1382 = vrot.lane.b32.xlu1 %v1375_v10, %s3608_s18  ;;  %v2852_v11 = vpop.f32.mrb[25].mxu1 }
 0x7ea   : > { %v1378_v12 = vpop.f32.mrb[26].mxu1 }
 0x7eb   : > { %v2853_v13 = vpop.f32.mrb[27].mxu1 }
 0x84b   : > { %v1143_v14 = vpop.permute.xlu1 %1142 }
 0x84c   : > { %1146 = vst.msk [vmem:[#allocation3] sm:$0xff] %vm1145_vm4, %v1143_v14 }
 0x853   : > { %v1386_v17 = vld [vmem:[#allocation3] sm:$0xff] }
 0x85b   : > { %v1383_v15 = vpop.permute.xlu1 %1382 }
 0x85c   : > { %1385 = vst.msk [vmem:[#allocation3 + $0x8] sm:$0xff] %vm1145_vm4, %v1383_v15 }
 0x863   : > { %v1387_v9 = vld [vmem:[#allocation3 + $0x8] sm:$0xff] }
 0x864   : > { %v1388_v18 = vpack.c.bf16 %v1387_v9, %v1386_v17 }
 0x866   : > { %2871 = vmatmul.mubr.bf16.vlgmr.msra.gmra.mrb[12].mxu0 %v1388_v18  ;;  %v1532_v18 = vsub.s32 3, %v4158_v49 }
 0x867   : > { %1902 = vmatprep.mubr.bf16.mxu0 %v3606_v28  ;;  %1871 = vmatpush1.bf16.msra.mxu0 %v3076_v31 }
 0x868   : > { %1872 = vmatprep.subr.bf16.mxu0 %v3084_v33  ;;  %v3121_v33 = vld [vmem:[%s4085_s20 + $0xc0] sm:$0xff]  }
 0x86b   : > { %1873 = vmatpush1.bf16.msra.mxu0 %v3082_v35  ;;  %v3123_v35 = vld [vmem:[%s4085_s20 + $0x80] sm:$0xff]  }
 0x86c   : > { %1874 = vmatprep.subr.bf16.mxu0 %v3090_v37  ;;  %v3125_v37 = vld [vmem:[%s4085_s20 + $0xc8] sm:$0xff]  }
 0x86f   : > { %1875 = vmatpush1.bf16.msra.mxu0 %v3088_v39  ;;  %v3127_v39 = vld [vmem:[%s4085_s20 + $0x88] sm:$0xff]  }
 0x870   : > { %1876 = vmatprep.subr.bf16.mxu0 %v3096_v41  ;;  %v3129_v41 = vld [vmem:[%s4085_s20 + $0xd0] sm:$0xff]  }
 0x873   : > { %1877 = vmatpush1.bf16.msra.mxu0 %v3094_v42  ;;  %v3131_v42 = vld [vmem:[%s4085_s20 + $0x90] sm:$0xff]  }
 0x874   : > { %1878 = vmatprep.subr.bf16.mxu0 %v3102_v45  ;;  %v3135_v45 = vld [vmem:[%s4085_s20 + $0x98] sm:$0xff]  }
 0x877   : > { %1879 = vmatpush1.bf16.msra.mxu0 %v3100_v44  ;;  %v3134_v44 = vld [vmem:[%s4085_s20 + $0x58] sm:$0xff]  }
 0x878   : > { %1880 = vmatprep.subr.bf16.mxu0 %v3108_v47  ;;  %v3137_v47 = vld [vmem:[%s4085_s20 + $0xe0] sm:$0xff]  }
 0x87b   : > { %1881 = vmatpush1.bf16.msra.mxu0 %v3106_v52  ;;  %v3139_v52 = vld [vmem:[%s4085_s20 + $0xa0] sm:$0xff]  }
 0x87c   : > { %1882 = vmatprep.subr.bf16.mxu0 %v3114_v54  ;;  %v3141_v54 = vld [vmem:[%s4085_s20 + $0xe8] sm:$0xff]  }
 0x87f   : > { %1883 = vmatpush1.bf16.msra.mxu0 %v3112_v57  ;;  %v3143_v57 = vld [vmem:[%s4085_s20 + $0xa8] sm:$0xff]  }
 0x880   : > { %1884 = vmatprep.subr.bf16.mxu0 %v3120_v59  ;;  %v3145_v59 = vld [vmem:[%s4085_s20 + $0xf0] sm:$0xff]  }
 0x883   : > { %1885 = vmatpush1.bf16.msra.mxu0 %v3118_v61  ;;  %v3147_v61 = vld [vmem:[%s4085_s20 + $0xb0] sm:$0xff]  }
 0x939   : > { %v1487_v20 = vpop.f32.mrb[12].mxu0 }
 0x93a   : > { %v1494_v21 = vadd.f32 %v1487_v20, %v4110_v2  ;;  %v2872_v22 = vpop.f32.mrb[13].mxu0 }
 0x93b   : > { %v1490_v23 = vpop.f32.mrb[14].mxu0  ;;  %v1533_v22 = vrot.slane %v4164_v51, %v1532_v18 }
 0x93c   : > { %v4269_v24 = vadd.f32 %v1499_v19, %v1494_v21  ;;  %v1495_v25 = vadd.f32 %v1490_v23, %v4113_v3  ;;  %v2873_v26 = vpop.f32.mrb[15].mxu0  ;;  %v3075_v3 = vld [vmem:[%s4079_s17 + $0x4] ss:$16 sps:$4 sm:$0xff]   ;;  %v1538_v23 = vsub.s32 4, %v4158_v49  ;;  %s3449_s17 = scalar_lea.vmem %s4384_s27, 256 }
 0x93d   : > { %1651 = vmatprep.subr.bf16.mxu1 %v3075_v3  ;;  %p3450_p12 = scmp.ne.s32.totalorder %s4384_s27, %s3449_s17 }
 0x93e   : > { %v4272_v28 = vadd.f32 %v1499_v19, %v1495_v25  ;;  %1502 = vadd.xlane.f32.xlu0 %v4269_v24  ;;  %v1508_v2 = vmul.f32 %v4269_v24, %v4269_v24  ;;  %1652 = vmatpush1.bf16.msra.mxu1 %v3073_v30  ;;  %v1539_v3 = vrot.slane %v4164_v51, %v1538_v23 }
 0x93f   : > { %1653 = vmatprep.subr.bf16.mxu1 %v3081_v32  ;;  %p3451_p6 = pnand %p3450_p12, %p4552_p13 }
 0x940   : > { %1504 = vadd.xlane.f32.xlu1 %v4272_v28  ;;  %v1509_v5 = vmul.f32 %v4272_v28, %v4272_v28 }
 0x941   : > { %p3452_p0 = pneg %p3451_p6 }
 0x942   : > { %1510 = vadd.xlane.f32.xlu0 %v1508_v2  ;;  %1654 = vmatpush1.bf16.msra.mxu1 %v3079_v34  ;;  %v3122_v34 = vld [vmem:[%s4085_s20 + $0x40] sm:$0xff]  }
 0x943   : > { %1655 = vmatprep.subr.bf16.mxu1 %v3087_v36  ;;  %v3124_v36 = vld [vmem:[%s4085_s20] sm:$0xff]   ;;  %2764 = vmatprep.subr.bf16.mxu0 %v3122_v34 }
 0x946   : > { %1512 = vadd.xlane.f32.xlu0 %v1509_v5  ;;  %1656 = vmatpush1.bf16.msra.mxu1 %v3085_v38  ;;  %v3126_v38 = vld [vmem:[%s4085_s20 + $0x48] sm:$0xff]  }
 0x947   : > { %1657 = vmatprep.subr.bf16.mxu1 %v3093_v40  ;;  %v3128_v40 = vld [vmem:[%s4085_s20 + $0x8] sm:$0xff]  }
 0x94a   : > { %1658 = vmatpush1.bf16.msra.mxu1 %v3091_v16  ;;  %v3130_v16 = vld [vmem:[%s4085_s20 + $0x50] sm:$0xff]  }
 0x94b   : > { %1659 = vmatprep.subr.bf16.mxu1 %v3099_v43  ;;  %v3132_v43 = vld [vmem:[%s4085_s20 + $0x10] sm:$0xff]  }
 0x94e   : > { %1660 = vmatpush1.bf16.msra.mxu1 %v3097_v27  ;;  %v3133_v27 = vld [vmem:[%s4085_s20 + $0xd8] sm:$0xff]  }
 0x94f   : > { %1661 = vmatprep.subr.bf16.mxu1 %v3105_v46  ;;  %v3136_v46 = vld [vmem:[%s4085_s20 + $0x18] sm:$0xff]  }
 0x952   : > { %1662 = vmatpush1.bf16.msra.mxu1 %v3103_v48  ;;  %v3138_v48 = vld [vmem:[%s4085_s20 + $0x60] sm:$0xff]  }
 0x953   : > { %1663 = vmatprep.subr.bf16.mxu1 %v3111_v53  ;;  %v3140_v53 = vld [vmem:[%s4085_s20 + $0x20] sm:$0xff]  }
 0x956   : > { %1664 = vmatpush1.bf16.msra.mxu1 %v3109_v55  ;;  %v3142_v55 = vld [vmem:[%s4085_s20 + $0x68] sm:$0xff]  }
 0x957   : > { %1665 = vmatprep.subr.bf16.mxu1 %v3117_v58  ;;  %v3144_v58 = vld [vmem:[%s4085_s20 + $0x28] sm:$0xff]  }
 0x95a   : > { %1666 = vmatpush1.bf16.msra.mxu1 %v3115_v60  ;;  %v3146_v60 = vld [vmem:[%s4085_s20 + $0x70] sm:$0xff]  }
 0x95b   : > { %2742 = vmatprep.subr.bf16.mxu1 %v3121_v33 }
 0x9cb   : > { %v1503_v62 = vpop.xlane.xlu0 %1502 }
 0x9cc   : > { %v1506_v63 = vmul.f32 0.0078125, %v1503_v62  ;;  %v3148_v62 = vld [vmem:[%s4085_s20 + $0x30] sm:$0xff]  }
 0x9cd   : > { %v1505_v0 = vpop.xlane.xlu1 %1504 }
 0x9ce   : > { %v1516_v4 = vmul.f32 %v1506_v63, %v1506_v63  ;;  %v1507_v6 = vmul.f32 0.0078125, %v1505_v0  ;;  %v1522_v19 = vsub.f32 %v4269_v24, %v1506_v63  ;;  %v3149_v63 = vld [vmem:[%s4085_s20 + $0xf8] sm:$0xff]  }
 0x9cf   : > { %v1511_v1 = vpop.xlane.xlu0 %1510  ;;  %v3150_v0 = vld [vmem:[%s4085_s20 + $0x78] sm:$0xff]  }
 0x9d0   : > { %v1514_v7 = vmul.f32 0.0078125, %v1511_v1  ;;  %v1517_v11 = vmul.f32 %v1507_v6, %v1507_v6  ;;  %v1523_v25 = vsub.f32 %v4272_v28, %v1507_v6  ;;  %v3151_v1 = vld [vmem:[%s4085_s20 + $0xb8] sm:$0xff]  }
 0x9d1   : > { %v1559_v6 = vld [vmem:[%s4095_s21] sm:$0x3] }
 0x9d2   : > { %v1518_v8 = vsub.f32 %v1514_v7, %v1516_v4  ;;  %v3152_v4 = vld [vmem:[%s4085_s20 + $0x38] sm:$0xff]   ;;  %s3453_s20 = sshll.u32 %s3609_s0, 4  ;;  %s3454_s20 = int_to_ptr.vmem [resolvable:$false] %s3453_s20 }
 0x9d3   : > { %v1513_v10 = vpop.xlane.xlu0 %1512  ;;  %v2612_v7 = vld [vmem:[%s4095_s21 + $0x2] sm:$0x3]  ;;  %s3455_s6 = scalar_lea.vmem %s3454_s20, 512  ;;  %p3456_p2 = scmp.lt.s32.totalorder %s4384_s27, %s3454_s20 }
 0x9d4   : > { %v1520_v12 = vmax.f32 %v1518_v8, 0.0  ;;  %v1515_v13 = vmul.f32 0.0078125, %v1513_v10  ;;  %v1564_v8 = vrot.slane %v1559_v6, %v4161_v50  ;;  %v1783_v10 = vrot.slane %v2612_v7, %v4161_v50  ;;  %p3457_p4 = scmp.lt.s32.totalorder %s3455_s6, %s3449_s17 }
 0x9d6   : > { %v1524_v14 = vadd.f32 1e-05, %v1520_v12  ;;  %v1519_v15 = vsub.f32 %v1515_v13, %v1517_v11  ;;  %v1568_v11 = vrot.slane %v1559_v6, %v4170_v56  ;;  %v1787_v12 = vrot.slane %v2612_v7, %v4170_v56  ;;  %p3458_p1 = por %p3457_p4, %p3456_p2 }
 0x9d8   : > { %3173 = vrsqrt.f32 %v1524_v14  ;;  %v1521_v17 = vmax.f32 %v1519_v15, 0.0  ;;  %p3459_p3 = pnand %p3458_p1, %p3452_p0 }
 0x9da   : > { %v1525_v9 = vadd.f32 1e-05, %v1521_v17 }
 0x9dc   : > { %3175 = vrsqrt.f32 %v1525_v9 }
 0x9e2   : > { %v3174_v20 = vpop.eup %3173 }
 0x9e3   : > { %v1528_v21 = vmul.f32 %v3174_v20, %v1522_v19 }
 0x9e5   : > { %v1534_v5 = vmul.f32 %v1533_v22, %v1528_v21 }
 0x9e6   : > { %v3176_v26 = vpop.eup %3175 }
 0x9e7   : > { %v1529_v2 = vmul.f32 %v3176_v26, %v1523_v25  ;;  %v1540_v30 = vadd.f32 %v1539_v3, %v1534_v5 }
 0x9e9   : > { %v1535_v29 = vmul.f32 %v1533_v22, %v1529_v2 }
 0x9eb   : > { %v1541_v31 = vadd.f32 %v1539_v3, %v1535_v29 }
 0x9ed   : > { %v1542_v32 = vpack.c.bf16 %v1541_v31, %v1540_v30 }
 0x9ef   : > { %1684 = vmatmul.mubr.bf16.vlgmr.msra.gmra.mrb[28].mxu1 %v1542_v32  ;;  %1903 = vmatmul.mubr.bf16.vlgmr.msra.gmra.mrb[16].mxu0 %v1542_v32 }
 0x9f0   : > { %2743 = vmatpush3.bf16.msra.mxu1 %v3123_v35  ;;  %2765 = vmatpush3.bf16.msra.mxu0 %v3124_v36 }
 0x9f1   : > { %2744 = vmatprep.subr.bf16.mxu1 %v3125_v37  ;;  %2766 = vmatprep.subr.bf16.mxu0 %v3126_v38 }
 0x9f4   : > { %2745 = vmatpush3.bf16.msra.mxu1 %v3127_v39  ;;  %2767 = vmatpush3.bf16.msra.mxu0 %v3128_v40 }
 0x9f5   : > { %2746 = vmatprep.subr.bf16.mxu1 %v3129_v41  ;;  %2768 = vmatprep.subr.bf16.mxu0 %v3130_v16 }
 0x9f8   : > { %2747 = vmatpush3.bf16.msra.mxu1 %v3131_v42  ;;  %2769 = vmatpush3.bf16.msra.mxu0 %v3132_v43 }
 0x9f9   : > { %2748 = vmatprep.subr.bf16.mxu1 %v3133_v27  ;;  %2770 = vmatprep.subr.bf16.mxu0 %v3134_v44 }
 0x9fc   : > { %2749 = vmatpush3.bf16.msra.mxu1 %v3135_v45  ;;  %2771 = vmatpush3.bf16.msra.mxu0 %v3136_v46 }
 0x9fd   : > { %2750 = vmatprep.subr.bf16.mxu1 %v3137_v47  ;;  %2772 = vmatprep.subr.bf16.mxu0 %v3138_v48 }
 0xa00   : > { %2751 = vmatpush3.bf16.msra.mxu1 %v3139_v52  ;;  %2773 = vmatpush3.bf16.msra.mxu0 %v3140_v53 }
 0xa01   : > { %2752 = vmatprep.subr.bf16.mxu1 %v3141_v54  ;;  %2774 = vmatprep.subr.bf16.mxu0 %v3142_v55 }
 0xa04   : > { %2753 = vmatpush3.bf16.msra.mxu1 %v3143_v57  ;;  %2775 = vmatpush3.bf16.msra.mxu0 %v3144_v58 }
 0xa05   : > { %2754 = vmatprep.subr.bf16.mxu1 %v3145_v59  ;;  %2776 = vmatprep.subr.bf16.mxu0 %v3146_v60 }
 0xa08   : > { %2755 = vmatpush3.bf16.msra.mxu1 %v3147_v61  ;;  %2777 = vmatpush3.bf16.msra.mxu0 %v3148_v62 }
 0xa09   : > { %2756 = vmatprep.subr.bf16.mxu1 %v3149_v63  ;;  %2778 = vmatprep.subr.bf16.mxu0 %v3150_v0 }
 0xa0c   : > { %2757 = vmatpush3.bf16.msra.mxu1 %v3151_v1  ;;  %2779 = vmatpush3.bf16.msra.mxu0 %v3152_v4 }
 0xac2   : > { %v1685_v13 = vpop.f32.mrb[28].mxu1  ;;  %v1904_v14 = vpop.f32.mrb[16].mxu0 }
 0xac3   : > { %v4356_v15 = vadd.f32 %v1685_v13, %v1564_v8  ;;  %v4358_v17 = vadd.f32 %v1904_v14, %v1783_v10  ;;  %v1687_v9 = vpop.f32.mrb[29].mxu1  ;;  %v1906_v18 = vpop.f32.mrb[17].mxu0 }
 0xac4   : > { %v4360_v19 = vadd.f32 %v1687_v9, %v1568_v11  ;;  %v4362_v20 = vadd.f32 %v1906_v18, %v1787_v12  ;;  %v1689_v21 = vpop.f32.mrb[30].mxu1  ;;  %v1908_v22 = vpop.f32.mrb[18].mxu0 }
 0xac5   : > { %v2592_v50 = vmul.f32 -1.702, %v4356_v15  ;;  %v2629_v23 = vmul.f32 -1.702, %v4358_v17  ;;  %v1690_v25 = vadd.f32 %v1689_v21, %v1564_v8  ;;  %v1909_v56 = vadd.f32 %v1908_v22, %v1783_v10  ;;  %v1691_v26 = vpop.f32.mrb[31].mxu1  ;;  %v1910_v2 = vpop.f32.mrb[19].mxu0 }
 0xac6   : > { %v2593_v5 = vmul.f32 -1.702, %v4360_v19  ;;  %v2630_v3 = vmul.f32 -1.702, %v4362_v20  ;;  %v1692_v29 = vadd.f32 %v1691_v26, %v1568_v11  ;;  %v1911_v30 = vadd.f32 %v1910_v2, %v1787_v12 }
 0xac7   : > { %v1702_v31 = vmul.f32 1.442695, %v2592_v50  ;;  %v1921_v32 = vmul.f32 1.442695, %v2629_v23  ;;  %v2594_v33 = vmul.f32 -1.702, %v1690_v25 }
 0xac8   : > { %v1704_v34 = vmul.f32 1.442695, %v2593_v5  ;;  %v1923_v35 = vmul.f32 1.442695, %v2630_v3  ;;  %v2631_v36 = vmul.f32 -1.702, %v1909_v56 }
 0xac9   : > { %3177 = vpow2.f32 %v1702_v31  ;;  %v1706_v37 = vmul.f32 1.442695, %v2594_v33  ;;  %v2595_v38 = vmul.f32 -1.702, %v1692_v29  ;;  %v2632_v39 = vmul.f32 -1.702, %v1911_v30 }
 0xaca   : > { %3179 = vpow2.f32 %v1921_v32  ;;  %v1925_v40 = vmul.f32 1.442695, %v2631_v36 }
 0xacb   : > { %3181 = vpow2.f32 %v1704_v34  ;;  %v1708_v41 = vmul.f32 1.442695, %v2595_v38  ;;  %v1927_v16 = vmul.f32 1.442695, %v2632_v39 }
 0xacc   : > { %3183 = vpow2.f32 %v1923_v35 }
 0xacd   : > { %3185 = vpow2.f32 %v1706_v37 }
 0xace   : > { %3187 = vpow2.f32 %v1925_v40 }
 0xacf   : > { %3189 = vpow2.f32 %v1708_v41 }
 0xad0   : > { %3191 = vpow2.f32 %v1927_v16 }
 0xad3   : > { %v3178_v42 = vpop.eup %3177 }
 0xad4   : > { %v3180_v43 = vpop.eup %3179  ;;  %v1710_v27 = vadd.f32 1.0, %v3178_v42 }
 0xad5   : > { %v3182_v44 = vpop.eup %3181  ;;  %v1929_v45 = vadd.f32 1.0, %v3180_v43 }
 0xad6   : > { %v3184_v46 = vpop.eup %3183  ;;  %3193 = vrcp.f32 %v1710_v27  ;;  %v1711_v47 = vadd.f32 1.0, %v3182_v44 }
 0xad7   : > { %v3186_v48 = vpop.eup %3185  ;;  %3195 = vrcp.f32 %v1929_v45  ;;  %v1930_v52 = vadd.f32 1.0, %v3184_v46 }
 0xad8   : > { %v3188_v53 = vpop.eup %3187  ;;  %3197 = vrcp.f32 %v1711_v47  ;;  %v1712_v54 = vadd.f32 1.0, %v3186_v48 }
 0xad9   : > { %v3190_v55 = vpop.eup %3189  ;;  %3199 = vrcp.f32 %v1930_v52  ;;  %v1931_v57 = vadd.f32 1.0, %v3188_v53 }
 0xada   : > { %v3192_v58 = vpop.eup %3191  ;;  %3201 = vrcp.f32 %v1712_v54  ;;  %v1713_v59 = vadd.f32 1.0, %v3190_v55 }
 0xadb   : > { %3203 = vrcp.f32 %v1931_v57  ;;  %v1932_v60 = vadd.f32 1.0, %v3192_v58 }
 0xadc   : > { %3205 = vrcp.f32 %v1713_v59 }
 0xadd   : > { %3207 = vrcp.f32 %v1932_v60 }
 0xae0   : > { %v3194_v61 = vpop.eup %3193 }
 0xae1   : > { %v3196_v62 = vpop.eup %3195  ;;  %v1722_v6 = vmul.f32 %v3194_v61, %v4356_v15 }
 0xae2   : > { %v3198_v63 = vpop.eup %3197  ;;  %v1941_v10 = vmul.f32 %v3196_v62, %v4358_v17 }
 0xae3   : > { %v3200_v0 = vpop.eup %3199  ;;  %v1723_v13 = vmul.f32 %v3198_v63, %v4360_v19 }
 0xae4   : > { %v3202_v1 = vpop.eup %3201  ;;  %v1942_v18 = vmul.f32 %v3200_v0, %v4362_v20 }
 0xae5   : > { %v3204_v4 = vpop.eup %3203  ;;  %v1724_v7 = vmul.f32 %v3202_v1, %v1690_v25 }
 0xae6   : > { %v3206_v8 = vpop.eup %3205  ;;  %v1943_v11 = vmul.f32 %v3204_v4, %v1909_v56  ;;  %v2258_v56 = vsub.s32 5, %v4158_v49 }
 0xae7   : > { %v3208_v12 = vpop.eup %3207  ;;  %v1726_v14 = vpack.c.bf16 %v1724_v7, %v1722_v6  ;;  %v1725_v9 = vmul.f32 %v3206_v8, %v1692_v29 }
 0xae8   : > { %v1945_v21 = vpack.c.bf16 %v1943_v11, %v1941_v10  ;;  %v1944_v22 = vmul.f32 %v3208_v12, %v1911_v30  ;;  %v2259_v32 = vrot.slane %v4164_v51, %v2258_v56 }
 0xae9   : > { %v1727_v50 = vpack.c.bf16 %v1725_v9, %v1723_v13 }
 0xaea   : > { %v1946_v23 = vpack.c.bf16 %v1944_v22, %v1942_v18 }
 0xaeb   : > { %2245 = vmatprep.mubr.bf16.mxu0 %v1727_v50 }
 0xaec   : > { %2108 = vmatprep.mubr.bf16.mxu1 %v1946_v23  ;;  %2246 = vmatmul.mubr.bf16.vlgmr.msra.gmra.mrb[20].mxu0 %v1726_v14 }
 0xaed   : > { %2109 = vmatmul.mubr.bf16.vlgmr.msra.gmra.mrb[32].mxu1 %v1945_v21 }
 0xbbf   : > { %v2780_v15 = vpop.f32.mrb[20].mxu0 }
 0xbc0   : > { %v2758_v25 = vpop.f32.mrb[32].mxu1  ;;  %v2781_v17 = vpop.f32.mrb[21].mxu0 }
 0xbc1   : > { %v2759_v26 = vpop.f32.mrb[33].mxu1  ;;  %v2782_v19 = vadd.f32 %v2781_v17, %v2780_v15  ;;  %v2783_v2 = vpop.f32.mrb[22].mxu0 }
 0xbc2   : > { %v2760_v20 = vadd.f32 %v2759_v26, %v2758_v25  ;;  %v2761_v5 = vpop.f32.mrb[34].mxu1  ;;  %v2784_v3 = vpop.f32.mrb[23].mxu0 }
 0xbc3   : > { %v2762_v29 = vpop.f32.mrb[35].mxu1  ;;  %v2785_v30 = vadd.f32 %v2784_v3, %v2783_v2 }
 0xbc4   : > { %v2248_v31 = vadd.f32 %v2782_v19, %v2760_v20  ;;  %v2763_v33 = vadd.f32 %v2762_v29, %v2761_v5 }
 0xbc6   : > { %v2254_v34 = vadd.f32 %v2248_v31, %v4269_v24  ;;  %v2251_v49 = vadd.f32 %v2785_v30, %v2763_v33 }
 0xbc8   : > { %v2260_v35 = vadd.f32 %v2259_v32, %v2254_v34  ;;  %v2255_v36 = vadd.f32 %v2251_v49, %v4272_v28 }
 0xbca   : > { %2262 = vst [vmem:[%s4104_s3] sm:$0xff] %v2260_v35  ;;  %v2261_v51 = vadd.f32 %v2259_v32, %v2255_v36 }
 0xbcc   : > { %2263 = vst [vmem:[%s4104_s3 + $0x8] sm:$0xff] %v2261_v51 }
 0xbcd   : > { %3462 = shalt.err (!%p3459_p3)
}
 0xbce   : > { %s3463_s11 = scalar_lea.hbm %s4382_s14, 256  ;;  %s3467_s26 = scalar_lea.hbm %s4551_s24, 512 }
 0xbcf   : > { %p3464_p5 = scmp.ne.s32.totalorder %s4382_s14, %s3463_s11  ;;  %p3468_p9 = scmp.lt.u32.totalorder %s4382_s14, %s4551_s24 }
 0xbd0   : > { %p3469_p7 = scmp.lt.u32.totalorder %s3467_s26, %s3463_s11  ;;  %p3471_p12 = scmp.lt.u32.totalorder %s3463_s11, %s4382_s14 }
 0xbd1   : > { %p3465_p10 = pnand %p3464_p5, %p4552_p13 }
 0xbd2   : > { %p3470_p11 = por %p3469_p7, %p3468_p9 }
 0xbd3   : > { %p3466_p8 = pneg %p3465_p10 }
 0xbd4   : > { %p3472_p6 = por %p3471_p12, %p3470_p11 }
 0xbd6   : > { %p3473_p0 = pnand %p3472_p6, %p3466_p8 }
 0xbd8   : > { %3476 = shalt.err (!%p3473_p0)
}
 0xbd9   : > { %s3610_s5 = smov 128   ;;  %s3611_s30 = smov 8  }
 0xbda   : > { %2896 = dma.vmem_to_hbm [thread:$0]  (%p4552_p13), %s4384_s27, 256, %s4382_s14, %s4390_s28, %s3610_s5, %s3610_s5, %s3611_s30  }
 0xbdb PF: > { %s4553_s3 = sld [smem:[#allocation32_spill]]  ;;  %s4554_s22 = sld [smem:[#allocation27_spill]] }
 0xbdc   : > { %s4555_s18 = sld [smem:[#allocation38_spill]] }
 0xbe1   : > { %p2929_p2 = scmp.ge.s32.totalorder %s4553_s3, 2  ;;  %s2293_s1 = sand.u32 1, %s4554_s22  }
 0xbe2   : > { %p4556_p4 = scmp.ne.s32.totalorder %s4555_s18, 0  ;;  %s2294_s12 = scalar_lea.sflag [#allocation6], %s2293_s1 }
 0xbe4   : > { %p2925_p1 = pnand %p2929_p2, %p4556_p4 }
 0xbe6   : > { %3542 = dma.done.wait (!%p2925_p1), %s2294_s12, 256  }
 0xbe7   : > { %3544 = vsyncadd (!%p2925_p1), %s2294_s12, 4294967040  ;;  %s34_s15 = sadd.s32 1, %s4553_s3   ;;  %s4557_s27 = sld [smem:[#allocation25_spill]] }
 0xbe8   : > { %p31_p3 = scmp.ge.s32.totalorder %s34_s15, 6   ;;  %s4558_s28 = sld [smem:[#allocation26_spill]] }
 0xbe9   : > { %s4559_s29 = sld [smem:[#allocation34_spill]]  ;;  %s4560_s10 = sld [smem:[#allocation28_spill]] }
 0xbea   : > { %s4561_s7 = sld [smem:[#allocation37_spill]]  ;;  %s4562_s12 = sld [smem:[#allocation31_spill]] }
 0xbeb   : > { %s4563_s16 = sld [smem:[#allocation33_spill]]  ;;  %s4564_s14 = sld [smem:[#allocation35_spill]] }
 0xbec   : > { %s4565_s30 = smov %s3563_s9  ;;  %s4568_s11 = smov %s3579_s13 }
 0xbed   :  { %33 = sbr.rel (!%p31_p3) target bundleno = 25 (0x19), region = 185 }
 0xbef   : > { %s4566_s9 = smov %s4560_s10 }
 0xbf0   : > { %s4567_s10 = smov %s4561_s7 }
 0xbf1   : > { %s4569_s13 = smov %s4563_s16 }
 0xbf4   :  { %2299 = vsyncpa [#allocation5], 1 }
 0xbf5   :  { %2301 = vsyncpa [#allocation5 + $0x1], 1 }
 0xbf6   :  { %2302 = vsyncpa [#allocation8], 1 }
 0xbf7   :  { %2304 = vsyncpa [#allocation8 + $0x1], 1 }
 0xbf8   :  { %2305 = vsyncpa [#allocation11], 1 }
 0xbf9   :  { %2307 = vsyncpa [#allocation11 + $0x1], 1 }
 0xbfa   :  { %2308 = vsyncpa [#allocation14], 1 }
 0xbfb   :  { %2310 = vsyncpa [#allocation14 + $0x1], 1 }
 0xbfc   :  { %2311 = vsyncpa [#allocation17], 1 }
 0xbfd   :  { %2313 = vsyncpa [#allocation17 + $0x1], 1 }
 0xbfe   :  { %2314 = vsyncpa [#allocation6], 1 }
 0xbff   :  { %2316 = vsyncpa [#allocation6 + $0x1], 1 }

// kernel: tpu_custom_call.1
= control target key start
LH: loop header
LB: loop body
LE: loop exit
PB: predicated region body
PF: predicated region fallthrough
CT: control target
= control target key end

     0   :  { %s4499_s0 = inlined_call_operand.hbm [shape: f32[32,128], index: 0, kind: input, shape index: {}]   ;;  %s4500_s1 = inlined_call_operand.hbm [shape: bf16[2,128,384], index: 1, kind: input, shape index: {}]   ;;  %s4501_s2 = inlined_call_operand.hbm [shape: bf16[2,128,128], index: 2, kind: input, shape index: {}]   ;;  %s4502_s3 = inlined_call_operand.hbm [shape: bf16[2,128,512], index: 3, kind: input, shape index: {}]   ;;  %s4503_s4 = inlined_call_operand.hbm [shape: bf16[2,512,128], index: 4, kind: input, shape index: {}]   ;;  %s4504_s5 = inlined_call_operand.hbm [shape: f32[2,8,128], index: 5, kind: input, shape index: {}]   ;;  %s4505_s6 = inlined_call_operand.hbm [shape: f32[2,1,384], index: 6, kind: input, shape index: {}]   ;;  %s4506_s7 = inlined_call_operand.hbm [shape: f32[2,1,512], index: 7, kind: input, shape index: {}]   ;;  %s4507_s8 = inlined_call_operand.hbm [shape: f32[32,128], index: 8, kind: output, shape index: {}]  }
   0x1   :  { %4533 = sst [smem:[#allocation37_spill]] %s4499_s0 }
   0x2   :  { %4534 = sst [smem:[#allocation38_spill]] %s4500_s1 }
   0x3   :  { %4535 = sst [smem:[#allocation39_spill]] %s4501_s2 }
   0x4   :  { %4536 = sst [smem:[#allocation40_spill]] %s4502_s3 }
   0x5   :  { %4537 = sst [smem:[#allocation41_spill]] %s4504_s5 }
   0x6   :  { %4538 = sst [smem:[#allocation42_spill]] %s4505_s6 }
   0x7   :  { %4539 = sst [smem:[#allocation43_spill]] %s4506_s7 }
   0x8   :  { %4540 = sst [smem:[#allocation44_spill]] %s4507_s8 }
   0x9   :  { %13 = vsyncpa [#allocation5], 0 }
   0xa   :  { %15 = vsyncpa [#allocation5 + $0x1], 0 }
   0xb   :  { %16 = vsyncpa [#allocation8], 0 }
   0xc   :  { %18 = vsyncpa [#allocation8 + $0x1], 0 }
   0xd   :  { %19 = vsyncpa [#allocation11], 0 }
   0xe   :  { %21 = vsyncpa [#allocation11 + $0x1], 0 }
   0xf   :  { %22 = vsyncpa [#allocation14], 0 }
  0x10   :  { %24 = vsyncpa [#allocation14 + $0x1], 0 }
  0x11   :  { %25 = vsyncpa [#allocation17], 0 }
  0x12   :  { %27 = vsyncpa [#allocation17 + $0x1], 0 }
  0x13   :  { %28 = vsyncpa [#allocation6], 0 }
  0x14   :  { %30 = vsyncpa [#allocation6 + $0x1], 0  ;;  %s3683_s27 = smov 0   ;;  %s3685_s28 = smov 0  }
  0x15   :  { %s3687_s29 = smov 0   ;;  %s3689_s30 = smov 0  }
  0x16   :  { %s3691_s9 = smov 0   ;;  %s3693_s10 = smov 0  }
  0x17   :  { %s3695_s11 = smov 0   ;;  %s3697_s12 = smov 0  }
  0x18   :  { %s3699_s13 = smov 0   ;;  %s3701_s14 = smov 0  }
  0x19   :  { %s3703_s15 = smov 0  }
  0x1a LB: > { %4541 = sst [smem:[#allocation25_spill]] %s3577_s28  ;;  %p4510_p0 = scmp.eq.s32.totalorder %s3613_s15, 0  ;;  %s3613_s15 = sphi %s3703_s15, %s36_s15   ;;  %s3609_s14 = sphi %s3701_s14, %s4602_s14   ;;  %s3605_s13 = sphi %s3699_s13, %s4606_s13   ;;  %s3601_s12 = sphi %s3697_s12, %s4600_s12   ;;  %s3597_s11 = sphi %s3695_s11, %s4605_s11   ;;  %s3593_s10 = sphi %s3693_s10, %s4599_s10   ;;  %s3589_s9 = sphi %s3691_s9, %s4604_s9   ;;  %s3585_s30 = sphi %s3689_s30, %s4603_s30   ;;  %s3581_s29 = sphi %s3687_s29, %s4597_s29   ;;  %s3577_s28 = sphi %s3685_s28, %s4596_s28   ;;  %s3573_s27 = sphi %s3683_s27, %s4595_s27  }
  0x1b   : > { %4542 = sst [smem:[#allocation26_spill]] %s3581_s29  ;;  %p88_p1 = scmp.ne.s32.totalorder %s3581_s29, %s3577_s28 }
  0x1c   : > { %4543 = sst [smem:[#allocation27_spill]] %s3593_s10  ;;  %p4509_p2 = scmp.lt.s32.totalorder %s3613_s15, 4 }
  0x1d   : > { %4544 = sst [smem:[#allocation28_spill]] %s3597_s11  ;;  %s3744_s17 = sand.u32 1, %s3613_s15  }
  0x1e   : > { %4545 = sst [smem:[#allocation29_spill]] %s3601_s12  ;;  %p90_p3 = por %p88_p1, %p4510_p0 }
  0x1f   : > { %4546 = sst [smem:[#allocation30_spill]] %s3609_s14  ;;  %s3749_s18 = sand.u32 1, %s3581_s29  }
  0x20   : > { %s2903_s19 = smul.u32 3072, %s3605_s13  ;;  %p3755_p4 = pnand %p4509_p2, %p90_p3 }
  0x21   : > { %s2902_s20 = smul.u32 192, %s3749_s18  ;;  %s4548_s1 = sld [smem:[#allocation38_spill]] }
  0x22   : > { %s4547_s21 = scalar_select %p3755_p4, 1, 0 }
  0x23   : > { %s325_s25 = scalar_lea.vmem [#allocation7], %s2902_s20  ;;  %p3772_p7 = pneg %p3755_p4 }
  0x24   : > { %s332_s26 = sshll.u32 %s325_s25, 4  ;;  %s3764_s26 = int_to_ptr.vmem [resolvable:$true] %s332_s26 }
  0x27   : > { %s3762_s24 = scalar_lea.hbm %s4548_s1, %s2903_s19  ;;  %s3240_s20 = scalar_lea.hbm %s4548_s1, 6144 }
  0x28   : > { %s3235_s8 = scalar_lea.hbm %s3762_s24, 3072  ;;  %p3241_p10 = scmp.lt.u32.totalorder %s3762_s24, %s4548_s1 }
  0x29   : > { %p3236_p6 = scmp.ne.s32.totalorder %s3762_s24, %s3235_s8  ;;  %p3242_p11 = scmp.lt.u32.totalorder %s3240_s20, %s3235_s8 }
  0x2a   : > { %p3244_p13 = scmp.lt.u32.totalorder %s3235_s8, %s3762_s24 }
  0x2b   : > { %p3238_p8 = pnand %p3772_p7, %p3236_p6  ;;  %p3243_p12 = por %p3242_p11, %p3241_p10 }
  0x2d   : > { %p3239_p9 = pneg %p3238_p8  ;;  %p3245_p1 = por %p3244_p13, %p3243_p12 }
  0x2f   : > { %p3246_p3 = pnand %p3245_p1, %p3239_p9 }
  0x31   : > { %3249 = shalt.err (!%p3246_p3)
}
  0x32   : > { %s3250_s16 = scalar_lea.vmem %s3764_s26, 3072  ;;  %s3615_s19 = smov [#allocation7]  }
  0x33   : > { %p3251_p6 = scmp.ne.s32.totalorder %s3764_s26, %s3250_s16  ;;  %s3255_s22 = sshll.u32 %s3615_s19, 4  ;;  %s3256_s22 = int_to_ptr.vmem [resolvable:$false] %s3255_s22 }
  0x34   : > { %s3257_s23 = scalar_lea.vmem %s3256_s22, 6144  ;;  %p3258_p0 = scmp.lt.s32.totalorder %s3764_s26, %s3256_s22 }
  0x35   : > { %p3253_p8 = pnand %p3251_p6, %p3772_p7  ;;  %p3259_p5 = scmp.lt.s32.totalorder %s3257_s23, %s3250_s16 }
  0x37   : > { %p3254_p2 = pneg %p3253_p8  ;;  %p3260_p10 = por %p3259_p5, %p3258_p0 }
  0x39   : > { %p3261_p11 = pnand %p3260_p10, %p3254_p2 }
  0x3b   : > { %3264 = shalt.err (!%p3261_p11)
}
  0x3c   : > { %s3616_s8 = smov 192   ;;  %s3617_s20 = smov 12  }
  0x3d   : > { %s4550_s25 = scalar_lea.sflag [#allocation8], %s3744_s17  ;;  %p459_p0 = scmp.lt.s32.totalorder %s3613_s15, 5 }
  0x3e   : > { %2932 = dma.hbm_to_vmem [thread:$0]  (!%p3755_p4), %s3762_s24, 3072, %s3764_s26, %s4550_s25, %s3616_s8, %s3616_s8, %s3617_s20  }
  0x3f   : > { %s2543_s16 = sshll.u32 %s3749_s18, 8  ;;  %s4512_s19 = sshll.u32 %s3605_s13, 12 }
  0x40   : > { %p4551_p2 = scmp.ge.s32.totalorder %s3613_s15, 1  ;;  %s4554_s3 = sld [smem:[#allocation40_spill]] }
  0x41   : > { %s367_s24 = scalar_lea.vmem [#allocation10], %s2543_s16  ;;  %s4521_s8 = scalar_lea.sflag [#allocation11], %s3744_s17 }
  0x42   : > { %p3802_p5 = pnand %p4551_p2, %p459_p0  ;;  %s374_s26 = sshll.u32 %s367_s24, 4  ;;  %s3815_s26 = int_to_ptr.vmem [resolvable:$true] %s374_s26 }
  0x44   : > { %s4552_s22 = scalar_select %p3802_p5, 1, 0 }
  0x46   : > { %4553 = sst [smem:[#allocation31_spill]] %s4552_s22  ;;  %s3811_s11 = scalar_lea.hbm %s4554_s3, %s4512_s19 }
  0x47   : > { %s3265_s20 = scalar_lea.hbm %s3811_s11, 4096  ;;  %s3270_s1 = scalar_lea.hbm %s4554_s3, 8192 }
  0x48   : > { %p3266_p9 = scmp.ne.s32.totalorder %s3811_s11, %s3265_s20  ;;  %p3271_p1 = scmp.lt.u32.totalorder %s3811_s11, %s4554_s3 }
  0x49   : > { %p3272_p3 = scmp.lt.u32.totalorder %s3270_s1, %s3265_s20  ;;  %p3274_p8 = scmp.lt.u32.totalorder %s3265_s20, %s3811_s11 }
  0x4a   : > { %p3268_p12 = pnand %p3266_p9, %p3772_p7 }
  0x4b   : > { %p3273_p6 = por %p3272_p3, %p3271_p1 }
  0x4c   : > { %p3269_p13 = pneg %p3268_p12 }
  0x4d   : > { %p3275_p10 = por %p3274_p8, %p3273_p6 }
  0x4f   : > { %p3276_p11 = pnand %p3275_p10, %p3269_p13 }
  0x51   : > { %3279 = shalt.err (!%p3276_p11)
}
  0x52   : > { %s3280_s24 = scalar_lea.vmem %s3815_s26, 4096  ;;  %s3618_s22 = smov [#allocation10]  }
  0x53   : > { %p3281_p0 = scmp.ne.s32.totalorder %s3815_s26, %s3280_s24  ;;  %s3285_s25 = sshll.u32 %s3618_s22, 4  ;;  %s3286_s25 = int_to_ptr.vmem [resolvable:$false] %s3285_s25 }
  0x54   : > { %s3287_s19 = scalar_lea.vmem %s3286_s25, 8192  ;;  %p3288_p12 = scmp.lt.s32.totalorder %s3815_s26, %s3286_s25 }
  0x55   : > { %p3283_p2 = pnand %p3281_p0, %p3772_p7  ;;  %p3289_p5 = scmp.lt.s32.totalorder %s3287_s19, %s3280_s24 }
  0x57   : > { %p3284_p9 = pneg %p3283_p2  ;;  %p3290_p1 = por %p3289_p5, %p3288_p12 }
  0x59   : > { %p3291_p3 = pnand %p3290_p1, %p3284_p9 }
  0x5b   : > { %3294 = shalt.err (!%p3291_p3)
}
  0x5c   : > { %s3619_s20 = smov 256   ;;  %s3620_s1 = smov 16  }
  0x5d   : > { %2938 = dma.hbm_to_vmem [thread:$0]  (!%p3755_p4), %s3811_s11, 4096, %s3815_s26, %s4521_s8, %s3619_s20, %s3619_s20, %s3620_s1  }
  0x5e   : > { %s4555_s23 = sshll.u32 %s3605_s13, 12  ;;  %s388_s19 = scalar_lea.vmem [#allocation12], %s2543_s16 }
  0x5f   : > { %s3846_s25 = scalar_lea.hbm %s4503_s4, %s4555_s23  ;;  %s395_s3 = sshll.u32 %s388_s19, 4  ;;  %s3850_s3 = int_to_ptr.vmem [resolvable:$true] %s395_s3 }
  0x60   : > { %s2549_s7 = sshll.u32 %s3749_s18, 3  ;;  %s2550_s6 = sshll.u32 %s3605_s13, 7 }
  0x61   : > { %s4556_s5 = sld [smem:[#allocation41_spill]]  ;;  %s409_s11 = scalar_lea.vmem [#allocation13], %s2549_s7 }
  0x62   : > { %s416_s26 = sshll.u32 %s409_s11, 4  ;;  %s4520_s20 = scalar_lea.sflag [#allocation14], %s3744_s17  ;;  %s417_s26 = int_to_ptr.vmem [resolvable:$true] %s416_s26 }
  0x67   : > { %s3857_s28 = scalar_lea.hbm %s4556_s5, %s2550_s6  ;;  %s3300_s24 = scalar_lea.hbm %s4556_s5, 256 }
  0x68   : > { %s3295_s1 = scalar_lea.hbm %s3857_s28, 128  ;;  %p3301_p8 = scmp.lt.u32.totalorder %s3857_s28, %s4556_s5 }
  0x69   : > { %p3296_p5 = scmp.ne.s32.totalorder %s3857_s28, %s3295_s1  ;;  %p3302_p10 = scmp.lt.u32.totalorder %s3300_s24, %s3295_s1 }
  0x6a   : > { %p3304_p0 = scmp.lt.u32.totalorder %s3295_s1, %s3857_s28 }
  0x6b   : > { %p3298_p13 = pnand %p3296_p5, %p3772_p7  ;;  %p3303_p11 = por %p3302_p10, %p3301_p8 }
  0x6d   : > { %p3299_p6 = pneg %p3298_p13  ;;  %p3305_p2 = por %p3304_p0, %p3303_p11 }
  0x6f   : > { %p3306_p9 = pnand %p3305_p2, %p3299_p6 }
  0x71   : > { %3309 = shalt.err (!%p3306_p9)
}
  0x72   : > { %s3310_s6 = scalar_lea.vmem %s417_s26, 128  ;;  %s3621_s7 = smov [#allocation13]  }
  0x73   : > { %p3311_p12 = scmp.ne.s32.totalorder %s417_s26, %s3310_s6  ;;  %s3315_s22 = sshll.u32 %s3621_s7, 4  ;;  %s3316_s22 = int_to_ptr.vmem [resolvable:$false] %s3315_s22 }
  0x74   : > { %s3317_s19 = scalar_lea.vmem %s3316_s22, 256  ;;  %p3318_p5 = scmp.lt.s32.totalorder %s417_s26, %s3316_s22 }
  0x75   : > { %p3313_p1 = pnand %p3311_p12, %p3772_p7  ;;  %p3319_p13 = scmp.lt.s32.totalorder %s3317_s19, %s3310_s6 }
  0x77   : > { %p3314_p3 = pneg %p3313_p1  ;;  %p3320_p4 = por %p3319_p13, %p3318_p5 }
  0x79   : > { %p3321_p8 = pnand %p3320_p4, %p3314_p3 }
  0x7b   : > { %3324 = shalt.err (!%p3321_p8)
}
  0x7c   : > { %p4557_p10 = scmp.ne.s32.totalorder %s4547_s21, 0  ;;  %s3880_s11 = sadd.s32 4294967295, %s3613_s15  }
  0x7d   : > { %s2533_s1 = sadd.s32 4294967294, %s3613_s15   ;;  %s45_s16 = sadd.s32 1, %s3605_s13 }
  0x7e   : > { %2944 = dma.hbm_to_vmem [thread:$0]  (!%p4557_p10), %s3857_s28, 128, %s417_s26, %s4520_s20  }
  0x7f   : > { %s48_s23 = sadd.s32 1, %s3609_s14  ;;  %s4558_s24 = sld [smem:[#allocation25_spill]] }
  0x80   : > { %p46_p4 = scmp.ge.s32.totalorder %s45_s16, 2  ;;  %s55_s0 = sadd.s32 1, %s3593_s10 }
  0x81   : > { %p62_p6 = scmp.ne.s32.totalorder %s3593_s10, %s3589_s9  ;;  %p68_p11 = scmp.ne.s32.totalorder %s3589_s9, %s3585_s30 }
  0x82   : > { %s4608_s16 = smov (%p46_p4, %s45_s16), 0  ;;  %s4610_s23 = smov (!%p46_p4, %s48_s23), %s3609_s14 }
  0x83   : > { %4559 = sst [smem:[#allocation32_spill]] %s4608_s16  ;;  %p4560_p0 = scmp.eq.s32.totalorder %s3613_s15, 0 }
  0x84   : > { %p69_p9 = scmp.eq.s32.totalorder %s3880_s11, 0  ;;  %p50_p12 = scmp.ge.s32.totalorder %s4610_s23, 2 }
  0x85   : > { %p3898_p2 = por %p4560_p0, %p62_p6  ;;  %s78_s26 = ssub.s32 %s3605_s13, %s4608_s16 }
  0x86   : > { %p3908_p1 = por %p69_p9, %p68_p11  ;;  %p79_p3 = scmp.eq.s32.totalorder %s78_s26, 0 }
  0x87   : > { %s4612_s23 = smov (%p50_p12, %s4610_s23), 0  ;;  %s4564_s6 = sadd.s32 1, %s3581_s29 }
  0x88   : > { %s4562_s2 = scalar_select %p3908_p1, 1, 0 }
  0x89   : > { %4563 = sst [smem:[#allocation33_spill]] %s4612_s23  ;;  %s52_s22 = ssub.s32 %s3609_s14, %s4612_s23 }
  0x8a   : > { %s3917_s7 = scalar_select %p79_p3, %s3581_s29, %s4564_s6  }
  0x8b   : > { %p94_p5 = scmp.ne.s32.totalorder %s4558_s24, %s3573_s27  ;;  %p53_p13 = scmp.eq.s32.totalorder %s52_s22, 0 }
  0x8c   : > { %4565 = sst [smem:[#allocation34_spill]] %s3917_s7  ;;  %p274_p8 = scmp.eq.s32.totalorder %s3880_s11, 3 }
  0x8d   : > { %p3924_p4 = por %p94_p5, %p69_p9  ;;  %p280_p0 = scmp.eq.s32.totalorder %s2533_s1, 3 }
  0x8e   : > { %s3929_s20 = scalar_select %p53_p13, %s3593_s10, %s55_s0  }
  0x8f   : > { %s4566_s19 = scalar_select %p3924_p4, 1, 0 }
  0x90   : > { %4567 = sst [smem:[#allocation35_spill]] %s3929_s20  ;;  %p3934_p12 = por %p274_p8, %p62_p6 }
  0x91   : > { %p3941_p3 = por %p280_p0, %p68_p11  ;;  %s300_s27 = sand.u32 1, %s3593_s10  }
  0x92   : > { %s4568_s26 = scalar_select %p3934_p12, 1, 0 }
  0x93   : > { %s4569_s6 = scalar_select %p3941_p3, 1, 0 }
  0x94   : > { %s2730_s24 = sshll.u32 %s3609_s14, 8  ;;  %s2536_s22 = sshll.u32 %s300_s27, 4 }
  0x95   : > { %4570 = sst [smem:[#allocation36_spill]] %s4569_s6  ;;  %s4571_s23 = sld [smem:[#allocation37_spill]] }
  0x96   : > { %s304_s1 = scalar_lea.vmem [#allocation4], %s2536_s22  ;;  %p4572_p6 = scmp.lt.s32.totalorder %s3613_s15, 4 }
  0x97   : > { %s311_s0 = sshll.u32 %s304_s1, 4  ;;  %s3962_s14 = scalar_lea.sflag [#allocation5], %s300_s27  ;;  %s3960_s0 = int_to_ptr.vmem [resolvable:$true] %s311_s0 }
  0x98   : > { %p3956_p11 = pnand %p4572_p6, %p3898_p2 }
  0x9a   : > { %p3327_p5 = pneg %p3956_p11 }
  0x9b   : > { %s3950_s16 = scalar_lea.hbm %s4571_s23, %s2730_s24  ;;  %s3330_s24 = scalar_lea.hbm %s4571_s23, 512 }
  0x9c   : > { %s3325_s5 = scalar_lea.hbm %s3950_s16, 256  ;;  %p3331_p2 = scmp.lt.u32.totalorder %s3950_s16, %s4571_s23 }
  0x9d   : > { %p3326_p9 = scmp.ne.s32.totalorder %s3950_s16, %s3325_s5  ;;  %p3332_p0 = scmp.lt.u32.totalorder %s3330_s24, %s3325_s5 }
  0x9e   : > { %p3334_p3 = scmp.lt.u32.totalorder %s3325_s5, %s3950_s16 }
  0x9f   : > { %p3328_p13 = pnand %p3327_p5, %p3326_p9  ;;  %p3333_p6 = por %p3332_p0, %p3331_p2 }
  0xa1   : > { %p3329_p8 = pneg %p3328_p13  ;;  %p3335_p12 = por %p3334_p3, %p3333_p6 }
  0xa3   : > { %p3336_p4 = pnand %p3335_p12, %p3329_p8 }
  0xa5   : > { %3339 = shalt.err (!%p3336_p4)
}
  0xa6   : > { %s3340_s27 = scalar_lea.vmem %s3960_s0, 256  ;;  %s3622_s8 = smov [#allocation4]  }
  0xa7   : > { %p3341_p9 = scmp.ne.s32.totalorder %s3960_s0, %s3340_s27  ;;  %s3345_s28 = sshll.u32 %s3622_s8, 4  ;;  %s3346_s28 = int_to_ptr.vmem [resolvable:$false] %s3345_s28 }
  0xa8   : > { %s3347_s22 = scalar_lea.vmem %s3346_s28, 512  ;;  %p3348_p10 = scmp.lt.s32.totalorder %s3960_s0, %s3346_s28 }
  0xa9   : > { %p3343_p13 = pnand %p3341_p9, %p3327_p5  ;;  %p3349_p2 = scmp.lt.s32.totalorder %s3347_s22, %s3340_s27 }
  0xab   : > { %p3344_p1 = pneg %p3343_p13  ;;  %p3350_p0 = por %p3349_p2, %p3348_p10 }
  0xad   : > { %p3351_p3 = pnand %p3350_p0, %p3344_p1 }
  0xaf   : > { %3354 = shalt.err (!%p3351_p3)
}
  0xb0   : > { %s3623_s5 = smov 128   ;;  %s3624_s24 = smov 8  }
  0xb1   : > { %2929 = dma.hbm_to_vmem [thread:$0]  (!%p3956_p11), %s3950_s16, 256, %s3960_s0, %s3962_s14, %s3623_s5, %s3623_s5, %s3624_s24  }
  0xb2   : > { %s2540_s1 = sshll.u32 %s3749_s18, 6  ;;  %s2731_s8 = sshll.u32 %s3605_s13, 10 }
  0xb3   : > { %s4574_s28 = sld [smem:[#allocation39_spill]]  ;;  %s346_s22 = scalar_lea.vmem [#allocation9], %s2540_s1 }
  0xb4   : > { %s353_s29 = sshll.u32 %s346_s22, 4  ;;  %s3997_s29 = int_to_ptr.vmem [resolvable:$true] %s353_s29 }
  0xb9   : > { %s4575_s7 = smov %s4574_s28  ;;  %s3995_s27 = scalar_lea.hbm %s4574_s28, %s2731_s8 }
  0xba   : > { %s3355_s6 = scalar_lea.hbm %s3995_s27, 1024  ;;  %s3360_s16 = scalar_lea.hbm %s4575_s7, 2048 }
  0xbb   : > { %p3356_p10 = scmp.ne.s32.totalorder %s3995_s27, %s3355_s6  ;;  %p3361_p12 = scmp.lt.u32.totalorder %s3995_s27, %s4575_s7 }
  0xbc   : > { %p3362_p11 = scmp.lt.u32.totalorder %s3360_s16, %s3355_s6  ;;  %p3364_p8 = scmp.lt.u32.totalorder %s3355_s6, %s3995_s27 }
  0xbd   : > { %p3358_p1 = pnand %p3356_p10, %p3772_p7 }
  0xbe   : > { %p3363_p5 = por %p3362_p11, %p3361_p12 }
  0xbf   : > { %p3359_p4 = pneg %p3358_p1 }
  0xc0   : > { %p3365_p6 = por %p3364_p8, %p3363_p5 }
  0xc2   : > { %p3366_p9 = pnand %p3365_p6, %p3359_p4 }
  0xc4   : > { %3369 = shalt.err (!%p3366_p9)
}
  0xc5   : > { %s3370_s0 = scalar_lea.vmem %s3997_s29, 1024  ;;  %s3625_s5 = smov [#allocation9]  }
  0xc6   : > { %p3371_p13 = scmp.ne.s32.totalorder %s3997_s29, %s3370_s0  ;;  %s3375_s24 = sshll.u32 %s3625_s5, 4  ;;  %s3376_s24 = int_to_ptr.vmem [resolvable:$false] %s3375_s24 }
  0xc7   : > { %s3377_s1 = scalar_lea.vmem %s3376_s24, 2048  ;;  %p3378_p3 = scmp.lt.s32.totalorder %s3997_s29, %s3376_s24 }
  0xc8   : > { %p3373_p2 = pnand %p3371_p13, %p3772_p7  ;;  %p3379_p10 = scmp.lt.s32.totalorder %s3377_s1, %s3370_s0 }
  0xca   : > { %p3374_p0 = pneg %p3373_p2  ;;  %p3380_p1 = por %p3379_p10, %p3378_p3 }
  0xcc   : > { %p3381_p12 = pnand %p3380_p1, %p3374_p0 }
  0xce   : > { %3384 = shalt.err (!%p3381_p12)
}
  0xcf   : > { %s3626_s6 = smov 64   ;;  %s3627_s8 = smov 4  }
  0xd0   : > { %p4576_p4 = scmp.ne.s32.totalorder %s4547_s21, 0  ;;  %s4577_s28 = scalar_lea.sflag [#allocation8], %s3744_s17 }
  0xd1   : > { %s3385_s22 = scalar_lea.hbm %s3846_s25, 4096  ;;  %s3390_s16 = scalar_lea.hbm %s4503_s4, 8192 }
  0xd2   : > { %2935 = dma.hbm_to_vmem [thread:$0]  (!%p4576_p4), %s3995_s27, 1024, %s3997_s29, %s4577_s28, %s3626_s6, %s3626_s6, %s3627_s8  }
  0xd3   : > { %p3386_p11 = scmp.ne.s32.totalorder %s3846_s25, %s3385_s22  ;;  %p3391_p6 = scmp.lt.u32.totalorder %s3846_s25, %s4503_s4 }
  0xd4   : > { %p3392_p9 = scmp.lt.u32.totalorder %s3390_s16, %s3385_s22  ;;  %p3394_p2 = scmp.lt.u32.totalorder %s3385_s22, %s3846_s25 }
  0xd5   : > { %p3388_p5 = pnand %p3386_p11, %p3772_p7 }
  0xd6   : > { %p3393_p13 = por %p3392_p9, %p3391_p6 }
  0xd7   : > { %p3389_p8 = pneg %p3388_p5 }
  0xd8   : > { %p3395_p0 = por %p3394_p2, %p3393_p13 }
  0xda   : > { %p3396_p3 = pnand %p3395_p0, %p3389_p8 }
  0xdc   : > { %3399 = shalt.err (!%p3396_p3)
}
  0xdd   : > { %s3400_s29 = scalar_lea.vmem %s3850_s3, 4096  ;;  %s3628_s27 = smov [#allocation12]  }
  0xde   : > { %p3401_p10 = scmp.ne.s32.totalorder %s3850_s3, %s3400_s29  ;;  %s3405_s0 = sshll.u32 %s3628_s27, 4  ;;  %s3406_s0 = int_to_ptr.vmem [resolvable:$false] %s3405_s0 }
  0xdf   : > { %s3407_s5 = scalar_lea.vmem %s3406_s0, 8192  ;;  %p3408_p11 = scmp.lt.s32.totalorder %s3850_s3, %s3406_s0 }
  0xe0   : > { %p3403_p1 = pnand %p3401_p10, %p3772_p7  ;;  %p3409_p5 = scmp.lt.s32.totalorder %s3407_s5, %s3400_s29 }
  0xe2   : > { %p3404_p12 = pneg %p3403_p1  ;;  %p3410_p6 = por %p3409_p5, %p3408_p11 }
  0xe4   : > { %p3411_p9 = pnand %p3410_p6, %p3404_p12 }
  0xe6   : > { %3414 = shalt.err (!%p3411_p9)
}
  0xe7   : > { %s4578_s24 = scalar_lea.sflag [#allocation11], %s3744_s17  ;;  %s2904_s1 = smul.u32 3, %s3749_s18 }
  0xe8   : > { %2941 = dma.hbm_to_vmem [thread:$0]  (!%p4576_p4), %s3846_s25, 4096, %s3850_s3, %s4578_s24, %s3626_s6, %s3626_s6, %s3627_s8  }
  0xe9   : > { %s2905_s28 = smul.u32 48, %s3605_s13  ;;  %s2552_s22 = sshll.u32 %s3749_s18, 2 }
  0xea   : > { %s4579_s16 = sld [smem:[#allocation42_spill]]  ;;  %s427_s23 = scalar_lea.vmem [#allocation15], %s2904_s1 }
  0xeb   : > { %s435_s29 = sshll.u32 %s427_s23, 4  ;;  %s2734_s27 = sshll.u32 %s3605_s13, 6  ;;  %s436_s29 = int_to_ptr.vmem [resolvable:$true] %s435_s29 }
  0xf0   : > { %s4057_s10 = scalar_lea.hbm %s4579_s16, %s2905_s28  ;;  %s3420_s6 = scalar_lea.hbm %s4579_s16, 96 }
  0xf1   : > { %s3415_s0 = scalar_lea.hbm %s4057_s10, 48  ;;  %p3421_p0 = scmp.lt.u32.totalorder %s4057_s10, %s4579_s16 }
  0xf2   : > { %p3416_p8 = scmp.ne.s32.totalorder %s4057_s10, %s3415_s0  ;;  %p3422_p3 = scmp.lt.u32.totalorder %s3420_s6, %s3415_s0 }
  0xf3   : > { %p3424_p1 = scmp.lt.u32.totalorder %s3415_s0, %s4057_s10 }
  0xf4   : > { %p3418_p13 = pnand %p3416_p8, %p3772_p7  ;;  %p3423_p10 = por %p3422_p3, %p3421_p0 }
  0xf6   : > { %p3419_p2 = pneg %p3418_p13  ;;  %p3425_p12 = por %p3424_p1, %p3423_p10 }
  0xf8   : > { %p3426_p11 = pnand %p3425_p12, %p3419_p2 }
  0xfa   : > { %3429 = shalt.err (!%p3426_p11)
}
  0xfb   : > { %s3430_s24 = scalar_lea.vmem %s436_s29, 48  ;;  %s3629_s1 = smov [#allocation15]  }
  0xfc   : > { %p3431_p5 = scmp.ne.s32.totalorder %s436_s29, %s3430_s24  ;;  %s3435_s28 = sshll.u32 %s3629_s1, 4  ;;  %s3436_s28 = int_to_ptr.vmem [resolvable:$false] %s3435_s28 }
  0xfd   : > { %s3437_s14 = scalar_lea.vmem %s3436_s28, 96  ;;  %p3438_p8 = scmp.lt.s32.totalorder %s436_s29, %s3436_s28 }
  0xfe   : > { %p3433_p6 = pnand %p3431_p5, %p3772_p7  ;;  %p3439_p13 = scmp.lt.s32.totalorder %s3437_s14, %s3430_s24 }
 0x100   : > { %p3434_p9 = pneg %p3433_p6  ;;  %p3440_p4 = por %p3439_p13, %p3438_p8 }
 0x102   : > { %p3441_p0 = pnand %p3440_p4, %p3434_p9 }
 0x104   : > { %3444 = shalt.err (!%p3441_p0)
}
 0x105   : > { %p4580_p3 = scmp.ne.s32.totalorder %s4547_s21, 0  ;;  %s4581_s20 = scalar_lea.sflag [#allocation14], %s3744_s17 }
 0x106   : > { %s4582_s3 = sld [smem:[#allocation43_spill]]  ;;  %s446_s6 = scalar_lea.vmem [#allocation16], %s2552_s22 }
 0x107   : > { %2947 = dma.hbm_to_vmem [thread:$0]  (!%p4580_p3), %s4057_s10, 48, %s436_s29, %s4581_s20  }
 0x108   : > { %s454_s8 = sshll.u32 %s446_s6, 4  ;;  %s443_s5 = scalar_lea.sflag [#allocation17], %s3749_s18  ;;  %s455_s8 = int_to_ptr.vmem [resolvable:$true] %s454_s8 }
 0x10c   : > { %s4082_s25 = scalar_lea.hbm %s4582_s3, %s2734_s27  ;;  %s3450_s24 = scalar_lea.hbm %s4582_s3, 128 }
 0x10d   : > { %s3445_s17 = scalar_lea.hbm %s4082_s25, 64  ;;  %p3451_p1 = scmp.lt.u32.totalorder %s4082_s25, %s4582_s3 }
 0x10e   : > { %p3446_p4 = scmp.ne.s32.totalorder %s4082_s25, %s3445_s17  ;;  %p3452_p12 = scmp.lt.u32.totalorder %s3450_s24, %s3445_s17 }
 0x10f   : > { %p3454_p5 = scmp.lt.u32.totalorder %s3445_s17, %s4082_s25 }
 0x110   : > { %p3448_p2 = pnand %p3446_p4, %p3772_p7  ;;  %p3453_p11 = por %p3452_p12, %p3451_p1 }
 0x112   : > { %p3449_p10 = pneg %p3448_p2  ;;  %p3455_p6 = por %p3454_p5, %p3453_p11 }
 0x114   : > { %p3456_p9 = pnand %p3455_p6, %p3449_p10 }
 0x116   : > { %3459 = shalt.err (!%p3456_p9)
}
 0x117   : > { %s3460_s18 = scalar_lea.vmem %s455_s8, 64  ;;  %s3630_s22 = smov [#allocation16]  }
 0x118   : > { %p3461_p8 = scmp.ne.s32.totalorder %s455_s8, %s3460_s18  ;;  %s3465_s28 = sshll.u32 %s3630_s22, 4  ;;  %s3466_s28 = int_to_ptr.vmem [resolvable:$false] %s3465_s28 }
 0x119   : > { %s3467_s14 = scalar_lea.vmem %s3466_s28, 128  ;;  %p3468_p4 = scmp.lt.s32.totalorder %s455_s8, %s3466_s28 }
 0x11a   : > { %p3463_p13 = pnand %p3461_p8, %p3772_p7  ;;  %p3469_p2 = scmp.lt.s32.totalorder %s3467_s14, %s3460_s18 }
 0x11c   : > { %p3464_p0 = pneg %p3463_p13  ;;  %p3470_p3 = por %p3469_p2, %p3468_p4 }
 0x11e   : > { %p3471_p1 = pnand %p3470_p3, %p3464_p0 }
 0x120   : > { %3474 = shalt.err (!%p3471_p1)
}
 0x121   : > { %p4583_p12 = scmp.ne.s32.totalorder %s4547_s21, 0  ;;  %s4584_s20 = sld [smem:[#allocation31_spill]] }
 0x123   : > { %2950 = dma.hbm_to_vmem [thread:$0]  (!%p4583_p12), %s4082_s25, 64, %s455_s8, %s443_s5  }
 0x127   : > { %p4585_p10 = scmp.ne.s32.totalorder %s4584_s20, 0 }
 0x128   : > { %s4107_s12 = sand.u32 (!%p4585_p10), 1, %s3589_s9   ;;  %p4586_p7 = scmp.ne.s32.totalorder (!%p4585_p10), %s4562_s2, 0 }
 0x129   : > { %463 = sbr.rel (%p4585_p10) target bundleno = 3045 (0xbe5), region = 52  ;;  %s2556_s23 = sshll.u32 (!%p4585_p10), %s4107_s12, 4 }
 0x12a   : > { %s466_s0 = scalar_lea.sflag (!%p4585_p10), [#allocation5], %s4107_s12  ;;  %s4113_s6 = scalar_lea.vmem (!%p4585_p10), [#allocation4], %s2556_s23 }
 0x130   : > { %3548 = dma.done.wait (%p4586_p7), %s466_s0, 256  }
 0x131   : > { %3550 = vsyncadd (%p4586_p7), %s466_s0, 4294967040  ;;  %s4587_s21 = sld [smem:[#allocation25_spill]]  ;;  %s474_s25 = sand.u32 1, %s3880_s11  }
 0x132   : > { %s475_s17 = scalar_lea.sflag [#allocation8], %s474_s25  ;;  %p4588_p3 = scmp.ne.s32.totalorder %s4566_s19, 0 }
 0x137   : > { %s476_s8 = sand.u32 1, %s4587_s21  }
 0x138   : > { %s2906_s5 = smul.u32 192, %s476_s8 }
 0x13a   : > { %s4121_s10 = scalar_lea.vmem [#allocation7], %s2906_s5 }
 0x13b   : > { %3552 = dma.done.wait (%p4588_p3), %s475_s17, 4096  }
 0x13c   : > { %3554 = vsyncadd (%p4588_p3), %s475_s17, 4294963200  ;;  %s2557_s29 = sshll.u32 %s476_s8, 6  ;;  %s2558_s24 = sshll.u32 %s476_s8, 8 }
 0x13d   : > { %s4127_s27 = scalar_lea.vmem [#allocation9], %s2557_s29  ;;  %s493_s2 = scalar_lea.sflag [#allocation11], %s474_s25 }
 0x13e   : > { %s4129_s1 = scalar_lea.vmem [#allocation10], %s2558_s24 }
 0x13f   : > { %3556 = dma.done.wait (%p4588_p3), %s493_s2, 8192  }
 0x140   : > { %3558 = vsyncadd (%p4588_p3), %s493_s2, 4294959104  ;;  %s2560_s11 = sshll.u32 %s476_s8, 3  ;;  %s4135_s18 = scalar_lea.vmem [#allocation12], %s2558_s24 }
 0x141   : > { %s511_s22 = scalar_lea.sflag [#allocation14], %s474_s25  ;;  %s4137_s28 = scalar_lea.vmem [#allocation13], %s2560_s11 }
 0x142   : > { %3560 = dma.done.wait (%p4588_p3), %s511_s22, 176  }
 0x143   : > { %3562 = vsyncadd (%p4588_p3), %s511_s22, 4294967120  ;;  %s2907_s14 = smul.u32 3, %s476_s8  ;;  %s2561_s20 = sshll.u32 %s476_s8, 2 }
 0x144   : > { %s529_s21 = scalar_lea.sflag [#allocation17], %s476_s8  ;;  %s4145_s5 = scalar_lea.vmem [#allocation16], %s2561_s20 }
 0x145   : > { %s4143_s0 = scalar_lea.vmem [#allocation15], %s2907_s14 }
 0x146   : > { %3564 = dma.done.wait (%p4588_p3), %s529_s21, 64  }
 0x147   : > { %3566 = vsyncadd (%p4588_p3), %s529_s21, 4294967232  ;;  %s4153_s25 = scalar_lea.vmem [#allocation18], %s2556_s23  ;;  %s4589_s17 = sld [smem:[#allocation28_spill]] }
 0x14d   : > { %p2563_p11 = scmp.ne.s32.totalorder %s4589_s17, 0 }
 0x14e   : > { %v607_v0 = vld [vmem:[%s4113_s6] sm:$0xff] (!%p2563_p11)  ;;  %v608_v1 = vld [vmem:[%s4113_s6 + $0x8] sm:$0xff] (!%p2563_p11) }
 0x14f   : > { %606 = sbr.rel (%p2563_p11) target bundleno = 342 (0x156), region = 88  ;;  %609 = vst [vmem:[%s4153_s25] sm:$0xff] (!%p2563_p11), %v607_v0  ;;  %610 = vst [vmem:[%s4153_s25 + $0x8] sm:$0xff] (!%p2563_p11), %v608_v1 }
 0x156 PF: > { %v4161_v2 = vld [vmem:[%s4153_s25] sm:$0xff]  ;;  %v4164_v3 = vld [vmem:[%s4153_s25 + $0x8] sm:$0xff]  ;;  %v3631_v9 = vmov 0.0   ;;  %v3632_v28 = vmov 0   ;;  %vm3633_vm0 = vmmov 0   ;;  %v642_v46 = vlaneseq  ;;  %s3634_s19 = smov 64  }
 0x157   : > { %614 = vadd.xlane.f32.xlu0 %v4161_v2  ;;  %v620_v4 = vmul.f32 %v4161_v2, %v4161_v2  ;;  %v621_v5 = vmul.f32 %v4164_v3, %v4164_v3  ;;  %v3059_v6 = vld [vmem:[%s4121_s10 + $0x4] ss:$12 sps:$4 sm:$0xff]   ;;  %v3061_v7 = vld [vmem:[%s4121_s10] ss:$12 sps:$4 sm:$0xff]   ;;  %v3062_v8 = vld [vmem:[%s4121_s10 + $0x8] ss:$12 sps:$4 sm:$0xff]   ;;  %2814 = vmatprep.subr.bf16.mxu1 %v3631_v9 }
 0x158   : > { %832 = vmatprep.subr.bf16.mxu0 %v3059_v6  ;;  %2815 = vmatpush3.bf16.msra.mxu1 %v3062_v8  ;;  %v3063_v10 = vld [vmem:[%s4121_s10 + $0x1c] ss:$12 sps:$4 sm:$0xff]   ;;  %v3065_v11 = vld [vmem:[%s4121_s10 + $0x18] ss:$12 sps:$4 sm:$0xff]   ;;  %v3066_v12 = vld [vmem:[%s4121_s10 + $0x20] ss:$12 sps:$4 sm:$0xff]  }
 0x159   : > { %622 = vadd.xlane.f32.xlu1 %v620_v4  ;;  %833 = vmatpush1.bf16.msra.mxu0 %v3061_v7  ;;  %v3067_v13 = vld [vmem:[%s4121_s10 + $0x34] ss:$12 sps:$4 sm:$0xff]   ;;  %v3069_v14 = vld [vmem:[%s4121_s10 + $0x30] ss:$12 sps:$4 sm:$0xff]   ;;  %v3070_v15 = vld [vmem:[%s4121_s10 + $0x38] ss:$12 sps:$4 sm:$0xff]  }
 0x15a   : > { %2816 = vmatprep.subr.bf16.mxu1 %v3631_v9  ;;  %834 = vmatprep.subr.bf16.mxu0 %v3063_v10  ;;  %v3071_v16 = vld [vmem:[%s4121_s10 + $0x4c] ss:$12 sps:$4 sm:$0xff]   ;;  %v3073_v17 = vld [vmem:[%s4121_s10 + $0x48] ss:$12 sps:$4 sm:$0xff]   ;;  %v3074_v18 = vld [vmem:[%s4121_s10 + $0x50] ss:$12 sps:$4 sm:$0xff]  }
 0x15b   : > { %616 = vadd.xlane.f32.xlu0 %v4164_v3  ;;  %v3075_v19 = vld [vmem:[%s4121_s10 + $0x64] ss:$12 sps:$4 sm:$0xff]   ;;  %v3077_v20 = vld [vmem:[%s4121_s10 + $0x60] ss:$12 sps:$4 sm:$0xff]   ;;  %v3078_v21 = vld [vmem:[%s4121_s10 + $0x68] ss:$12 sps:$4 sm:$0xff]   ;;  %864 = vmatprep.mubr.bf16.mxu0 %v3632_v28 }
 0x15c   : > { %2817 = vmatpush3.bf16.msra.mxu1 %v3066_v12  ;;  %v3079_v22 = vld [vmem:[%s4121_s10 + $0x7c] ss:$12 sps:$4 sm:$0xff]   ;;  %v3081_v23 = vld [vmem:[%s4121_s10 + $0x78] ss:$12 sps:$4 sm:$0xff]   ;;  %v3082_v24 = vld [vmem:[%s4121_s10 + $0x80] ss:$12 sps:$4 sm:$0xff]   ;;  %2830 = vmatprep.mubr.msk.bf16.mxu1 %vm3633_vm0, %v3631_v9 }
 0x15d   : > { %624 = vadd.xlane.f32.xlu1 %v621_v5  ;;  %835 = vmatpush1.bf16.msra.mxu0 %v3065_v11  ;;  %v3083_v25 = vld [vmem:[%s4121_s10 + $0x94] ss:$12 sps:$4 sm:$0xff]   ;;  %v3085_v26 = vld [vmem:[%s4121_s10 + $0x90] ss:$12 sps:$4 sm:$0xff]   ;;  %v3086_v27 = vld [vmem:[%s4121_s10 + $0x98] ss:$12 sps:$4 sm:$0xff]  }
 0x15e   : > { %2818 = vmatprep.subr.bf16.mxu1 %v3631_v9  ;;  %836 = vmatprep.subr.bf16.mxu0 %v3067_v13  ;;  %v3087_v29 = vld [vmem:[%s4121_s10 + $0xac] ss:$12 sps:$4 sm:$0xff]   ;;  %v3089_v30 = vld [vmem:[%s4121_s10 + $0xa8] ss:$12 sps:$4 sm:$0xff]   ;;  %v3090_v31 = vld [vmem:[%s4121_s10 + $0xb0] ss:$12 sps:$4 sm:$0xff]  }
 0x15f   : > { %v4209_v49 = vshrl.u32 %v642_v46, 7  ;;  %v4215_v51 = vld [vmem:[%s4137_s28] sm:$0xff]  ;;  %v687_v4 = vld [vmem:[%s4143_s0] sm:$0x7]  ;;  %vm931_vm1 = vcmask 523264   ;;  %vm994_vm2 = vcmask 1043456  }
 0x160   : > { %2819 = vmatpush3.bf16.msra.mxu1 %v3070_v15  ;;  %vm978_vm3 = vcmask 64512   ;;  %vm1162_vm4 = vcmask 1048064   ;;  %s4590_s23 = sld [smem:[#allocation29_spill]]  ;;  %s2295_s8 = sshll.u32 %s4153_s25, 4  ;;  %s4434_s8 = int_to_ptr.vmem [resolvable:$true] %s2295_s8 }
 0x161   : > { %837 = vmatpush1.bf16.msra.mxu0 %v3069_v14  ;;  %2820 = vmatprep.subr.bf16.mxu1 %v3631_v9  ;;  %v4212_v50 = vsub.s32 0, %v4209_v49  ;;  %v4221_v56 = vsub.s32 1, %v4209_v49  ;;  %v699_v5 = vsub.s32 2, %v4209_v49  ;;  %s4591_s24 = sld [smem:[#allocation44_spill]]  ;;  %s2282_s2 = scalar_lea.sflag [#allocation6], %s4107_s12 }
 0x162   : > { %838 = vmatprep.subr.bf16.mxu0 %v3071_v16  ;;  %p4592_p6 = scmp.ne.s32.totalorder %s4568_s26, 0  ;;  %s3635_s11 = smov [#allocation18]  }
 0x163   : > { %v645_v55 = vrot.slane %v4215_v51, %v4212_v50  ;;  %v651_v61 = vrot.slane %v4215_v51, %v4221_v56  ;;  %v696_v6 = vrot.slane %v687_v4, %v4221_v56  ;;  %v700_v10 = vrot.slane %v687_v4, %v699_v5 }
 0x164   : > { %2821 = vmatpush3.bf16.msra.mxu1 %v3074_v18 }
 0x165   : > { %839 = vmatpush1.bf16.msra.mxu0 %v3073_v17  ;;  %2822 = vmatprep.subr.bf16.mxu1 %v3631_v9 }
 0x166   : > { %840 = vmatprep.subr.bf16.mxu0 %v3075_v19  ;;  %v692_v19 = vrot.slane %v687_v4, %v4212_v50  ;;  %s2735_s6 = sshll.u32 %s4590_s23, 8 }
 0x168   : > { %2823 = vmatpush3.bf16.msra.mxu1 %v3078_v21 }
 0x169   : > { %841 = vmatpush1.bf16.msra.mxu0 %v3077_v20  ;;  %2824 = vmatprep.subr.bf16.mxu1 %v3631_v9 }
 0x16a   : > { %842 = vmatprep.subr.bf16.mxu0 %v3079_v22 }
 0x16c   : > { %2825 = vmatpush3.bf16.msra.mxu1 %v3082_v24 }
 0x16d   : > { %843 = vmatpush1.bf16.msra.mxu0 %v3081_v23  ;;  %2826 = vmatprep.subr.bf16.mxu1 %v3631_v9 }
 0x16e   : > { %844 = vmatprep.subr.bf16.mxu0 %v3083_v25 }
 0x170   : > { %2827 = vmatpush3.bf16.msra.mxu1 %v3086_v27 }
 0x171   : > { %845 = vmatpush1.bf16.msra.mxu0 %v3085_v26  ;;  %2828 = vmatprep.subr.bf16.mxu1 %v3631_v9 }
 0x172   : > { %846 = vmatprep.subr.bf16.mxu0 %v3087_v29 }
 0x174   : > { %2829 = vmatpush3.bf16.msra.mxu1 %v3090_v31 }
 0x175   : > { %847 = vmatpush1.bf16.msra.mxu0 %v3089_v30  ;;  %2834 = vmatprep.subr.bf16.mxu1 %v3631_v9 }
 0x176   : > { %2858 = vmatprep.subr.bf16.mxu0 %v3631_v9 }
 0x1e4   : > { %v615_v32 = vpop.xlane.xlu0 %614 }
 0x1e5   : > { %v618_v33 = vmul.f32 0.0078125, %v615_v32 }
 0x1e6   : > { %v623_v34 = vpop.xlane.xlu1 %622 }
 0x1e7   : > { %v628_v35 = vmul.f32 %v618_v33, %v618_v33  ;;  %v626_v36 = vmul.f32 0.0078125, %v623_v34  ;;  %v634_v52 = vsub.f32 %v4161_v2, %v618_v33 }
 0x1e8   : > { %v617_v37 = vpop.xlane.xlu0 %616 }
 0x1e9   : > { %v630_v38 = vsub.f32 %v626_v36, %v628_v35  ;;  %v619_v39 = vmul.f32 0.0078125, %v617_v37 }
 0x1ea   : > { %v625_v40 = vpop.xlane.xlu1 %624 }
 0x1eb   : > { %v632_v41 = vmax.f32 %v630_v38, 0.0  ;;  %v629_v42 = vmul.f32 %v619_v39, %v619_v39  ;;  %v627_v43 = vmul.f32 0.0078125, %v625_v40  ;;  %v635_v57 = vsub.f32 %v4164_v3, %v619_v39 }
 0x1ed   : > { %v636_v44 = vadd.f32 1e-05, %v632_v41  ;;  %v631_v45 = vsub.f32 %v627_v43, %v629_v42 }
 0x1ef   : > { %3179 = vrsqrt.f32 %v636_v44  ;;  %v633_v47 = vmax.f32 %v631_v45, 0.0 }
 0x1f1   : > { %v637_v48 = vadd.f32 1e-05, %v633_v47 }
 0x1f3   : > { %3181 = vrsqrt.f32 %v637_v48 }
 0x1f9   : > { %v3180_v53 = vpop.eup %3179 }
 0x1fa   : > { %v640_v54 = vmul.f32 %v3180_v53, %v634_v52 }
 0x1fc   : > { %v646_v60 = vmul.f32 %v645_v55, %v640_v54 }
 0x1fd   : > { %v3182_v58 = vpop.eup %3181 }
 0x1fe   : > { %v641_v59 = vmul.f32 %v3182_v58, %v635_v57  ;;  %v652_v63 = vadd.f32 %v651_v61, %v646_v60 }
 0x200   : > { %v647_v62 = vmul.f32 %v645_v55, %v641_v59 }
 0x202   : > { %v653_v0 = vadd.f32 %v651_v61, %v647_v62 }
 0x204   : > { %v654_v1 = vpack.c.bf16 %v653_v0, %v652_v63 }
 0x206   : > { %865 = vmatmul.mubr.bf16.vlgmr.msra.gmra.mrb[0].mxu0 %v654_v1  ;;  %2831 = vmatmul.mubr.bf16.vlgmr.msra.gmra.mrb[0].mxu1 %v654_v1 }
 0x207   : > { %2836 = vmatprep.mubr.msk.bf16.mxu1 %vm3633_vm0, %v3631_v9  ;;  %2860 = vmatprep.mubr.msk.bf16.mxu0 %vm3633_vm0, %v3631_v9 }
 0x2d9   : > { %v866_v7 = vpop.f32.mrb[0].mxu0  ;;  %v909_v8 = vpop.f32.mrb[0].mxu1 }
 0x2da   : > { %v868_v11 = vpop.f32.mrb[1].mxu0  ;;  %v2832_v12 = vpop.f32.mrb[1].mxu1  ;;  %v910_v22 = vadd.f32 %v909_v8, %v700_v10  ;;  %v867_v25 = vadd.f32 %v866_v7, %v692_v19 }
 0x2db   : > { %v869_v13 = vadd.f32 %v868_v11, %v696_v6  ;;  %v870_v14 = vpop.f32.mrb[2].mxu0  ;;  %v912_v15 = vpop.f32.mrb[2].mxu1 }
 0x2dc   : > { %v4235_v16 = vadd.f32 %v912_v15, %v700_v10  ;;  %v872_v17 = vpop.f32.mrb[3].mxu0  ;;  %v2833_v18 = vpop.f32.mrb[3].mxu1  ;;  %v4241_v27 = vpack.c.bf16 %v910_v22, %v910_v22  ;;  %v871_v29 = vadd.f32 %v870_v14, %v692_v19  ;;  %v926_v30 = vpack.c.bf16 %v867_v25, %v867_v25 }
 0x2dd   : > { %v928_v20 = vpack.c.bf16 %v869_v13, %v869_v13  ;;  %v873_v21 = vadd.f32 %v872_v17, %v696_v6 }
 0x2de   : > { %v996_v31 = vsel %vm994_vm2, %v4241_v27, 0  ;;  %v1168_v32 = vpack.c.bf16 %v871_v29, %v871_v29 }
 0x2df   : > { %v936_v23 = vsel %vm931_vm1, %v928_v20, 0  ;;  %v1170_v24 = vpack.c.bf16 %v873_v21, %v873_v21 }
 0x2e0   : > { %2835 = vmatpush3.bf16.xpose.msra.mxu1 %v936_v23 }
 0x2e1   : > { %v1177_v26 = vsel %vm931_vm1, %v1170_v24, 0  ;;  %2840 = vmatprep.subr.bf16.mxu1 %v3631_v9 }
 0x2e2   : > { %2859 = vmatpush3.bf16.xpose.msra.mxu0 %v1177_v26 }
 0x2e3   : > { %2870 = vmatprep.subr.bf16.mxu0 %v3631_v9 }
 0x2e7   : > { %2837 = vmatmul.mubr.msk.bf16.vlgmr.msra.gmra.mrb[4].mxu1 %vm931_vm1, %v926_v30 }
 0x2e8   : > { %2841 = vmatpush3.bf16.msra.mxu1 %v996_v31  ;;  %2842 = vmatprep.mubr.msk.bf16.mxu1 %vm3633_vm0, %v3631_v9 }
 0x2e9   : > { %2861 = vmatmul.mubr.msk.bf16.vlgmr.msra.gmra.mrb[4].mxu0 %vm931_vm1, %v1168_v32  ;;  %2846 = vmatprep.subr.bf16.mxu1 %v3631_v9 }
 0x2ea   : > { %2872 = vmatprep.mubr.msk.bf16.mxu0 %vm3633_vm0, %v3631_v9 }
 0x3ba   : > { %v972_v33 = vpop.f32.mrb[4].mxu1 }
 0x3bb   : > { %v2838_v34 = vpop.f32.mrb[5].mxu1  ;;  %v979_v35 = vsel %vm978_vm3, %v972_v33, -inf }
 0x3bc   : > { %v1213_v36 = vpop.f32.mrb[4].mxu0  ;;  %980 = vmax.xlane.f32.xlu0 %v979_v35  ;;  %v975_v37 = vpop.f32.mrb[6].mxu1  ;;  %v1172_v34 = vpack.c.bf16 %v4235_v16, %v4235_v16 }
 0x3bd   : > { %v2839_v38 = vpop.f32.mrb[7].mxu1  ;;  %v2862_v39 = vpop.f32.mrb[5].mxu0  ;;  %v1219_v47 = vsel %vm978_vm3, %v1213_v36, -inf }
 0x3be   : > { %v1216_v40 = vpop.f32.mrb[6].mxu0 }
 0x3bf   : > { %v2863_v41 = vpop.f32.mrb[7].mxu0 }
 0x3d2   : > { %1049 = vrot.lane.b32.xlu0 %v928_v20, %s3634_s19 }
 0x449   : > { %v981_v42 = vpop.xlane.xlu0 %980 }
 0x44a   : > { %v982_v43 = vsub.f32 %v972_v33, %v981_v42 }
 0x44c   : > { %v983_v44 = vmul.f32 1.442695, %v982_v43  ;;  %v1235_v43 = vsel %vm994_vm2, %v1172_v34, 0 }
 0x44d   : > { %v1050_v58 = vpop.permute.xlu0 %1049 }
 0x44e   : > { %3183 = vpow2.f32 %v983_v44  ;;  %v1055_v60 = vsel %vm931_vm1, %v1050_v58, 0  ;;  %v3095_v58 = vld [vmem:[%s4127_s27 + $0x20] sm:$0xff]  }
 0x458   : > { %v3184_v45 = vpop.eup %3183 }
 0x459   : > { %v985_v46 = vsel %vm978_vm3, %v3184_v45, 0.0 }
 0x45a   : > { %986 = vadd.xlane.f32.xlu1 %v985_v46 }
 0x46b   : > { %1046 = vrot.lane.b32.xlu1 %v926_v30, %s3634_s19 }
 0x46f   : > { %1289 = vrot.lane.b32.xlu1 %v1170_v24, %s3634_s19 }
 0x473   : > { %1286 = vrot.lane.b32.xlu1 %v1168_v32, %s3634_s19 }
 0x497   : > { %1220 = vmax.xlane.f32.xlu1 %v1219_v47 }
 0x4e7   : > { %v987_v48 = vpop.xlane.xlu1 %986 }
 0x4e8   : > { %3185 = vrcp.f32 %v987_v48 }
 0x4eb   : > { %v1047_v52 = vpop.permute.xlu1 %1046 }
 0x4ef   : > { %v1290_v53 = vpop.permute.xlu1 %1289 }
 0x4f0   : > { %v1295_v54 = vsel %vm931_vm1, %v1290_v53, 0  ;;  %v3091_v53 = vld [vmem:[%s4127_s27] sm:$0xff]  }
 0x4f1   : > { %2871 = vmatpush3.bf16.xpose.msra.mxu0 %v1295_v54  ;;  %v3092_v54 = vld [vmem:[%s4127_s27 + $0x8] sm:$0xff]  }
 0x4f2   : > { %v3186_v55 = vpop.eup %3185  ;;  %2882 = vmatprep.subr.bf16.mxu0 %v3631_v9 }
 0x4f3   : > { %v989_v57 = vmul.f32 %v3186_v55, %v3184_v45  ;;  %v1287_v61 = vpop.permute.xlu1 %1286  ;;  %v3093_v55 = vld [vmem:[%s4127_s27 + $0x10] sm:$0xff]  }
 0x4f5   : > { %v990_v59 = vpack.c.bf16 %v989_v57, %v989_v57  ;;  %v3094_v57 = vld [vmem:[%s4127_s27 + $0x18] sm:$0xff]  }
 0x4f7   : > { %2843 = vmatmul.mubr.msk.bf16.vlgmr.msra.gmra.mrb[8].mxu1 %vm978_vm3, %v990_v59  ;;  %v3096_v59 = vld [vmem:[%s4127_s27 + $0x28] sm:$0xff]  }
 0x4f8   : > { %2847 = vmatpush3.bf16.xpose.msra.mxu1 %v1055_v60  ;;  %2873 = vmatmul.mubr.msk.bf16.vlgmr.msra.gmra.mrb[8].mxu0 %vm931_vm1, %v1287_v61 }
 0x4f9   : > { %2848 = vmatprep.mubr.msk.bf16.mxu1 %vm3633_vm0, %v3631_v9  ;;  %2852 = vmatprep.subr.bf16.mxu1 %v3631_v9 }
 0x4fa   : > { %2898 = vmatprep.mubr.msk.bf16.mxu0 %vm3633_vm0, %v3631_v9  ;;  %2883 = vmatpush3.bf16.msra.mxu0 %v3091_v53  ;;  %v3137_v53 = vld [vmem:[%s4129_s1 + $0xc4] ss:$16 sps:$4 sm:$0xff]  }
 0x4fb   : > { %2884 = vmatprep.subr.bf16.mxu0 %v3631_v9 }
 0x4fe   : > { %2885 = vmatpush3.bf16.msra.mxu0 %v3092_v54  ;;  %v3140_v54 = vld [vmem:[%s4129_s1 + $0xcc] ss:$16 sps:$4 sm:$0xff]  }
 0x4ff   : > { %2849 = vmatmul.mubr.msk.bf16.vlgmr.msra.gmra.mrb[12].mxu1 %vm931_vm1, %v1047_v52  ;;  %2886 = vmatprep.subr.bf16.mxu0 %v3631_v9 }
 0x500   : > { %2854 = vmatprep.mubr.msk.bf16.mxu1 %vm3633_vm0, %v3631_v9 }
 0x502   : > { %2887 = vmatpush3.bf16.msra.mxu0 %v3093_v55  ;;  %v3135_v55 = vld [vmem:[%s4129_s1 + $0xc0] ss:$16 sps:$4 sm:$0xff]  }
 0x503   : > { %2888 = vmatprep.subr.bf16.mxu0 %v3631_v9 }
 0x506   : > { %2889 = vmatpush3.bf16.msra.mxu0 %v3094_v57  ;;  %v3138_v57 = vld [vmem:[%s4129_s1 + $0xc8] ss:$16 sps:$4 sm:$0xff]  }
 0x507   : > { %2890 = vmatprep.subr.bf16.mxu0 %v3631_v9 }
 0x50a   : > { %2891 = vmatpush3.bf16.msra.mxu0 %v3095_v58  ;;  %v3143_v58 = vld [vmem:[%s4129_s1 + $0xe4] ss:$16 sps:$4 sm:$0xff]  }
 0x50b   : > { %2892 = vmatprep.subr.bf16.mxu0 %v3631_v9 }
 0x50e   : > { %2893 = vmatpush3.bf16.msra.mxu0 %v3096_v59  ;;  %v3146_v59 = vld [vmem:[%s4129_s1 + $0xec] ss:$16 sps:$4 sm:$0xff]  }
 0x50f   : > { %2894 = vmatprep.subr.bf16.mxu0 %v3631_v9 }
 0x524   : > { %v1221_v62 = vpop.xlane.xlu1 %1220 }
 0x525   : > { %v1222_v63 = vsub.f32 %v1213_v36, %v1221_v62 }
 0x527   : > { %v1223_v0 = vmul.f32 1.442695, %v1222_v63 }
 0x529   : > { %3187 = vpow2.f32 %v1223_v0  ;;  %v3097_v0 = vld [vmem:[%s4127_s27 + $0x30] sm:$0xff]  }
 0x52a   : > { %2895 = vmatpush3.bf16.msra.mxu0 %v3097_v0 }
 0x52b   : > { %2896 = vmatprep.subr.bf16.mxu0 %v3631_v9 }
 0x533   : > { %v3188_v20 = vpop.eup %3187 }
 0x534   : > { %v1225_v21 = vsel %vm978_vm3, %v3188_v20, 0.0 }
 0x5ca   : > { %v1032_v1 = vpop.f32.mrb[8].mxu1 }
 0x5cb   : > { %1038 = vst.msk [vmem:[#allocation3] sm:$0xff] %vm931_vm1, %v1032_v1  ;;  %v2844_v4 = vpop.f32.mrb[9].mxu1  ;;  %v1331_v6 = vpop.f32.mrb[8].mxu0  ;;  %v3098_v1 = vld [vmem:[%s4127_s27 + $0x38] sm:$0xff]   ;;  %s4432_s27 = scalar_lea.hbm %s4591_s24, %s2735_s6 }
 0x5cc   : > { %v1035_v7 = vpop.f32.mrb[10].mxu1  ;;  %v2874_v8 = vpop.f32.mrb[9].mxu0  ;;  %v1337_v19 = vsel %vm978_vm3, %v1331_v6, -inf  ;;  %2897 = vmatpush3.bf16.msra.mxu0 %v3098_v1 }
 0x5cd   : > { %v2845_v10 = vpop.f32.mrb[11].mxu1  ;;  %v1334_v11 = vpop.f32.mrb[10].mxu0 }
 0x5ce   : > { %v2875_v12 = vpop.f32.mrb[11].mxu0 }
 0x5d2   : > { %v1091_v13 = vpop.f32.mrb[12].mxu1 }
 0x5d3   : > { %v2850_v14 = vpop.f32.mrb[13].mxu1  ;;  %v1097_v15 = vsel %vm978_vm3, %v1091_v13, -inf }
 0x5d4   : > { %1098 = vmax.xlane.f32.xlu0 %v1097_v15  ;;  %v1094_v17 = vpop.f32.mrb[14].mxu1 }
 0x5d5   : > { %v2851_v18 = vpop.f32.mrb[15].mxu1 }
 0x5d8   : > { %1338 = vmax.xlane.f32.xlu0 %v1337_v19  ;;  %v1516_v19 = vrot.slane %v4215_v51, %v699_v5 }
 0x5dc   : > { %1226 = vadd.xlane.f32.xlu0 %v1225_v21 }
 0x661   : > { %v1099_v22 = vpop.xlane.xlu0 %1098 }
 0x662   : > { %v1100_v23 = vsub.f32 %v1091_v13, %v1099_v22 }
 0x664   : > { %v1101_v24 = vmul.f32 1.442695, %v1100_v23 }
 0x665   : > { %v1339_v25 = vpop.xlane.xlu0 %1338 }
 0x666   : > { %3189 = vpow2.f32 %v1101_v24  ;;  %v1340_v26 = vsub.f32 %v1331_v6, %v1339_v25 }
 0x668   : > { %v1341_v29 = vmul.f32 1.442695, %v1340_v26 }
 0x669   : > { %v1227_v35 = vpop.xlane.xlu0 %1226 }
 0x66a   : > { %3191 = vpow2.f32 %v1341_v29  ;;  %v3104_v29 = vld [vmem:[%s4129_s1 + $0xc] ss:$16 sps:$4 sm:$0xff]  }
 0x66b   : > { %1887 = vmatprep.subr.bf16.mxu0 %v3104_v29 }
 0x670   : > { %v3190_v30 = vpop.eup %3189 }
 0x671   : > { %v1103_v31 = vsel %vm978_vm3, %v3190_v30, 0.0 }
 0x672   : > { %1104 = vadd.xlane.f32.xlu0 %v1103_v31  ;;  %v3102_v31 = vld [vmem:[%s4129_s1 + $0x8] ss:$16 sps:$4 sm:$0xff]  }
 0x674   : > { %v3192_v32 = vpop.eup %3191 }
 0x675   : > { %v1343_v33 = vsel %vm978_vm3, %v3192_v32, 0.0 }
 0x676   : > { %1344 = vadd.xlane.f32.xlu1 %v1343_v33  ;;  %v3110_v33 = vld [vmem:[%s4129_s1 + $0x2c] ss:$16 sps:$4 sm:$0xff]  }
 0x687   : > { %1350 = vrot.lane.b32.xlu1 %v1172_v34, %s3634_s19  ;;  %v3105_v34 = vld [vmem:[%s4129_s1 + $0x20] ss:$16 sps:$4 sm:$0xff]  }
 0x688   : > { %1110 = vrot.lane.b32.xlu0 %v4241_v27, %s3634_s19 }
 0x6ff   : > { %v1105_v36 = vpop.xlane.xlu0 %1104 }
 0x700   : > { %3193 = vrcp.f32 %v1105_v36  ;;  %v3113_v36 = vld [vmem:[%s4129_s1 + $0x44] ss:$16 sps:$4 sm:$0xff]  }
 0x701   : > { %3195 = vrcp.f32 %v1227_v35  ;;  %v3108_v35 = vld [vmem:[%s4129_s1 + $0x28] ss:$16 sps:$4 sm:$0xff]  }
 0x703   : > { %v1111_v37 = vpop.permute.xlu0 %1110  ;;  %v1345_v39 = vpop.xlane.xlu1 %1344 }
 0x704   : > { %v1116_v38 = vsel %vm994_vm2, %v1111_v37, 0  ;;  %3197 = vrcp.f32 %v1345_v39  ;;  %v3116_v37 = vld [vmem:[%s4129_s1 + $0x4c] ss:$16 sps:$4 sm:$0xff]   ;;  %v3114_v39 = vld [vmem:[%s4129_s1 + $0x48] ss:$16 sps:$4 sm:$0xff]  }
 0x705   : > { %2853 = vmatpush3.bf16.msra.mxu1 %v1116_v38  ;;  %v3111_v38 = vld [vmem:[%s4129_s1 + $0x40] ss:$16 sps:$4 sm:$0xff]  }
 0x706   : > { %2864 = vmatprep.subr.bf16.mxu1 %v3631_v9 }
 0x707   : > { %v1351_v44 = vpop.permute.xlu1 %1350 }
 0x708   : > { %v1356_v47 = vsel %vm994_vm2, %v1351_v44, 0  ;;  %v3126_v44 = vld [vmem:[%s4129_s1 + $0x88] ss:$16 sps:$4 sm:$0xff]  }
 0x70a   : > { %v3194_v40 = vpop.eup %3193 }
 0x70b   : > { %v1107_v41 = vmul.f32 %v3194_v40, %v3190_v30  ;;  %v3196_v42 = vpop.eup %3195  ;;  %v3099_v30 = vld [vmem:[%s4129_s1] ss:$16 sps:$4 sm:$0xff]   ;;  %v3119_v40 = vld [vmem:[%s4129_s1 + $0x64] ss:$16 sps:$4 sm:$0xff]  }
 0x70c   : > { %v1229_v27 = vmul.f32 %v3196_v42, %v3188_v20  ;;  %v3120_v42 = vld [vmem:[%s4129_s1 + $0x68] ss:$16 sps:$4 sm:$0xff]  }
 0x70d   : > { %v1108_v16 = vpack.c.bf16 %v1107_v41, %v1107_v41  ;;  %v3122_v41 = vld [vmem:[%s4129_s1 + $0x6c] ss:$16 sps:$4 sm:$0xff]  }
 0x70e   : > { %v1230_v45 = vpack.c.bf16 %v1229_v27, %v1229_v27  ;;  %v3198_v46 = vpop.eup %3197  ;;  %v3123_v27 = vld [vmem:[%s4129_s1 + $0x80] ss:$16 sps:$4 sm:$0xff]  }
 0x70f   : > { %2855 = vmatmul.mubr.msk.bf16.vlgmr.msra.gmra.mrb[16].mxu1 %vm978_vm3, %v1108_v16  ;;  %v1347_v48 = vmul.f32 %v3198_v46, %v3192_v32  ;;  %v3107_v32 = vld [vmem:[%s4129_s1 + $0x24] ss:$16 sps:$4 sm:$0xff]   ;;  %v3117_v16 = vld [vmem:[%s4129_s1 + $0x60] ss:$16 sps:$4 sm:$0xff]  }
 0x710   : > { %2865 = vmatpush3.bf16.msra.mxu1 %v1235_v43  ;;  %2866 = vmatprep.mubr.msk.bf16.mxu1 %vm3633_vm0, %v3631_v9  ;;  %v3125_v43 = vld [vmem:[%s4129_s1 + $0x84] ss:$16 sps:$4 sm:$0xff]  }
 0x711   : > { %2876 = vmatprep.subr.bf16.mxu1 %v3631_v9  ;;  %v1348_v52 = vpack.c.bf16 %v1347_v48, %v1347_v48  ;;  %v3131_v46 = vld [vmem:[%s4129_s1 + $0xa4] ss:$16 sps:$4 sm:$0xff]   ;;  %v3129_v48 = vld [vmem:[%s4129_s1 + $0xa0] ss:$16 sps:$4 sm:$0xff]  }
 0x717   : > { %2867 = vmatmul.mubr.msk.bf16.vlgmr.msra.gmra.mrb[20].mxu1 %vm978_vm3, %v1230_v45  ;;  %v3128_v45 = vld [vmem:[%s4129_s1 + $0x8c] ss:$16 sps:$4 sm:$0xff]  }
 0x718   : > { %2877 = vmatpush3.bf16.msra.mxu1 %v1356_v47  ;;  %2878 = vmatprep.mubr.msk.bf16.mxu1 %vm3633_vm0, %v3631_v9  ;;  %v3134_v47 = vld [vmem:[%s4129_s1 + $0xac] ss:$16 sps:$4 sm:$0xff]  }
 0x71f   : > { %2879 = vmatmul.mubr.msk.bf16.vlgmr.msra.gmra.mrb[24].mxu1 %vm978_vm3, %v1348_v52  ;;  %v3132_v52 = vld [vmem:[%s4129_s1 + $0xa8] ss:$16 sps:$4 sm:$0xff]  }
 0x720   : > { %1700 = vmatprep.mubr.bf16.mxu1 %v3632_v28 }
 0x7e2   : > { %v1152_v60 = vpop.f32.mrb[16].mxu1 }
 0x7e3   : > { %1159 = vrot.lane.b32.xlu1 %v1152_v60, %s3634_s19  ;;  %v2856_v61 = vpop.f32.mrb[17].mxu1  ;;  %v3141_v60 = vld [vmem:[%s4129_s1 + $0xe0] ss:$16 sps:$4 sm:$0xff]  }
 0x7e4   : > { %v1155_v62 = vpop.f32.mrb[18].mxu1  ;;  %v3144_v61 = vld [vmem:[%s4129_s1 + $0xe8] ss:$16 sps:$4 sm:$0xff]  }
 0x7e5   : > { %v2857_v63 = vpop.f32.mrb[19].mxu1 }
 0x7ea   : > { %v1271_v4 = vpop.f32.mrb[20].mxu1 }
 0x7eb   : > { %1278 = vst.msk [vmem:[#allocation3 + $0x8] sm:$0xff] %vm931_vm1, %v1271_v4  ;;  %v2868_v6 = vpop.f32.mrb[21].mxu1 }
 0x7ec   : > { %v1274_v7 = vpop.f32.mrb[22].mxu1 }
 0x7ed   : > { %v2869_v8 = vpop.f32.mrb[23].mxu1 }
 0x7f2   : > { %v1392_v10 = vpop.f32.mrb[24].mxu1 }
 0x7f3   : > { %1399 = vrot.lane.b32.xlu1 %v1392_v10, %s3634_s19  ;;  %v2880_v11 = vpop.f32.mrb[25].mxu1 }
 0x7f4   : > { %v1395_v12 = vpop.f32.mrb[26].mxu1 }
 0x7f5   : > { %v2881_v13 = vpop.f32.mrb[27].mxu1 }
 0x855   : > { %v1160_v14 = vpop.permute.xlu1 %1159 }
 0x856   : > { %1163 = vst.msk [vmem:[#allocation3] sm:$0xff] %vm1162_vm4, %v1160_v14 }
 0x85d   : > { %v1403_v17 = vld [vmem:[#allocation3] sm:$0xff] }
 0x865   : > { %v1400_v15 = vpop.permute.xlu1 %1399 }
 0x866   : > { %1402 = vst.msk [vmem:[#allocation3 + $0x8] sm:$0xff] %vm1162_vm4, %v1400_v15 }
 0x86d   : > { %v1404_v9 = vld [vmem:[#allocation3 + $0x8] sm:$0xff] }
 0x86e   : > { %v1405_v18 = vpack.c.bf16 %v1404_v9, %v1403_v17 }
 0x870   : > { %2899 = vmatmul.mubr.bf16.vlgmr.msra.gmra.mrb[12].mxu0 %v1405_v18  ;;  %v1549_v18 = vsub.s32 3, %v4209_v49 }
 0x871   : > { %1919 = vmatprep.mubr.bf16.mxu0 %v3632_v28  ;;  %1888 = vmatpush1.bf16.msra.mxu0 %v3102_v31 }
 0x872   : > { %1889 = vmatprep.subr.bf16.mxu0 %v3110_v33  ;;  %v3147_v33 = vld [vmem:[%s4135_s18 + $0xc0] sm:$0xff]  }
 0x875   : > { %1890 = vmatpush1.bf16.msra.mxu0 %v3108_v35  ;;  %v3149_v35 = vld [vmem:[%s4135_s18 + $0x80] sm:$0xff]  }
 0x876   : > { %1891 = vmatprep.subr.bf16.mxu0 %v3116_v37  ;;  %v3151_v37 = vld [vmem:[%s4135_s18 + $0xc8] sm:$0xff]  }
 0x879   : > { %1892 = vmatpush1.bf16.msra.mxu0 %v3114_v39  ;;  %v3153_v39 = vld [vmem:[%s4135_s18 + $0x88] sm:$0xff]  }
 0x87a   : > { %1893 = vmatprep.subr.bf16.mxu0 %v3122_v41  ;;  %v3155_v41 = vld [vmem:[%s4135_s18 + $0xd0] sm:$0xff]  }
 0x87d   : > { %1894 = vmatpush1.bf16.msra.mxu0 %v3120_v42  ;;  %v3157_v42 = vld [vmem:[%s4135_s18 + $0x90] sm:$0xff]  }
 0x87e   : > { %1895 = vmatprep.subr.bf16.mxu0 %v3128_v45  ;;  %v3161_v45 = vld [vmem:[%s4135_s18 + $0x98] sm:$0xff]  }
 0x881   : > { %1896 = vmatpush1.bf16.msra.mxu0 %v3126_v44  ;;  %v3160_v44 = vld [vmem:[%s4135_s18 + $0x58] sm:$0xff]  }
 0x882   : > { %1897 = vmatprep.subr.bf16.mxu0 %v3134_v47  ;;  %v3163_v47 = vld [vmem:[%s4135_s18 + $0xe0] sm:$0xff]  }
 0x885   : > { %1898 = vmatpush1.bf16.msra.mxu0 %v3132_v52  ;;  %v3165_v52 = vld [vmem:[%s4135_s18 + $0xa0] sm:$0xff]  }
 0x886   : > { %1899 = vmatprep.subr.bf16.mxu0 %v3140_v54  ;;  %v3167_v54 = vld [vmem:[%s4135_s18 + $0xe8] sm:$0xff]  }
 0x889   : > { %1900 = vmatpush1.bf16.msra.mxu0 %v3138_v57  ;;  %v3169_v57 = vld [vmem:[%s4135_s18 + $0xa8] sm:$0xff]  }
 0x88a   : > { %1901 = vmatprep.subr.bf16.mxu0 %v3146_v59  ;;  %v3171_v59 = vld [vmem:[%s4135_s18 + $0xf0] sm:$0xff]  }
 0x88d   : > { %1902 = vmatpush1.bf16.msra.mxu0 %v3144_v61  ;;  %v3173_v61 = vld [vmem:[%s4135_s18 + $0xb0] sm:$0xff]  }
 0x943   : > { %v1504_v20 = vpop.f32.mrb[12].mxu0 }
 0x944   : > { %v1511_v21 = vadd.f32 %v1504_v20, %v4161_v2  ;;  %v2900_v22 = vpop.f32.mrb[13].mxu0 }
 0x945   : > { %v1507_v23 = vpop.f32.mrb[14].mxu0  ;;  %v1550_v22 = vrot.slane %v4215_v51, %v1549_v18 }
 0x946   : > { %v4320_v24 = vadd.f32 %v1516_v19, %v1511_v21  ;;  %v1512_v25 = vadd.f32 %v1507_v23, %v4164_v3  ;;  %v2901_v26 = vpop.f32.mrb[15].mxu0  ;;  %v3101_v3 = vld [vmem:[%s4129_s1 + $0x4] ss:$16 sps:$4 sm:$0xff]   ;;  %v1555_v23 = vsub.s32 4, %v4209_v49  ;;  %s3475_s1 = scalar_lea.vmem %s4434_s8, 256 }
 0x947   : > { %1668 = vmatprep.subr.bf16.mxu1 %v3101_v3  ;;  %p3476_p5 = scmp.ne.s32.totalorder %s4434_s8, %s3475_s1 }
 0x948   : > { %v4323_v28 = vadd.f32 %v1516_v19, %v1512_v25  ;;  %1519 = vadd.xlane.f32.xlu0 %v4320_v24  ;;  %v1525_v2 = vmul.f32 %v4320_v24, %v4320_v24  ;;  %1669 = vmatpush1.bf16.msra.mxu1 %v3099_v30  ;;  %v1556_v3 = vrot.slane %v4215_v51, %v1555_v23 }
 0x949   : > { %1670 = vmatprep.subr.bf16.mxu1 %v3107_v32  ;;  %p3477_p9 = pnand %p3476_p5, %p4592_p6 }
 0x94a   : > { %1521 = vadd.xlane.f32.xlu1 %v4323_v28  ;;  %v1526_v5 = vmul.f32 %v4323_v28, %v4323_v28 }
 0x94b   : > { %p3478_p8 = pneg %p3477_p9 }
 0x94c   : > { %1527 = vadd.xlane.f32.xlu0 %v1525_v2  ;;  %1671 = vmatpush1.bf16.msra.mxu1 %v3105_v34  ;;  %v3148_v34 = vld [vmem:[%s4135_s18 + $0x40] sm:$0xff]  }
 0x94d   : > { %1672 = vmatprep.subr.bf16.mxu1 %v3113_v36  ;;  %v3150_v36 = vld [vmem:[%s4135_s18] sm:$0xff]   ;;  %2792 = vmatprep.subr.bf16.mxu0 %v3148_v34 }
 0x950   : > { %1529 = vadd.xlane.f32.xlu0 %v1526_v5  ;;  %1673 = vmatpush1.bf16.msra.mxu1 %v3111_v38  ;;  %v3152_v38 = vld [vmem:[%s4135_s18 + $0x48] sm:$0xff]  }
 0x951   : > { %1674 = vmatprep.subr.bf16.mxu1 %v3119_v40  ;;  %v3154_v40 = vld [vmem:[%s4135_s18 + $0x8] sm:$0xff]  }
 0x954   : > { %1675 = vmatpush1.bf16.msra.mxu1 %v3117_v16  ;;  %v3156_v16 = vld [vmem:[%s4135_s18 + $0x50] sm:$0xff]  }
 0x955   : > { %1676 = vmatprep.subr.bf16.mxu1 %v3125_v43  ;;  %v3158_v43 = vld [vmem:[%s4135_s18 + $0x10] sm:$0xff]  }
 0x958   : > { %1677 = vmatpush1.bf16.msra.mxu1 %v3123_v27  ;;  %v3159_v27 = vld [vmem:[%s4135_s18 + $0xd8] sm:$0xff]  }
 0x959   : > { %1678 = vmatprep.subr.bf16.mxu1 %v3131_v46  ;;  %v3162_v46 = vld [vmem:[%s4135_s18 + $0x18] sm:$0xff]  }
 0x95c   : > { %1679 = vmatpush1.bf16.msra.mxu1 %v3129_v48  ;;  %v3164_v48 = vld [vmem:[%s4135_s18 + $0x60] sm:$0xff]  }
 0x95d   : > { %1680 = vmatprep.subr.bf16.mxu1 %v3137_v53  ;;  %v3166_v53 = vld [vmem:[%s4135_s18 + $0x20] sm:$0xff]  }
 0x960   : > { %1681 = vmatpush1.bf16.msra.mxu1 %v3135_v55  ;;  %v3168_v55 = vld [vmem:[%s4135_s18 + $0x68] sm:$0xff]  }
 0x961   : > { %1682 = vmatprep.subr.bf16.mxu1 %v3143_v58  ;;  %v3170_v58 = vld [vmem:[%s4135_s18 + $0x28] sm:$0xff]  }
 0x964   : > { %1683 = vmatpush1.bf16.msra.mxu1 %v3141_v60  ;;  %v3172_v60 = vld [vmem:[%s4135_s18 + $0x70] sm:$0xff]  }
 0x965   : > { %2770 = vmatprep.subr.bf16.mxu1 %v3147_v33 }
 0x9d5   : > { %v1520_v62 = vpop.xlane.xlu0 %1519 }
 0x9d6   : > { %v1523_v63 = vmul.f32 0.0078125, %v1520_v62  ;;  %v3174_v62 = vld [vmem:[%s4135_s18 + $0x30] sm:$0xff]  }
 0x9d7   : > { %v1522_v0 = vpop.xlane.xlu1 %1521 }
 0x9d8   : > { %v1533_v4 = vmul.f32 %v1523_v63, %v1523_v63  ;;  %v1524_v6 = vmul.f32 0.0078125, %v1522_v0  ;;  %v1539_v19 = vsub.f32 %v4320_v24, %v1523_v63  ;;  %v3175_v63 = vld [vmem:[%s4135_s18 + $0xf8] sm:$0xff]  }
 0x9d9   : > { %v1528_v1 = vpop.xlane.xlu0 %1527  ;;  %v3176_v0 = vld [vmem:[%s4135_s18 + $0x78] sm:$0xff]  }
 0x9da   : > { %v1531_v7 = vmul.f32 0.0078125, %v1528_v1  ;;  %v1534_v11 = vmul.f32 %v1524_v6, %v1524_v6  ;;  %v1540_v25 = vsub.f32 %v4323_v28, %v1524_v6  ;;  %v3177_v1 = vld [vmem:[%s4135_s18 + $0xb8] sm:$0xff]  }
 0x9db   : > { %v1576_v6 = vld [vmem:[%s4145_s5] sm:$0x3] }
 0x9dc   : > { %v1535_v8 = vsub.f32 %v1531_v7, %v1533_v4  ;;  %v3178_v4 = vld [vmem:[%s4135_s18 + $0x38] sm:$0xff]   ;;  %s3479_s18 = sshll.u32 %s3635_s11, 4  ;;  %s3480_s18 = int_to_ptr.vmem [resolvable:$false] %s3479_s18 }
 0x9dd   : > { %v1530_v10 = vpop.xlane.xlu0 %1529  ;;  %v2640_v7 = vld [vmem:[%s4145_s5 + $0x2] sm:$0x3]  ;;  %s3481_s22 = scalar_lea.vmem %s3480_s18, 512  ;;  %p3482_p13 = scmp.lt.s32.totalorder %s4434_s8, %s3480_s18 }
 0x9de   : > { %v1537_v12 = vmax.f32 %v1535_v8, 0.0  ;;  %v1532_v13 = vmul.f32 0.0078125, %v1530_v10  ;;  %v1581_v8 = vrot.slane %v1576_v6, %v4212_v50  ;;  %v1800_v10 = vrot.slane %v2640_v7, %v4212_v50  ;;  %p3483_p0 = scmp.lt.s32.totalorder %s3481_s22, %s3475_s1 }
 0x9e0   : > { %v1541_v14 = vadd.f32 1e-05, %v1537_v12  ;;  %v1536_v15 = vsub.f32 %v1532_v13, %v1534_v11  ;;  %v1585_v11 = vrot.slane %v1576_v6, %v4221_v56  ;;  %v1804_v12 = vrot.slane %v2640_v7, %v4221_v56  ;;  %p3484_p4 = por %p3483_p0, %p3482_p13 }
 0x9e2   : > { %3199 = vrsqrt.f32 %v1541_v14  ;;  %v1538_v17 = vmax.f32 %v1536_v15, 0.0  ;;  %p3485_p2 = pnand %p3484_p4, %p3478_p8 }
 0x9e4   : > { %v1542_v9 = vadd.f32 1e-05, %v1538_v17 }
 0x9e6   : > { %3201 = vrsqrt.f32 %v1542_v9 }
 0x9ec   : > { %v3200_v20 = vpop.eup %3199 }
 0x9ed   : > { %v1545_v21 = vmul.f32 %v3200_v20, %v1539_v19 }
 0x9ef   : > { %v1551_v5 = vmul.f32 %v1550_v22, %v1545_v21 }
 0x9f0   : > { %v3202_v26 = vpop.eup %3201 }
 0x9f1   : > { %v1546_v2 = vmul.f32 %v3202_v26, %v1540_v25  ;;  %v1557_v30 = vadd.f32 %v1556_v3, %v1551_v5 }
 0x9f3   : > { %v1552_v29 = vmul.f32 %v1550_v22, %v1546_v2 }
 0x9f5   : > { %v1558_v31 = vadd.f32 %v1556_v3, %v1552_v29 }
 0x9f7   : > { %v1559_v32 = vpack.c.bf16 %v1558_v31, %v1557_v30 }
 0x9f9   : > { %1701 = vmatmul.mubr.bf16.vlgmr.msra.gmra.mrb[28].mxu1 %v1559_v32  ;;  %1920 = vmatmul.mubr.bf16.vlgmr.msra.gmra.mrb[16].mxu0 %v1559_v32 }
 0x9fa   : > { %2771 = vmatpush3.bf16.msra.mxu1 %v3149_v35  ;;  %2793 = vmatpush3.bf16.msra.mxu0 %v3150_v36 }
 0x9fb   : > { %2772 = vmatprep.subr.bf16.mxu1 %v3151_v37  ;;  %2794 = vmatprep.subr.bf16.mxu0 %v3152_v38 }
 0x9fe   : > { %2773 = vmatpush3.bf16.msra.mxu1 %v3153_v39  ;;  %2795 = vmatpush3.bf16.msra.mxu0 %v3154_v40 }
 0x9ff   : > { %2774 = vmatprep.subr.bf16.mxu1 %v3155_v41  ;;  %2796 = vmatprep.subr.bf16.mxu0 %v3156_v16 }
 0xa02   : > { %2775 = vmatpush3.bf16.msra.mxu1 %v3157_v42  ;;  %2797 = vmatpush3.bf16.msra.mxu0 %v3158_v43 }
 0xa03   : > { %2776 = vmatprep.subr.bf16.mxu1 %v3159_v27  ;;  %2798 = vmatprep.subr.bf16.mxu0 %v3160_v44 }
 0xa06   : > { %2777 = vmatpush3.bf16.msra.mxu1 %v3161_v45  ;;  %2799 = vmatpush3.bf16.msra.mxu0 %v3162_v46 }
 0xa07   : > { %2778 = vmatprep.subr.bf16.mxu1 %v3163_v47  ;;  %2800 = vmatprep.subr.bf16.mxu0 %v3164_v48 }
 0xa0a   : > { %2779 = vmatpush3.bf16.msra.mxu1 %v3165_v52  ;;  %2801 = vmatpush3.bf16.msra.mxu0 %v3166_v53 }
 0xa0b   : > { %2780 = vmatprep.subr.bf16.mxu1 %v3167_v54  ;;  %2802 = vmatprep.subr.bf16.mxu0 %v3168_v55 }
 0xa0e   : > { %2781 = vmatpush3.bf16.msra.mxu1 %v3169_v57  ;;  %2803 = vmatpush3.bf16.msra.mxu0 %v3170_v58 }
 0xa0f   : > { %2782 = vmatprep.subr.bf16.mxu1 %v3171_v59  ;;  %2804 = vmatprep.subr.bf16.mxu0 %v3172_v60 }
 0xa12   : > { %2783 = vmatpush3.bf16.msra.mxu1 %v3173_v61  ;;  %2805 = vmatpush3.bf16.msra.mxu0 %v3174_v62 }
 0xa13   : > { %2784 = vmatprep.subr.bf16.mxu1 %v3175_v63  ;;  %2806 = vmatprep.subr.bf16.mxu0 %v3176_v0 }
 0xa16   : > { %2785 = vmatpush3.bf16.msra.mxu1 %v3177_v1  ;;  %2807 = vmatpush3.bf16.msra.mxu0 %v3178_v4 }
 0xacc   : > { %v1702_v13 = vpop.f32.mrb[28].mxu1  ;;  %v1921_v14 = vpop.f32.mrb[16].mxu0 }
 0xacd   : > { %v4407_v15 = vadd.f32 %v1702_v13, %v1581_v8  ;;  %v4409_v17 = vadd.f32 %v1921_v14, %v1800_v10  ;;  %v1704_v9 = vpop.f32.mrb[29].mxu1  ;;  %v1923_v18 = vpop.f32.mrb[17].mxu0 }
 0xace   : > { %v4411_v19 = vadd.f32 %v1704_v9, %v1585_v11  ;;  %v4413_v20 = vadd.f32 %v1923_v18, %v1804_v12  ;;  %v1706_v21 = vpop.f32.mrb[30].mxu1  ;;  %v1925_v22 = vpop.f32.mrb[18].mxu0 }
 0xacf   : > { %v2620_v50 = vmul.f32 -1.702, %v4407_v15  ;;  %v2657_v23 = vmul.f32 -1.702, %v4409_v17  ;;  %v1707_v25 = vadd.f32 %v1706_v21, %v1581_v8  ;;  %v1926_v56 = vadd.f32 %v1925_v22, %v1800_v10  ;;  %v1708_v26 = vpop.f32.mrb[31].mxu1  ;;  %v1927_v2 = vpop.f32.mrb[19].mxu0 }
 0xad0   : > { %v2621_v5 = vmul.f32 -1.702, %v4411_v19  ;;  %v2658_v3 = vmul.f32 -1.702, %v4413_v20  ;;  %v1709_v29 = vadd.f32 %v1708_v26, %v1585_v11  ;;  %v1928_v30 = vadd.f32 %v1927_v2, %v1804_v12 }
 0xad1   : > { %v1719_v31 = vmul.f32 1.442695, %v2620_v50  ;;  %v1938_v32 = vmul.f32 1.442695, %v2657_v23  ;;  %v2622_v33 = vmul.f32 -1.702, %v1707_v25 }
 0xad2   : > { %v1721_v34 = vmul.f32 1.442695, %v2621_v5  ;;  %v1940_v35 = vmul.f32 1.442695, %v2658_v3  ;;  %v2659_v36 = vmul.f32 -1.702, %v1926_v56 }
 0xad3   : > { %3203 = vpow2.f32 %v1719_v31  ;;  %v1723_v37 = vmul.f32 1.442695, %v2622_v33  ;;  %v2623_v38 = vmul.f32 -1.702, %v1709_v29  ;;  %v2660_v39 = vmul.f32 -1.702, %v1928_v30 }
 0xad4   : > { %3205 = vpow2.f32 %v1938_v32  ;;  %v1942_v40 = vmul.f32 1.442695, %v2659_v36 }
 0xad5   : > { %3207 = vpow2.f32 %v1721_v34  ;;  %v1725_v41 = vmul.f32 1.442695, %v2623_v38  ;;  %v1944_v16 = vmul.f32 1.442695, %v2660_v39 }
 0xad6   : > { %3209 = vpow2.f32 %v1940_v35 }
 0xad7   : > { %3211 = vpow2.f32 %v1723_v37 }
 0xad8   : > { %3213 = vpow2.f32 %v1942_v40 }
 0xad9   : > { %3215 = vpow2.f32 %v1725_v41 }
 0xada   : > { %3217 = vpow2.f32 %v1944_v16 }
 0xadd   : > { %v3204_v42 = vpop.eup %3203 }
 0xade   : > { %v3206_v43 = vpop.eup %3205  ;;  %v1727_v27 = vadd.f32 1.0, %v3204_v42 }
 0xadf   : > { %v3208_v44 = vpop.eup %3207  ;;  %v1946_v45 = vadd.f32 1.0, %v3206_v43 }
 0xae0   : > { %v3210_v46 = vpop.eup %3209  ;;  %3219 = vrcp.f32 %v1727_v27  ;;  %v1728_v47 = vadd.f32 1.0, %v3208_v44 }
 0xae1   : > { %v3212_v48 = vpop.eup %3211  ;;  %3221 = vrcp.f32 %v1946_v45  ;;  %v1947_v52 = vadd.f32 1.0, %v3210_v46 }
 0xae2   : > { %v3214_v53 = vpop.eup %3213  ;;  %3223 = vrcp.f32 %v1728_v47  ;;  %v1729_v54 = vadd.f32 1.0, %v3212_v48 }
 0xae3   : > { %v3216_v55 = vpop.eup %3215  ;;  %3225 = vrcp.f32 %v1947_v52  ;;  %v1948_v57 = vadd.f32 1.0, %v3214_v53 }
 0xae4   : > { %v3218_v58 = vpop.eup %3217  ;;  %3227 = vrcp.f32 %v1729_v54  ;;  %v1730_v59 = vadd.f32 1.0, %v3216_v55 }
 0xae5   : > { %3229 = vrcp.f32 %v1948_v57  ;;  %v1949_v60 = vadd.f32 1.0, %v3218_v58 }
 0xae6   : > { %3231 = vrcp.f32 %v1730_v59 }
 0xae7   : > { %3233 = vrcp.f32 %v1949_v60 }
 0xaea   : > { %v3220_v61 = vpop.eup %3219 }
 0xaeb   : > { %v3222_v62 = vpop.eup %3221  ;;  %v1739_v6 = vmul.f32 %v3220_v61, %v4407_v15 }
 0xaec   : > { %v3224_v63 = vpop.eup %3223  ;;  %v1958_v10 = vmul.f32 %v3222_v62, %v4409_v17 }
 0xaed   : > { %v3226_v0 = vpop.eup %3225  ;;  %v1740_v13 = vmul.f32 %v3224_v63, %v4411_v19 }
 0xaee   : > { %v3228_v1 = vpop.eup %3227  ;;  %v1959_v18 = vmul.f32 %v3226_v0, %v4413_v20 }
 0xaef   : > { %v3230_v4 = vpop.eup %3229  ;;  %v1741_v7 = vmul.f32 %v3228_v1, %v1707_v25 }
 0xaf0   : > { %v3232_v8 = vpop.eup %3231  ;;  %v1960_v11 = vmul.f32 %v3230_v4, %v1926_v56  ;;  %v2275_v56 = vsub.s32 5, %v4209_v49 }
 0xaf1   : > { %v3234_v12 = vpop.eup %3233  ;;  %v1743_v14 = vpack.c.bf16 %v1741_v7, %v1739_v6  ;;  %v1742_v9 = vmul.f32 %v3232_v8, %v1709_v29 }
 0xaf2   : > { %v1962_v21 = vpack.c.bf16 %v1960_v11, %v1958_v10  ;;  %v1961_v22 = vmul.f32 %v3234_v12, %v1928_v30  ;;  %v2276_v32 = vrot.slane %v4215_v51, %v2275_v56 }
 0xaf3   : > { %v1744_v50 = vpack.c.bf16 %v1742_v9, %v1740_v13 }
 0xaf4   : > { %v1963_v23 = vpack.c.bf16 %v1961_v22, %v1959_v18 }
 0xaf5   : > { %2262 = vmatprep.mubr.bf16.mxu0 %v1744_v50 }
 0xaf6   : > { %2125 = vmatprep.mubr.bf16.mxu1 %v1963_v23  ;;  %2263 = vmatmul.mubr.bf16.vlgmr.msra.gmra.mrb[20].mxu0 %v1743_v14 }
 0xaf7   : > { %2126 = vmatmul.mubr.bf16.vlgmr.msra.gmra.mrb[32].mxu1 %v1962_v21 }
 0xbc9   : > { %v2808_v15 = vpop.f32.mrb[20].mxu0 }
 0xbca   : > { %v2786_v25 = vpop.f32.mrb[32].mxu1  ;;  %v2809_v17 = vpop.f32.mrb[21].mxu0 }
 0xbcb   : > { %v2787_v19 = vpop.f32.mrb[33].mxu1  ;;  %v2810_v26 = vadd.f32 %v2809_v17, %v2808_v15  ;;  %v2811_v2 = vpop.f32.mrb[22].mxu0 }
 0xbcc   : > { %v2788_v5 = vadd.f32 %v2787_v19, %v2786_v25  ;;  %v2789_v20 = vpop.f32.mrb[34].mxu1  ;;  %v2812_v3 = vpop.f32.mrb[23].mxu0 }
 0xbcd   : > { %v2790_v29 = vpop.f32.mrb[35].mxu1  ;;  %v2813_v30 = vadd.f32 %v2812_v3, %v2811_v2 }
 0xbce   : > { %v2265_v31 = vadd.f32 %v2810_v26, %v2788_v5  ;;  %v2791_v33 = vadd.f32 %v2790_v29, %v2789_v20 }
 0xbd0   : > { %v2271_v34 = vadd.f32 %v2265_v31, %v4320_v24  ;;  %v2268_v35 = vadd.f32 %v2813_v30, %v2791_v33 }
 0xbd2   : > { %v2277_v49 = vadd.f32 %v2276_v32, %v2271_v34  ;;  %v2272_v36 = vadd.f32 %v2268_v35, %v4323_v28 }
 0xbd4   : > { %2279 = vst [vmem:[%s4153_s25] sm:$0xff] %v2277_v49  ;;  %v2278_v51 = vadd.f32 %v2276_v32, %v2272_v36 }
 0xbd6   : > { %2280 = vst [vmem:[%s4153_s25 + $0x8] sm:$0xff] %v2278_v51 }
 0xbd7   : > { %3488 = shalt.err (!%p3485_p2)
}
 0xbd8   : > { %s3489_s28 = scalar_lea.hbm %s4432_s27, 256  ;;  %s3493_s0 = scalar_lea.hbm %s4591_s24, 512 }
 0xbd9   : > { %p3490_p1 = scmp.ne.s32.totalorder %s4432_s27, %s3489_s28  ;;  %p3494_p7 = scmp.lt.u32.totalorder %s4432_s27, %s4591_s24 }
 0xbda   : > { %p3495_p3 = scmp.lt.u32.totalorder %s3493_s0, %s3489_s28  ;;  %p3497_p5 = scmp.lt.u32.totalorder %s3489_s28, %s4432_s27 }
 0xbdb   : > { %p3491_p12 = pnand %p3490_p1, %p4592_p6 }
 0xbdc   : > { %p3496_p11 = por %p3495_p3, %p3494_p7 }
 0xbdd   : > { %p3492_p10 = pneg %p3491_p12 }
 0xbde   : > { %p3498_p9 = por %p3497_p5, %p3496_p11 }
 0xbe0   : > { %p3499_p8 = pnand %p3498_p9, %p3492_p10 }
 0xbe2   : > { %3502 = shalt.err (!%p3499_p8)
}
 0xbe3   : > { %s3636_s25 = smov 128   ;;  %s3637_s17 = smov 8  }
 0xbe4   : > { %2924 = dma.vmem_to_hbm [thread:$0]  (%p4592_p6), %s4434_s8, 256, %s4432_s27, %s2282_s2, %s3636_s25, %s3636_s25, %s3637_s17  }
 0xbe5 PF: > { %s4593_s19 = sld [smem:[#allocation36_spill]]  ;;  %p2956_p13 = scmp.ge.s32.totalorder %s3613_s15, 2 }
 0xbe6   : > { %s2310_s23 = sand.u32 1, %s3585_s30  }
 0xbe7   : > { %s2311_s6 = scalar_lea.sflag [#allocation6], %s2310_s23 }
 0xbeb   : > { %p4594_p0 = scmp.ne.s32.totalorder %s4593_s19, 0 }
 0xbed   : > { %p2952_p4 = pnand %p2956_p13, %p4594_p0 }
 0xbef   : > { %3568 = dma.done.wait (!%p2952_p4), %s2311_s6, 256  }
 0xbf0   : > { %3570 = vsyncadd (!%p2952_p4), %s2311_s6, 4294967040  ;;  %s36_s15 = sadd.s32 1, %s3613_s15   ;;  %s4595_s27 = sld [smem:[#allocation25_spill]] }
 0xbf1   : > { %p33_p2 = scmp.ge.s32.totalorder %s36_s15, 6   ;;  %s4596_s28 = sld [smem:[#allocation26_spill]] }
 0xbf2   : > { %s4597_s29 = sld [smem:[#allocation34_spill]]  ;;  %s4598_s26 = sld [smem:[#allocation27_spill]] }
 0xbf3   : > { %s4599_s10 = sld [smem:[#allocation35_spill]]  ;;  %s4600_s12 = sld [smem:[#allocation30_spill]] }
 0xbf4   : > { %s4601_s8 = sld [smem:[#allocation32_spill]]  ;;  %s4602_s14 = sld [smem:[#allocation33_spill]] }
 0xbf5   : > { %s4603_s30 = smov %s3589_s9  ;;  %s4605_s11 = smov %s3605_s13 }
 0xbf6   :  { %35 = sbr.rel (!%p33_p2) target bundleno = 26 (0x1a), region = 192 }
 0xbf8   : > { %s4604_s9 = smov %s4598_s26 }
 0xbfa   : > { %s4606_s13 = smov %s4601_s8 }
 0xbfd   :  { %2316 = vsyncpa [#allocation5], 1 }
 0xbfe   :  { %2318 = vsyncpa [#allocation5 + $0x1], 1 }
 0xbff   :  { %2319 = vsyncpa [#allocation8], 1 }
 0xc00   :  { %2321 = vsyncpa [#allocation8 + $0x1], 1 }
 0xc01   :  { %2322 = vsyncpa [#allocation11], 1 }
 0xc02   :  { %2324 = vsyncpa [#allocation11 + $0x1], 1 }
 0xc03   :  { %2325 = vsyncpa [#allocation14], 1 }
 0xc04   :  { %2327 = vsyncpa [#allocation14 + $0x1], 1 }
 0xc05   :  { %2328 = vsyncpa [#allocation17], 1 }
 0xc06   :  { %2330 = vsyncpa [#allocation17 + $0x1], 1 }
 0xc07   :  { %2331 = vsyncpa [#allocation6], 1 }
 0xc08   :  { %2333 = vsyncpa [#allocation6 + $0x1], 1 }

</bundles_post_ra>
